<compile_context>
chip_gen: v7x
topology: tpu7x:2x2x1
jax: 0.10.0
libtpu: 0.0.40
codegen_flags: <defaults>
</compile_context>

<pallas_src>
import functools

import numpy as np
import jax
import jax.numpy as jnp
from jax.experimental import pallas as pl
from jax.experimental.pallas import tpu as pltpu


def _controller_sample_kernel(
        # inputs (all fully VMEM-resident, single block each)
        enc_ref, w_ref, b_ref, wdec_ref, bdec_ref, gum_ref,
        # outputs
        logits_ref, act_ref, hxo_ref, cxo_ref,
        *, hid, tanh_c, train, num_tokens, offsets, batch):
    f32 = jnp.float32
    num_steps = len(num_tokens)
    s_pad = gum_ref.shape[-1]
    hp = jax.lax.Precision.HIGHEST

    w = w_ref[...]                      # (2H, 4H) fused LSTM weight (resident)
    b = b_ref[...]                      # (1, 4H)  fused LSTM bias

    # gate-type mask (PyTorch order i,f,g,o: tanh on g block, sigmoid elsewhere)
    lane = jax.lax.broadcasted_iota(jnp.int32, (batch, 4 * hid), 1)
    is_g = (lane >= 2 * hid) & (lane < 3 * hid)

    x = jnp.zeros((batch, hid), f32)    # static zero input for step 0 (is_embed)
    hx = jnp.zeros((batch, hid), f32)   # init_hidden
    cx = jnp.zeros((batch, hid), f32)

    for t in range(num_steps):          # fully unrolled recurrent loop
        # ---- LSTMCell: fused [x | hx] @ [W_ih^T ; W_hh^T] + (b_ih + b_hh) ----
        xh = jnp.concatenate([x, hx], axis=-1)                  # (B, 2H)
        gates = jnp.dot(xh, w, preferred_element_type=jnp.float32,
                        precision=hp) + b                       # (B, 4H)
        # single tanh pass: sigmoid(z) = 0.5*(1 + tanh(z/2))
        th = jnp.tanh(jnp.where(is_g, gates, 0.5 * gates))
        gact = jnp.where(is_g, th, 0.5 * (1.0 + th))
        i_g = gact[:, 0 * hid:1 * hid]
        f_g = gact[:, 1 * hid:2 * hid]
        g_g = gact[:, 2 * hid:3 * hid]
        o_g = gact[:, 3 * hid:4 * hid]
        cx = f_g * cx + i_g * g_g
        hx = o_g * jnp.tanh(cx)

        # ---- decoders[t](hx); 1/softmax_temperature pre-folded into wdec/bdec ----
        logits = (jnp.dot(hx, wdec_ref[t], preferred_element_type=jnp.float32,
                          precision=hp) + bdec_ref[t])          # (B, S_pad)
        if train:                                               # args.mode == 'train'
            logits = tanh_c * jnp.tanh(logits)
        logits_ref[t] = logits          # lane-dense store into resident output

        # ---- multinomial sampling: Gumbel-max with precomputed noise
        #      (-1e30 padding mask already folded into gum_ref) ----
        scores = logits + gum_ref[t]
        m = jnp.max(scores, axis=-1, keepdims=True)
        col = jax.lax.broadcasted_iota(jnp.int32, scores.shape, 1)
        action = jnp.min(jnp.where(scores >= m, col, s_pad),
                         axis=-1, keepdims=True)                # (B, 1) int32
        act_ref[t] = action

        # ---- next-step input: encoder(action + sum(num_tokens[:t])) ----
        # select-accumulate over the <=8 valid table rows at a static offset;
        # pure VPU compare/select/add work, no MXU push on the recurrence.
        if t + 1 < num_steps:
            emb = jnp.zeros((batch, hid), f32)
            for r in range(num_tokens[t]):
                a = offsets[t] + r
                row = enc_ref[a:a + 1, :]                       # (1, H) static slice
                sel = (action == r).astype(f32)                 # (B, 1)
                emb = emb + sel * row
            x = emb

    hxo_ref[...] = hx
    cxo_ref[...] = cx


def controller_sample(enc_table, w_lstm, b_lstm, dec_w_stack, dec_b_stack,
                      gumbel_masked, *, num_tokens, batch_size, hidden,
                      tanh_c, train):
    """Runs the full sequential sampling loop in one grid-less pallas_call.

    Returns (logits_slab (steps,B,S_pad), actions (steps,B,1), hx (B,H), cx (B,H)).
    """
    num_tokens = tuple(int(s) for s in num_tokens)
    num_steps = len(num_tokens)
    S_pad = dec_w_stack.shape[-1]

    offsets, acc = [], 0
    for s in num_tokens:                      # sum(num_tokens[:t]) as constants
        offsets.append(acc)
        acc += s
    offsets = tuple(offsets)

    kernel = functools.partial(
        _controller_sample_kernel,
        hid=hidden, tanh_c=tanh_c, train=train,
        num_tokens=num_tokens, offsets=offsets, batch=batch_size)

    vmem = lambda: pl.BlockSpec(memory_space=pltpu.MemorySpace.VMEM)

    out_shape = (
        jax.ShapeDtypeStruct((num_steps, batch_size, S_pad), jnp.float32),
        jax.ShapeDtypeStruct((num_steps, batch_size, 1), jnp.int32),
        jax.ShapeDtypeStruct((batch_size, hidden), jnp.float32),
        jax.ShapeDtypeStruct((batch_size, hidden), jnp.float32),
    )
    return pl.pallas_call(
        kernel,
        out_shape=out_shape,
        in_specs=[vmem() for _ in range(6)],
        out_specs=(vmem(), vmem(), vmem(), vmem()),
    )(enc_table, w_lstm, b_lstm, dec_w_stack, dec_b_stack, gumbel_masked)


if __name__ == "__main__":
    # --- synthetic args (matching the PyTorch module's __init__ semantics) ---
    B = 2                          # sample(batch_size=2)
    H = 32                         # args.controller_hid_size
    n_aug, n_mag = 8, 4            # len(args.augment_types), len(args.magnitude_types)
    op_num, subpolicy_num = 2, 2   # args.op_num_pre_subpolicy, args.subpolicy_num
    num_tokens = [n_aug, n_mag] * op_num * subpolicy_num   # 8 steps
    num_steps = len(num_tokens)
    T = sum(num_tokens)
    S_PAD = 128                    # lane-dense padded decoder width
    temperature = 5.0              # args.softmax_temperature
    tanh_c = 2.5                   # args.tanh_c
    train = True                   # args.mode == 'train'
    init_range = 0.1

    key = jax.random.PRNGKey(0)
    keys = jax.random.split(key, 7)
    uni = lambda k, shape: jax.random.uniform(k, shape, jnp.float32,
                                              -init_range, init_range)

    # PyTorch-layout parameters (uniform(-0.1, 0.1); decoder biases zero)
    encoder_table = uni(keys[0], (T, H))                 # nn.Embedding
    w_ih = uni(keys[1], (4 * H, H))                      # LSTMCell weight_ih
    w_hh = uni(keys[2], (4 * H, H))                      # LSTMCell weight_hh
    b_ih = uni(keys[3], (4 * H,))
    b_hh = uni(keys[4], (4 * H,))
    dec_keys = jax.random.split(keys[5], num_steps)
    dec_ws = [uni(k, (s, H)) for k, s in zip(dec_keys, num_tokens)]
    dec_bs = [jnp.zeros((s,), jnp.float32) for s in num_tokens]

    # --- one-time constant folds for the kernel operands ---
    w_lstm = jnp.concatenate([w_ih.T, w_hh.T], axis=0)   # (2H, 4H)
    b_lstm = (b_ih + b_hh)[None, :]                      # (1, 4H)

    dec_w_stack = np.zeros((num_steps, H, S_PAD), np.float32)
    dec_b_stack = np.zeros((num_steps, 1, S_PAD), np.float32)
    neg_mask = np.zeros((num_steps, 1, S_PAD), np.float32)
    for t, s in enumerate(num_tokens):
        dec_w_stack[t, :, :s] = np.asarray(dec_ws[t]).T / temperature   # fold 1/temperature
        dec_b_stack[t, 0, :s] = np.asarray(dec_bs[t]) / temperature
        neg_mask[t, 0, s:] = -1e30
    dec_w_stack = jnp.asarray(dec_w_stack)
    dec_b_stack = jnp.asarray(dec_b_stack)

    # Gumbel noise for the multinomial sampling, precomputed OFF the recurrent
    # critical path, with the padding mask folded in (padded lanes never win).
    gumbel = jax.random.gumbel(keys[6], (num_steps, B, S_PAD), jnp.float32)
    gumbel_masked = gumbel + jnp.asarray(neg_mask)

    logits_slab, actions3, hx, cx = controller_sample(
        encoder_table, w_lstm, b_lstm, dec_w_stack, dec_b_stack, gumbel_masked,
        num_tokens=num_tokens, batch_size=B, hidden=H, tanh_c=tanh_c, train=train)
    jax.block_until_ready((logits_slab, actions3, hx, cx))
    actions = np.asarray(actions3[:, :, 0])              # (num_steps, B)

    # --- host-side sample() statistics (entropy / selected log-prob) from the slab ---
    valid_np = np.zeros((num_steps, 1, S_PAD), bool)
    for t, s in enumerate(num_tokens):
        valid_np[t, 0, :s] = True
    valid = jnp.asarray(valid_np)
    masked = jnp.where(valid, logits_slab, -jnp.inf)
    logp = jax.nn.log_softmax(masked, axis=-1)
    probs = jnp.exp(logp)
    entropies = -jnp.sum(jnp.where(valid, probs * logp, 0.0), axis=-1).sum()
    log_probs = jnp.take_along_axis(
        logp, jnp.asarray(actions)[..., None], axis=-1)[..., 0].sum()
    jax.block_until_ready((entropies, log_probs))
    # TODO(synk): _get_sub_policies policy-dict assembly is host-side Python bookkeeping.

    # --- correctness: replay the kernel's sampled actions through a pure-JAX reference ---
    def reference_replay(acts):
        hp = jax.lax.Precision.HIGHEST
        rhx = jnp.zeros((B, H), jnp.float32)
        rcx = jnp.zeros((B, H), jnp.float32)
        x = jnp.zeros((B, H), jnp.float32)
        outs, off = [], 0
        for t, s in enumerate(num_tokens):
            gates = (jnp.dot(x, w_ih.T, precision=hp) + b_ih
                     + jnp.dot(rhx, w_hh.T, precision=hp) + b_hh)
            i = jax.nn.sigmoid(gates[:, 0 * H:1 * H])
            f = jax.nn.sigmoid(gates[:, 1 * H:2 * H])
            g = jnp.tanh(gates[:, 2 * H:3 * H])
            o = jax.nn.sigmoid(gates[:, 3 * H:4 * H])
            rcx = f * rcx + i * g
            rhx = o * jnp.tanh(rcx)
            lg = (jnp.dot(rhx, dec_ws[t].T, precision=hp) + dec_bs[t]) / temperature
            if train:
                lg = tanh_c * jnp.tanh(lg)
            outs.append(lg)
            x = encoder_table[acts[t] + off]
            off += s
        return outs, rhx, rcx

    ref_logits, ref_hx, ref_cx = reference_replay(actions)

    assert logits_slab.shape == (num_steps, B, S_PAD)
    assert actions3.shape == (num_steps, B, 1)
    assert hx.shape == (B, H) and cx.shape == (B, H)
    assert bool(jnp.all(jnp.isfinite(logits_slab)))
    max_diff = 0.0
    for t, s in enumerate(num_tokens):
        assert actions[t].min() >= 0 and actions[t].max() < s
        max_diff = max(max_diff,
                       float(jnp.max(jnp.abs(logits_slab[t, :, :s] - ref_logits[t]))))
    max_diff = max(max_diff,
                   float(jnp.max(jnp.abs(hx - ref_hx))),
                   float(jnp.max(jnp.abs(cx - ref_cx))))
    assert max_diff < 1e-3, max_diff

    print("KERNEL_OK")
</pallas_src>

<mosaic_0001>
module attributes {stable_mosaic.version = 11 : i64} {
  func.func @_controller_sample_kernel(%arg0: memref<48x32xf32, #tpu.memory_space<vmem>>, %arg1: memref<64x128xf32, #tpu.memory_space<vmem>>, %arg2: memref<1x128xf32, #tpu.memory_space<vmem>>, %arg3: memref<8x32x128xf32, #tpu.memory_space<vmem>>, %arg4: memref<8x1x128xf32, #tpu.memory_space<vmem>>, %arg5: memref<8x2x128xf32, #tpu.memory_space<vmem>>, %arg6: memref<8x2x128xf32, #tpu.memory_space<vmem>>, %arg7: memref<8x2x1xi32, #tpu.memory_space<vmem>>, %arg8: memref<2x32xf32, #tpu.memory_space<vmem>>, %arg9: memref<2x32xf32, #tpu.memory_space<vmem>>) attributes {dimension_semantics = [], scalar_prefetch = 0 : i64, scratch_operands = 0 : i64, tpu.core_type = #tpu.core_type<tc>} {
    %c0 = arith.constant 0 : index
    %c0_0 = arith.constant 0 : index
    %0 = vector.load %arg1[%c0, %c0_0] : memref<64x128xf32, #tpu.memory_space<vmem>>, vector<64x128xf32>
    %c0_1 = arith.constant 0 : index
    %c0_2 = arith.constant 0 : index
    %1 = vector.load %arg2[%c0_1, %c0_2] : memref<1x128xf32, #tpu.memory_space<vmem>>, vector<1x128xf32>
    %2 = tpu.iota {dimensions = array<i32: 1>} : vector<2x128xi32>
    %c64_i32 = arith.constant 64 : i32
    %3 = vector.broadcast %c64_i32 : i32 to vector<2x128xi32>
    %4 = arith.cmpi sge, %2, %3 : vector<2x128xi32>
    %c96_i32 = arith.constant 96 : i32
    %5 = vector.broadcast %c96_i32 : i32 to vector<2x128xi32>
    %6 = arith.cmpi slt, %2, %5 : vector<2x128xi32>
    %7 = arith.andi %4, %6 : vector<2x128xi1>
    %cst = arith.constant 0.000000e+00 : f32
    %8 = vector.broadcast %cst : f32 to vector<2x32xf32>
    %cst_3 = arith.constant 0.000000e+00 : f32
    %9 = vector.broadcast %cst_3 : f32 to vector<2x32xf32>
    %cst_4 = arith.constant 0.000000e+00 : f32
    %10 = vector.broadcast %cst_4 : f32 to vector<2x32xf32>
    %11 = tpu.concatenate %8, %9 in 1 : vector<2x32xf32>, vector<2x32xf32> -> vector<2x64xf32>
    %cst_5 = arith.constant dense<0.000000e+00> : vector<2x128xf32>
    %12 = tpu.matmul %11, %0, %cst_5 {dimension_numbers = #tpu.dot_dimension_numbers<[1], [0], [0], [1], [0, 0, 1, 1], [], []>, precision = #tpu.contract_precision<fp32>} : vector<2x64xf32>, vector<64x128xf32>, vector<2x128xf32> -> vector<2x128xf32>
    %13 = vector.broadcast %1 : vector<1x128xf32> to vector<2x128xf32>
    %14 = arith.addf %12, %13 : vector<2x128xf32>
    %cst_6 = arith.constant 5.000000e-01 : f32
    %15 = vector.broadcast %cst_6 : f32 to vector<2x128xf32>
    %16 = arith.mulf %15, %14 : vector<2x128xf32>
    %17 = arith.select %7, %14, %16 : vector<2x128xi1>, vector<2x128xf32>
    %18 = math.tanh %17 : vector<2x128xf32>
    %cst_7 = arith.constant 1.000000e+00 : f32
    %19 = vector.broadcast %cst_7 : f32 to vector<2x128xf32>
    %20 = arith.addf %19, %18 : vector<2x128xf32>
    %cst_8 = arith.constant 5.000000e-01 : f32
    %21 = vector.broadcast %cst_8 : f32 to vector<2x128xf32>
    %22 = arith.mulf %21, %20 : vector<2x128xf32>
    %23 = arith.select %7, %18, %22 : vector<2x128xi1>, vector<2x128xf32>
    %24 = vector.extract_strided_slice %23 {offsets = [0, 0], sizes = [2, 32], strides = [1, 1]} : vector<2x128xf32> to vector<2x32xf32>
    %25 = vector.extract_strided_slice %23 {offsets = [0, 32], sizes = [2, 32], strides = [1, 1]} : vector<2x128xf32> to vector<2x32xf32>
    %26 = vector.extract_strided_slice %23 {offsets = [0, 64], sizes = [2, 32], strides = [1, 1]} : vector<2x128xf32> to vector<2x32xf32>
    %27 = vector.extract_strided_slice %23 {offsets = [0, 96], sizes = [2, 32], strides = [1, 1]} : vector<2x128xf32> to vector<2x32xf32>
    %28 = arith.mulf %25, %10 : vector<2x32xf32>
    %29 = arith.mulf %24, %26 : vector<2x32xf32>
    %30 = arith.addf %28, %29 : vector<2x32xf32>
    %31 = math.tanh %30 : vector<2x32xf32>
    %32 = arith.mulf %27, %31 : vector<2x32xf32>
    %c0_9 = arith.constant 0 : index
    %c0_10 = arith.constant 0 : index
    %c0_11 = arith.constant 0 : index
    %33 = vector.load %arg3[%c0_9, %c0_10, %c0_11] : memref<8x32x128xf32, #tpu.memory_space<vmem>>, vector<1x32x128xf32>
    %34 = vector.shape_cast %33 : vector<1x32x128xf32> to vector<32x128xf32>
    %cst_12 = arith.constant dense<0.000000e+00> : vector<2x128xf32>
    %35 = tpu.matmul %32, %34, %cst_12 {dimension_numbers = #tpu.dot_dimension_numbers<[1], [0], [0], [1], [0, 0, 1, 1], [], []>, precision = #tpu.contract_precision<fp32>} : vector<2x32xf32>, vector<32x128xf32>, vector<2x128xf32> -> vector<2x128xf32>
    %c0_13 = arith.constant 0 : index
    %c0_14 = arith.constant 0 : index
    %c0_15 = arith.constant 0 : index
    %36 = vector.load %arg4[%c0_13, %c0_14, %c0_15] : memref<8x1x128xf32, #tpu.memory_space<vmem>>, vector<1x1x128xf32>
    %37 = vector.shape_cast %36 : vector<1x1x128xf32> to vector<1x128xf32>
    %38 = vector.broadcast %37 : vector<1x128xf32> to vector<2x128xf32>
    %39 = arith.addf %35, %38 : vector<2x128xf32>
    %40 = math.tanh %39 : vector<2x128xf32>
    %cst_16 = arith.constant 2.500000e+00 : f32
    %41 = vector.broadcast %cst_16 : f32 to vector<2x128xf32>
    %42 = arith.mulf %41, %40 : vector<2x128xf32>
    %c0_17 = arith.constant 0 : index
    %c0_18 = arith.constant 0 : index
    %c0_19 = arith.constant 0 : index
    %43 = vector.load %arg6[%c0_17, %c0_18, %c0_19] : memref<8x2x128xf32, #tpu.memory_space<vmem>>, vector<1x2x128xf32>
    %44 = vector.shape_cast %43 : vector<1x2x128xf32> to vector<2x128xf32>
    %45 = vector.shape_cast %42 : vector<2x128xf32> to vector<1x2x128xf32>
    tpu.vector_store %arg6[%c0_17, %c0_18, %c0_19], %45 {strides = array<i32>} : memref<8x2x128xf32, #tpu.memory_space<vmem>>, vector<1x2x128xf32>,
    %c0_20 = arith.constant 0 : index
    %c0_21 = arith.constant 0 : index
    %c0_22 = arith.constant 0 : index
    %46 = vector.load %arg5[%c0_20, %c0_21, %c0_22] : memref<8x2x128xf32, #tpu.memory_space<vmem>>, vector<1x2x128xf32>
    %47 = vector.shape_cast %46 : vector<1x2x128xf32> to vector<2x128xf32>
    %48 = arith.addf %42, %47 : vector<2x128xf32>
    %cst_23 = arith.constant dense<0xFF800000> : vector<2xf32>
    %49 = vector.multi_reduction <maximumf>, %48, %cst_23 [1] : vector<2x128xf32> to vector<2xf32>
    %50 = vector.shape_cast %49 : vector<2xf32> to vector<2x1xf32>
    %51 = tpu.iota {dimensions = array<i32: 1>} : vector<2x128xi32>
    %52 = vector.broadcast %50 : vector<2x1xf32> to vector<2x128xf32>
    %53 = arith.cmpf oge, %48, %52 : vector<2x128xf32>
    %c128_i32 = arith.constant 128 : i32
    %54 = vector.broadcast %c128_i32 : i32 to vector<2x128xi32>
    %55 = arith.select %53, %51, %54 : vector<2x128xi1>, vector<2x128xi32>
    %cst_24 = arith.constant dense<2147483647> : vector<2xi32>
    %56 = vector.multi_reduction <minsi>, %55, %cst_24 [1] : vector<2x128xi32> to vector<2xi32>
    %57 = vector.shape_cast %56 : vector<2xi32> to vector<2x1xi32>
    %c0_25 = arith.constant 0 : index
    %c0_26 = arith.constant 0 : index
    %c0_27 = arith.constant 0 : index
    %58 = vector.load %arg7[%c0_25, %c0_26, %c0_27] : memref<8x2x1xi32, #tpu.memory_space<vmem>>, vector<1x2x1xi32>
    %59 = vector.shape_cast %58 : vector<1x2x1xi32> to vector<2x1xi32>
    %60 = vector.shape_cast %57 : vector<2x1xi32> to vector<1x2x1xi32>
    tpu.vector_store %arg7[%c0_25, %c0_26, %c0_27], %60 {strides = array<i32>} : memref<8x2x1xi32, #tpu.memory_space<vmem>>, vector<1x2x1xi32>,
    %cst_28 = arith.constant 0.000000e+00 : f32
    %61 = vector.broadcast %cst_28 : f32 to vector<2x32xf32>
    %c0_29 = arith.constant 0 : index
    %c0_30 = arith.constant 0 : index
    %62 = vector.load %arg0[%c0_29, %c0_30] : memref<48x32xf32, #tpu.memory_space<vmem>>, vector<1x32xf32>
    %c0_i32 = arith.constant 0 : i32
    %63 = vector.broadcast %c0_i32 : i32 to vector<2x1xi32>
    %64 = arith.cmpi eq, %57, %63 : vector<2x1xi32>
    %65 = arith.extui %64 : vector<2x1xi1> to vector<2x1xi32>
    %66 = arith.sitofp %65 : vector<2x1xi32> to vector<2x1xf32>
    %67 = vector.broadcast %66 : vector<2x1xf32> to vector<2x32xf32>
    %68 = vector.broadcast %62 : vector<1x32xf32> to vector<2x32xf32>
    %69 = arith.mulf %67, %68 : vector<2x32xf32>
    %70 = arith.addf %61, %69 : vector<2x32xf32>
    %c1 = arith.constant 1 : index
    %c0_31 = arith.constant 0 : index
    %71 = vector.load %arg0[%c1, %c0_31] : memref<48x32xf32, #tpu.memory_space<vmem>>, vector<1x32xf32>
    %c1_i32 = arith.constant 1 : i32
    %72 = vector.broadcast %c1_i32 : i32 to vector<2x1xi32>
    %73 = arith.cmpi eq, %57, %72 : vector<2x1xi32>
    %74 = arith.extui %73 : vector<2x1xi1> to vector<2x1xi32>
    %75 = arith.sitofp %74 : vector<2x1xi32> to vector<2x1xf32>
    %76 = vector.broadcast %75 : vector<2x1xf32> to vector<2x32xf32>
    %77 = vector.broadcast %71 : vector<1x32xf32> to vector<2x32xf32>
    %78 = arith.mulf %76, %77 : vector<2x32xf32>
    %79 = arith.addf %70, %78 : vector<2x32xf32>
    %c2 = arith.constant 2 : index
    %c0_32 = arith.constant 0 : index
    %80 = vector.load %arg0[%c2, %c0_32] : memref<48x32xf32, #tpu.memory_space<vmem>>, vector<1x32xf32>
    %c2_i32 = arith.constant 2 : i32
    %81 = vector.broadcast %c2_i32 : i32 to vector<2x1xi32>
    %82 = arith.cmpi eq, %57, %81 : vector<2x1xi32>
    %83 = arith.extui %82 : vector<2x1xi1> to vector<2x1xi32>
    %84 = arith.sitofp %83 : vector<2x1xi32> to vector<2x1xf32>
    %85 = vector.broadcast %84 : vector<2x1xf32> to vector<2x32xf32>
    %86 = vector.broadcast %80 : vector<1x32xf32> to vector<2x32xf32>
    %87 = arith.mulf %85, %86 : vector<2x32xf32>
    %88 = arith.addf %79, %87 : vector<2x32xf32>
    %c3 = arith.constant 3 : index
    %c0_33 = arith.constant 0 : index
    %89 = vector.load %arg0[%c3, %c0_33] : memref<48x32xf32, #tpu.memory_space<vmem>>, vector<1x32xf32>
    %c3_i32 = arith.constant 3 : i32
    %90 = vector.broadcast %c3_i32 : i32 to vector<2x1xi32>
    %91 = arith.cmpi eq, %57, %90 : vector<2x1xi32>
    %92 = arith.extui %91 : vector<2x1xi1> to vector<2x1xi32>
    %93 = arith.sitofp %92 : vector<2x1xi32> to vector<2x1xf32>
    %94 = vector.broadcast %93 : vector<2x1xf32> to vector<2x32xf32>
    %95 = vector.broadcast %89 : vector<1x32xf32> to vector<2x32xf32>
    %96 = arith.mulf %94, %95 : vector<2x32xf32>
    %97 = arith.addf %88, %96 : vector<2x32xf32>
    %c4 = arith.constant 4 : index
    %c0_34 = arith.constant 0 : index
    %98 = vector.load %arg0[%c4, %c0_34] : memref<48x32xf32, #tpu.memory_space<vmem>>, vector<1x32xf32>
    %c4_i32 = arith.constant 4 : i32
    %99 = vector.broadcast %c4_i32 : i32 to vector<2x1xi32>
    %100 = arith.cmpi eq, %57, %99 : vector<2x1xi32>
    %101 = arith.extui %100 : vector<2x1xi1> to vector<2x1xi32>
    %102 = arith.sitofp %101 : vector<2x1xi32> to vector<2x1xf32>
    %103 = vector.broadcast %102 : vector<2x1xf32> to vector<2x32xf32>
    %104 = vector.broadcast %98 : vector<1x32xf32> to vector<2x32xf32>
    %105 = arith.mulf %103, %104 : vector<2x32xf32>
    %106 = arith.addf %97, %105 : vector<2x32xf32>
    %c5 = arith.constant 5 : index
    %c0_35 = arith.constant 0 : index
    %107 = vector.load %arg0[%c5, %c0_35] : memref<48x32xf32, #tpu.memory_space<vmem>>, vector<1x32xf32>
    %c5_i32 = arith.constant 5 : i32
    %108 = vector.broadcast %c5_i32 : i32 to vector<2x1xi32>
    %109 = arith.cmpi eq, %57, %108 : vector<2x1xi32>
    %110 = arith.extui %109 : vector<2x1xi1> to vector<2x1xi32>
    %111 = arith.sitofp %110 : vector<2x1xi32> to vector<2x1xf32>
    %112 = vector.broadcast %111 : vector<2x1xf32> to vector<2x32xf32>
    %113 = vector.broadcast %107 : vector<1x32xf32> to vector<2x32xf32>
    %114 = arith.mulf %112, %113 : vector<2x32xf32>
    %115 = arith.addf %106, %114 : vector<2x32xf32>
    %c6 = arith.constant 6 : index
    %c0_36 = arith.constant 0 : index
    %116 = vector.load %arg0[%c6, %c0_36] : memref<48x32xf32, #tpu.memory_space<vmem>>, vector<1x32xf32>
    %c6_i32 = arith.constant 6 : i32
    %117 = vector.broadcast %c6_i32 : i32 to vector<2x1xi32>
    %118 = arith.cmpi eq, %57, %117 : vector<2x1xi32>
    %119 = arith.extui %118 : vector<2x1xi1> to vector<2x1xi32>
    %120 = arith.sitofp %119 : vector<2x1xi32> to vector<2x1xf32>
    %121 = vector.broadcast %120 : vector<2x1xf32> to vector<2x32xf32>
    %122 = vector.broadcast %116 : vector<1x32xf32> to vector<2x32xf32>
    %123 = arith.mulf %121, %122 : vector<2x32xf32>
    %124 = arith.addf %115, %123 : vector<2x32xf32>
    %c7 = arith.constant 7 : index
    %c0_37 = arith.constant 0 : index
    %125 = vector.load %arg0[%c7, %c0_37] : memref<48x32xf32, #tpu.memory_space<vmem>>, vector<1x32xf32>
    %c7_i32 = arith.constant 7 : i32
    %126 = vector.broadcast %c7_i32 : i32 to vector<2x1xi32>
    %127 = arith.cmpi eq, %57, %126 : vector<2x1xi32>
    %128 = arith.extui %127 : vector<2x1xi1> to vector<2x1xi32>
    %129 = arith.sitofp %128 : vector<2x1xi32> to vector<2x1xf32>
    %130 = vector.broadcast %129 : vector<2x1xf32> to vector<2x32xf32>
    %131 = vector.broadcast %125 : vector<1x32xf32> to vector<2x32xf32>
    %132 = arith.mulf %130, %131 : vector<2x32xf32>
    %133 = arith.addf %124, %132 : vector<2x32xf32>
    %134 = tpu.concatenate %133, %32 in 1 : vector<2x32xf32>, vector<2x32xf32> -> vector<2x64xf32>
    %cst_38 = arith.constant dense<0.000000e+00> : vector<2x128xf32>
    %135 = tpu.matmul %134, %0, %cst_38 {dimension_numbers = #tpu.dot_dimension_numbers<[1], [0], [0], [1], [0, 0, 1, 1], [], []>, precision = #tpu.contract_precision<fp32>} : vector<2x64xf32>, vector<64x128xf32>, vector<2x128xf32> -> vector<2x128xf32>
    %136 = vector.broadcast %1 : vector<1x128xf32> to vector<2x128xf32>
    %137 = arith.addf %135, %136 : vector<2x128xf32>
    %cst_39 = arith.constant 5.000000e-01 : f32
    %138 = vector.broadcast %cst_39 : f32 to vector<2x128xf32>
    %139 = arith.mulf %138, %137 : vector<2x128xf32>
    %140 = arith.select %7, %137, %139 : vector<2x128xi1>, vector<2x128xf32>
    %141 = math.tanh %140 : vector<2x128xf32>
    %cst_40 = arith.constant 1.000000e+00 : f32
    %142 = vector.broadcast %cst_40 : f32 to vector<2x128xf32>
    %143 = arith.addf %142, %141 : vector<2x128xf32>
    %cst_41 = arith.constant 5.000000e-01 : f32
    %144 = vector.broadcast %cst_41 : f32 to vector<2x128xf32>
    %145 = arith.mulf %144, %143 : vector<2x128xf32>
    %146 = arith.select %7, %141, %145 : vector<2x128xi1>, vector<2x128xf32>
    %147 = vector.extract_strided_slice %146 {offsets = [0, 0], sizes = [2, 32], strides = [1, 1]} : vector<2x128xf32> to vector<2x32xf32>
    %148 = vector.extract_strided_slice %146 {offsets = [0, 32], sizes = [2, 32], strides = [1, 1]} : vector<2x128xf32> to vector<2x32xf32>
    %149 = vector.extract_strided_slice %146 {offsets = [0, 64], sizes = [2, 32], strides = [1, 1]} : vector<2x128xf32> to vector<2x32xf32>
    %150 = vector.extract_strided_slice %146 {offsets = [0, 96], sizes = [2, 32], strides = [1, 1]} : vector<2x128xf32> to vector<2x32xf32>
    %151 = arith.mulf %148, %30 : vector<2x32xf32>
    %152 = arith.mulf %147, %149 : vector<2x32xf32>
    %153 = arith.addf %151, %152 : vector<2x32xf32>
    %154 = math.tanh %153 : vector<2x32xf32>
    %155 = arith.mulf %150, %154 : vector<2x32xf32>
    %c1_42 = arith.constant 1 : index
    %c0_43 = arith.constant 0 : index
    %c0_44 = arith.constant 0 : index
    %156 = vector.load %arg3[%c1_42, %c0_43, %c0_44] : memref<8x32x128xf32, #tpu.memory_space<vmem>>, vector<1x32x128xf32>
    %157 = vector.shape_cast %156 : vector<1x32x128xf32> to vector<32x128xf32>
    %cst_45 = arith.constant dense<0.000000e+00> : vector<2x128xf32>
    %158 = tpu.matmul %155, %157, %cst_45 {dimension_numbers = #tpu.dot_dimension_numbers<[1], [0], [0], [1], [0, 0, 1, 1], [], []>, precision = #tpu.contract_precision<fp32>} : vector<2x32xf32>, vector<32x128xf32>, vector<2x128xf32> -> vector<2x128xf32>
    %c1_46 = arith.constant 1 : index
    %c0_47 = arith.constant 0 : index
    %c0_48 = arith.constant 0 : index
    %159 = vector.load %arg4[%c1_46, %c0_47, %c0_48] : memref<8x1x128xf32, #tpu.memory_space<vmem>>, vector<1x1x128xf32>
    %160 = vector.shape_cast %159 : vector<1x1x128xf32> to vector<1x128xf32>
    %161 = vector.broadcast %160 : vector<1x128xf32> to vector<2x128xf32>
    %162 = arith.addf %158, %161 : vector<2x128xf32>
    %163 = math.tanh %162 : vector<2x128xf32>
    %cst_49 = arith.constant 2.500000e+00 : f32
    %164 = vector.broadcast %cst_49 : f32 to vector<2x128xf32>
    %165 = arith.mulf %164, %163 : vector<2x128xf32>
    %c1_50 = arith.constant 1 : index
    %c0_51 = arith.constant 0 : index
    %c0_52 = arith.constant 0 : index
    %166 = vector.load %arg6[%c1_50, %c0_51, %c0_52] : memref<8x2x128xf32, #tpu.memory_space<vmem>>, vector<1x2x128xf32>
    %167 = vector.shape_cast %166 : vector<1x2x128xf32> to vector<2x128xf32>
    %168 = vector.shape_cast %165 : vector<2x128xf32> to vector<1x2x128xf32>
    tpu.vector_store %arg6[%c1_50, %c0_51, %c0_52], %168 {strides = array<i32>} : memref<8x2x128xf32, #tpu.memory_space<vmem>>, vector<1x2x128xf32>,
    %c1_53 = arith.constant 1 : index
    %c0_54 = arith.constant 0 : index
    %c0_55 = arith.constant 0 : index
    %169 = vector.load %arg5[%c1_53, %c0_54, %c0_55] : memref<8x2x128xf32, #tpu.memory_space<vmem>>, vector<1x2x128xf32>
    %170 = vector.shape_cast %169 : vector<1x2x128xf32> to vector<2x128xf32>
    %171 = arith.addf %165, %170 : vector<2x128xf32>
    %cst_56 = arith.constant dense<0xFF800000> : vector<2xf32>
    %172 = vector.multi_reduction <maximumf>, %171, %cst_56 [1] : vector<2x128xf32> to vector<2xf32>
    %173 = vector.shape_cast %172 : vector<2xf32> to vector<2x1xf32>
    %174 = tpu.iota {dimensions = array<i32: 1>} : vector<2x128xi32>
    %175 = vector.broadcast %173 : vector<2x1xf32> to vector<2x128xf32>
    %176 = arith.cmpf oge, %171, %175 : vector<2x128xf32>
    %c128_i32_57 = arith.constant 128 : i32
    %177 = vector.broadcast %c128_i32_57 : i32 to vector<2x128xi32>
    %178 = arith.select %176, %174, %177 : vector<2x128xi1>, vector<2x128xi32>
    %cst_58 = arith.constant dense<2147483647> : vector<2xi32>
    %179 = vector.multi_reduction <minsi>, %178, %cst_58 [1] : vector<2x128xi32> to vector<2xi32>
    %180 = vector.shape_cast %179 : vector<2xi32> to vector<2x1xi32>
    %c1_59 = arith.constant 1 : index
    %c0_60 = arith.constant 0 : index
    %c0_61 = arith.constant 0 : index
    %181 = vector.load %arg7[%c1_59, %c0_60, %c0_61] : memref<8x2x1xi32, #tpu.memory_space<vmem>>, vector<1x2x1xi32>
    %182 = vector.shape_cast %181 : vector<1x2x1xi32> to vector<2x1xi32>
    %183 = vector.shape_cast %180 : vector<2x1xi32> to vector<1x2x1xi32>
    tpu.vector_store %arg7[%c1_59, %c0_60, %c0_61], %183 {strides = array<i32>} : memref<8x2x1xi32, #tpu.memory_space<vmem>>, vector<1x2x1xi32>,
    %cst_62 = arith.constant 0.000000e+00 : f32
    %184 = vector.broadcast %cst_62 : f32 to vector<2x32xf32>
    %c8 = arith.constant 8 : index
    %c0_63 = arith.constant 0 : index
    %185 = vector.load %arg0[%c8, %c0_63] : memref<48x32xf32, #tpu.memory_space<vmem>>, vector<1x32xf32>
    %c0_i32_64 = arith.constant 0 : i32
    %186 = vector.broadcast %c0_i32_64 : i32 to vector<2x1xi32>
    %187 = arith.cmpi eq, %180, %186 : vector<2x1xi32>
    %188 = arith.extui %187 : vector<2x1xi1> to vector<2x1xi32>
    %189 = arith.sitofp %188 : vector<2x1xi32> to vector<2x1xf32>
    %190 = vector.broadcast %189 : vector<2x1xf32> to vector<2x32xf32>
    %191 = vector.broadcast %185 : vector<1x32xf32> to vector<2x32xf32>
    %192 = arith.mulf %190, %191 : vector<2x32xf32>
    %193 = arith.addf %184, %192 : vector<2x32xf32>
    %c9 = arith.constant 9 : index
    %c0_65 = arith.constant 0 : index
    %194 = vector.load %arg0[%c9, %c0_65] : memref<48x32xf32, #tpu.memory_space<vmem>>, vector<1x32xf32>
    %c1_i32_66 = arith.constant 1 : i32
    %195 = vector.broadcast %c1_i32_66 : i32 to vector<2x1xi32>
    %196 = arith.cmpi eq, %180, %195 : vector<2x1xi32>
    %197 = arith.extui %196 : vector<2x1xi1> to vector<2x1xi32>
    %198 = arith.sitofp %197 : vector<2x1xi32> to vector<2x1xf32>
    %199 = vector.broadcast %198 : vector<2x1xf32> to vector<2x32xf32>
    %200 = vector.broadcast %194 : vector<1x32xf32> to vector<2x32xf32>
    %201 = arith.mulf %199, %200 : vector<2x32xf32>
    %202 = arith.addf %193, %201 : vector<2x32xf32>
    %c10 = arith.constant 10 : index
    %c0_67 = arith.constant 0 : index
    %203 = vector.load %arg0[%c10, %c0_67] : memref<48x32xf32, #tpu.memory_space<vmem>>, vector<1x32xf32>
    %c2_i32_68 = arith.constant 2 : i32
    %204 = vector.broadcast %c2_i32_68 : i32 to vector<2x1xi32>
    %205 = arith.cmpi eq, %180, %204 : vector<2x1xi32>
    %206 = arith.extui %205 : vector<2x1xi1> to vector<2x1xi32>
    %207 = arith.sitofp %206 : vector<2x1xi32> to vector<2x1xf32>
    %208 = vector.broadcast %207 : vector<2x1xf32> to vector<2x32xf32>
    %209 = vector.broadcast %203 : vector<1x32xf32> to vector<2x32xf32>
    %210 = arith.mulf %208, %209 : vector<2x32xf32>
    %211 = arith.addf %202, %210 : vector<2x32xf32>
    %c11 = arith.constant 11 : index
    %c0_69 = arith.constant 0 : index
    %212 = vector.load %arg0[%c11, %c0_69] : memref<48x32xf32, #tpu.memory_space<vmem>>, vector<1x32xf32>
    %c3_i32_70 = arith.constant 3 : i32
    %213 = vector.broadcast %c3_i32_70 : i32 to vector<2x1xi32>
    %214 = arith.cmpi eq, %180, %213 : vector<2x1xi32>
    %215 = arith.extui %214 : vector<2x1xi1> to vector<2x1xi32>
    %216 = arith.sitofp %215 : vector<2x1xi32> to vector<2x1xf32>
    %217 = vector.broadcast %216 : vector<2x1xf32> to vector<2x32xf32>
    %218 = vector.broadcast %212 : vector<1x32xf32> to vector<2x32xf32>
    %219 = arith.mulf %217, %218 : vector<2x32xf32>
    %220 = arith.addf %211, %219 : vector<2x32xf32>
    %221 = tpu.concatenate %220, %155 in 1 : vector<2x32xf32>, vector<2x32xf32> -> vector<2x64xf32>
    %cst_71 = arith.constant dense<0.000000e+00> : vector<2x128xf32>
    %222 = tpu.matmul %221, %0, %cst_71 {dimension_numbers = #tpu.dot_dimension_numbers<[1], [0], [0], [1], [0, 0, 1, 1], [], []>, precision = #tpu.contract_precision<fp32>} : vector<2x64xf32>, vector<64x128xf32>, vector<2x128xf32> -> vector<2x128xf32>
    %223 = vector.broadcast %1 : vector<1x128xf32> to vector<2x128xf32>
    %224 = arith.addf %222, %223 : vector<2x128xf32>
    %cst_72 = arith.constant 5.000000e-01 : f32
    %225 = vector.broadcast %cst_72 : f32 to vector<2x128xf32>
    %226 = arith.mulf %225, %224 : vector<2x128xf32>
    %227 = arith.select %7, %224, %226 : vector<2x128xi1>, vector<2x128xf32>
    %228 = math.tanh %227 : vector<2x128xf32>
    %cst_73 = arith.constant 1.000000e+00 : f32
    %229 = vector.broadcast %cst_73 : f32 to vector<2x128xf32>
    %230 = arith.addf %229, %228 : vector<2x128xf32>
    %cst_74 = arith.constant 5.000000e-01 : f32
    %231 = vector.broadcast %cst_74 : f32 to vector<2x128xf32>
    %232 = arith.mulf %231, %230 : vector<2x128xf32>
    %233 = arith.select %7, %228, %232 : vector<2x128xi1>, vector<2x128xf32>
    %234 = vector.extract_strided_slice %233 {offsets = [0, 0], sizes = [2, 32], strides = [1, 1]} : vector<2x128xf32> to vector<2x32xf32>
    %235 = vector.extract_strided_slice %233 {offsets = [0, 32], sizes = [2, 32], strides = [1, 1]} : vector<2x128xf32> to vector<2x32xf32>
    %236 = vector.extract_strided_slice %233 {offsets = [0, 64], sizes = [2, 32], strides = [1, 1]} : vector<2x128xf32> to vector<2x32xf32>
    %237 = vector.extract_strided_slice %233 {offsets = [0, 96], sizes = [2, 32], strides = [1, 1]} : vector<2x128xf32> to vector<2x32xf32>
    %238 = arith.mulf %235, %153 : vector<2x32xf32>
    %239 = arith.mulf %234, %236 : vector<2x32xf32>
    %240 = arith.addf %238, %239 : vector<2x32xf32>
    %241 = math.tanh %240 : vector<2x32xf32>
    %242 = arith.mulf %237, %241 : vector<2x32xf32>
    %c2_75 = arith.constant 2 : index
    %c0_76 = arith.constant 0 : index
    %c0_77 = arith.constant 0 : index
    %243 = vector.load %arg3[%c2_75, %c0_76, %c0_77] : memref<8x32x128xf32, #tpu.memory_space<vmem>>, vector<1x32x128xf32>
    %244 = vector.shape_cast %243 : vector<1x32x128xf32> to vector<32x128xf32>
    %cst_78 = arith.constant dense<0.000000e+00> : vector<2x128xf32>
    %245 = tpu.matmul %242, %244, %cst_78 {dimension_numbers = #tpu.dot_dimension_numbers<[1], [0], [0], [1], [0, 0, 1, 1], [], []>, precision = #tpu.contract_precision<fp32>} : vector<2x32xf32>, vector<32x128xf32>, vector<2x128xf32> -> vector<2x128xf32>
    %c2_79 = arith.constant 2 : index
    %c0_80 = arith.constant 0 : index
    %c0_81 = arith.constant 0 : index
    %246 = vector.load %arg4[%c2_79, %c0_80, %c0_81] : memref<8x1x128xf32, #tpu.memory_space<vmem>>, vector<1x1x128xf32>
    %247 = vector.shape_cast %246 : vector<1x1x128xf32> to vector<1x128xf32>
    %248 = vector.broadcast %247 : vector<1x128xf32> to vector<2x128xf32>
    %249 = arith.addf %245, %248 : vector<2x128xf32>
    %250 = math.tanh %249 : vector<2x128xf32>
    %cst_82 = arith.constant 2.500000e+00 : f32
    %251 = vector.broadcast %cst_82 : f32 to vector<2x128xf32>
    %252 = arith.mulf %251, %250 : vector<2x128xf32>
    %c2_83 = arith.constant 2 : index
    %c0_84 = arith.constant 0 : index
    %c0_85 = arith.constant 0 : index
    %253 = vector.load %arg6[%c2_83, %c0_84, %c0_85] : memref<8x2x128xf32, #tpu.memory_space<vmem>>, vector<1x2x128xf32>
    %254 = vector.shape_cast %253 : vector<1x2x128xf32> to vector<2x128xf32>
    %255 = vector.shape_cast %252 : vector<2x128xf32> to vector<1x2x128xf32>
    tpu.vector_store %arg6[%c2_83, %c0_84, %c0_85], %255 {strides = array<i32>} : memref<8x2x128xf32, #tpu.memory_space<vmem>>, vector<1x2x128xf32>,
    %c2_86 = arith.constant 2 : index
    %c0_87 = arith.constant 0 : index
    %c0_88 = arith.constant 0 : index
    %256 = vector.load %arg5[%c2_86, %c0_87, %c0_88] : memref<8x2x128xf32, #tpu.memory_space<vmem>>, vector<1x2x128xf32>
    %257 = vector.shape_cast %256 : vector<1x2x128xf32> to vector<2x128xf32>
    %258 = arith.addf %252, %257 : vector<2x128xf32>
    %cst_89 = arith.constant dense<0xFF800000> : vector<2xf32>
    %259 = vector.multi_reduction <maximumf>, %258, %cst_89 [1] : vector<2x128xf32> to vector<2xf32>
    %260 = vector.shape_cast %259 : vector<2xf32> to vector<2x1xf32>
    %261 = tpu.iota {dimensions = array<i32: 1>} : vector<2x128xi32>
    %262 = vector.broadcast %260 : vector<2x1xf32> to vector<2x128xf32>
    %263 = arith.cmpf oge, %258, %262 : vector<2x128xf32>
    %c128_i32_90 = arith.constant 128 : i32
    %264 = vector.broadcast %c128_i32_90 : i32 to vector<2x128xi32>
    %265 = arith.select %263, %261, %264 : vector<2x128xi1>, vector<2x128xi32>
    %cst_91 = arith.constant dense<2147483647> : vector<2xi32>
    %266 = vector.multi_reduction <minsi>, %265, %cst_91 [1] : vector<2x128xi32> to vector<2xi32>
    %267 = vector.shape_cast %266 : vector<2xi32> to vector<2x1xi32>
    %c2_92 = arith.constant 2 : index
    %c0_93 = arith.constant 0 : index
    %c0_94 = arith.constant 0 : index
    %268 = vector.load %arg7[%c2_92, %c0_93, %c0_94] : memref<8x2x1xi32, #tpu.memory_space<vmem>>, vector<1x2x1xi32>
    %269 = vector.shape_cast %268 : vector<1x2x1xi32> to vector<2x1xi32>
    %270 = vector.shape_cast %267 : vector<2x1xi32> to vector<1x2x1xi32>
    tpu.vector_store %arg7[%c2_92, %c0_93, %c0_94], %270 {strides = array<i32>} : memref<8x2x1xi32, #tpu.memory_space<vmem>>, vector<1x2x1xi32>,
    %cst_95 = arith.constant 0.000000e+00 : f32
    %271 = vector.broadcast %cst_95 : f32 to vector<2x32xf32>
    %c12 = arith.constant 12 : index
    %c0_96 = arith.constant 0 : index
    %272 = vector.load %arg0[%c12, %c0_96] : memref<48x32xf32, #tpu.memory_space<vmem>>, vector<1x32xf32>
    %c0_i32_97 = arith.constant 0 : i32
    %273 = vector.broadcast %c0_i32_97 : i32 to vector<2x1xi32>
    %274 = arith.cmpi eq, %267, %273 : vector<2x1xi32>
    %275 = arith.extui %274 : vector<2x1xi1> to vector<2x1xi32>
    %276 = arith.sitofp %275 : vector<2x1xi32> to vector<2x1xf32>
    %277 = vector.broadcast %276 : vector<2x1xf32> to vector<2x32xf32>
    %278 = vector.broadcast %272 : vector<1x32xf32> to vector<2x32xf32>
    %279 = arith.mulf %277, %278 : vector<2x32xf32>
    %280 = arith.addf %271, %279 : vector<2x32xf32>
    %c13 = arith.constant 13 : index
    %c0_98 = arith.constant 0 : index
    %281 = vector.load %arg0[%c13, %c0_98] : memref<48x32xf32, #tpu.memory_space<vmem>>, vector<1x32xf32>
    %c1_i32_99 = arith.constant 1 : i32
    %282 = vector.broadcast %c1_i32_99 : i32 to vector<2x1xi32>
    %283 = arith.cmpi eq, %267, %282 : vector<2x1xi32>
    %284 = arith.extui %283 : vector<2x1xi1> to vector<2x1xi32>
    %285 = arith.sitofp %284 : vector<2x1xi32> to vector<2x1xf32>
    %286 = vector.broadcast %285 : vector<2x1xf32> to vector<2x32xf32>
    %287 = vector.broadcast %281 : vector<1x32xf32> to vector<2x32xf32>
    %288 = arith.mulf %286, %287 : vector<2x32xf32>
    %289 = arith.addf %280, %288 : vector<2x32xf32>
    %c14 = arith.constant 14 : index
    %c0_100 = arith.constant 0 : index
    %290 = vector.load %arg0[%c14, %c0_100] : memref<48x32xf32, #tpu.memory_space<vmem>>, vector<1x32xf32>
    %c2_i32_101 = arith.constant 2 : i32
    %291 = vector.broadcast %c2_i32_101 : i32 to vector<2x1xi32>
    %292 = arith.cmpi eq, %267, %291 : vector<2x1xi32>
    %293 = arith.extui %292 : vector<2x1xi1> to vector<2x1xi32>
    %294 = arith.sitofp %293 : vector<2x1xi32> to vector<2x1xf32>
    %295 = vector.broadcast %294 : vector<2x1xf32> to vector<2x32xf32>
    %296 = vector.broadcast %290 : vector<1x32xf32> to vector<2x32xf32>
    %297 = arith.mulf %295, %296 : vector<2x32xf32>
    %298 = arith.addf %289, %297 : vector<2x32xf32>
    %c15 = arith.constant 15 : index
    %c0_102 = arith.constant 0 : index
    %299 = vector.load %arg0[%c15, %c0_102] : memref<48x32xf32, #tpu.memory_space<vmem>>, vector<1x32xf32>
    %c3_i32_103 = arith.constant 3 : i32
    %300 = vector.broadcast %c3_i32_103 : i32 to vector<2x1xi32>
    %301 = arith.cmpi eq, %267, %300 : vector<2x1xi32>
    %302 = arith.extui %301 : vector<2x1xi1> to vector<2x1xi32>
    %303 = arith.sitofp %302 : vector<2x1xi32> to vector<2x1xf32>
    %304 = vector.broadcast %303 : vector<2x1xf32> to vector<2x32xf32>
    %305 = vector.broadcast %299 : vector<1x32xf32> to vector<2x32xf32>
    %306 = arith.mulf %304, %305 : vector<2x32xf32>
    %307 = arith.addf %298, %306 : vector<2x32xf32>
    %c16 = arith.constant 16 : index
    %c0_104 = arith.constant 0 : index
    %308 = vector.load %arg0[%c16, %c0_104] : memref<48x32xf32, #tpu.memory_space<vmem>>, vector<1x32xf32>
    %c4_i32_105 = arith.constant 4 : i32
    %309 = vector.broadcast %c4_i32_105 : i32 to vector<2x1xi32>
    %310 = arith.cmpi eq, %267, %309 : vector<2x1xi32>
    %311 = arith.extui %310 : vector<2x1xi1> to vector<2x1xi32>
    %312 = arith.sitofp %311 : vector<2x1xi32> to vector<2x1xf32>
    %313 = vector.broadcast %312 : vector<2x1xf32> to vector<2x32xf32>
    %314 = vector.broadcast %308 : vector<1x32xf32> to vector<2x32xf32>
    %315 = arith.mulf %313, %314 : vector<2x32xf32>
    %316 = arith.addf %307, %315 : vector<2x32xf32>
    %c17 = arith.constant 17 : index
    %c0_106 = arith.constant 0 : index
    %317 = vector.load %arg0[%c17, %c0_106] : memref<48x32xf32, #tpu.memory_space<vmem>>, vector<1x32xf32>
    %c5_i32_107 = arith.constant 5 : i32
    %318 = vector.broadcast %c5_i32_107 : i32 to vector<2x1xi32>
    %319 = arith.cmpi eq, %267, %318 : vector<2x1xi32>
    %320 = arith.extui %319 : vector<2x1xi1> to vector<2x1xi32>
    %321 = arith.sitofp %320 : vector<2x1xi32> to vector<2x1xf32>
    %322 = vector.broadcast %321 : vector<2x1xf32> to vector<2x32xf32>
    %323 = vector.broadcast %317 : vector<1x32xf32> to vector<2x32xf32>
    %324 = arith.mulf %322, %323 : vector<2x32xf32>
    %325 = arith.addf %316, %324 : vector<2x32xf32>
    %c18 = arith.constant 18 : index
    %c0_108 = arith.constant 0 : index
    %326 = vector.load %arg0[%c18, %c0_108] : memref<48x32xf32, #tpu.memory_space<vmem>>, vector<1x32xf32>
    %c6_i32_109 = arith.constant 6 : i32
    %327 = vector.broadcast %c6_i32_109 : i32 to vector<2x1xi32>
    %328 = arith.cmpi eq, %267, %327 : vector<2x1xi32>
    %329 = arith.extui %328 : vector<2x1xi1> to vector<2x1xi32>
    %330 = arith.sitofp %329 : vector<2x1xi32> to vector<2x1xf32>
    %331 = vector.broadcast %330 : vector<2x1xf32> to vector<2x32xf32>
    %332 = vector.broadcast %326 : vector<1x32xf32> to vector<2x32xf32>
    %333 = arith.mulf %331, %332 : vector<2x32xf32>
    %334 = arith.addf %325, %333 : vector<2x32xf32>
    %c19 = arith.constant 19 : index
    %c0_110 = arith.constant 0 : index
    %335 = vector.load %arg0[%c19, %c0_110] : memref<48x32xf32, #tpu.memory_space<vmem>>, vector<1x32xf32>
    %c7_i32_111 = arith.constant 7 : i32
    %336 = vector.broadcast %c7_i32_111 : i32 to vector<2x1xi32>
    %337 = arith.cmpi eq, %267, %336 : vector<2x1xi32>
    %338 = arith.extui %337 : vector<2x1xi1> to vector<2x1xi32>
    %339 = arith.sitofp %338 : vector<2x1xi32> to vector<2x1xf32>
    %340 = vector.broadcast %339 : vector<2x1xf32> to vector<2x32xf32>
    %341 = vector.broadcast %335 : vector<1x32xf32> to vector<2x32xf32>
    %342 = arith.mulf %340, %341 : vector<2x32xf32>
    %343 = arith.addf %334, %342 : vector<2x32xf32>
    %344 = tpu.concatenate %343, %242 in 1 : vector<2x32xf32>, vector<2x32xf32> -> vector<2x64xf32>
    %cst_112 = arith.constant dense<0.000000e+00> : vector<2x128xf32>
    %345 = tpu.matmul %344, %0, %cst_112 {dimension_numbers = #tpu.dot_dimension_numbers<[1], [0], [0], [1], [0, 0, 1, 1], [], []>, precision = #tpu.contract_precision<fp32>} : vector<2x64xf32>, vector<64x128xf32>, vector<2x128xf32> -> vector<2x128xf32>
    %346 = vector.broadcast %1 : vector<1x128xf32> to vector<2x128xf32>
    %347 = arith.addf %345, %346 : vector<2x128xf32>
    %cst_113 = arith.constant 5.000000e-01 : f32
    %348 = vector.broadcast %cst_113 : f32 to vector<2x128xf32>
    %349 = arith.mulf %348, %347 : vector<2x128xf32>
    %350 = arith.select %7, %347, %349 : vector<2x128xi1>, vector<2x128xf32>
    %351 = math.tanh %350 : vector<2x128xf32>
    %cst_114 = arith.constant 1.000000e+00 : f32
    %352 = vector.broadcast %cst_114 : f32 to vector<2x128xf32>
    %353 = arith.addf %352, %351 : vector<2x128xf32>
    %cst_115 = arith.constant 5.000000e-01 : f32
    %354 = vector.broadcast %cst_115 : f32 to vector<2x128xf32>
    %355 = arith.mulf %354, %353 : vector<2x128xf32>
    %356 = arith.select %7, %351, %355 : vector<2x128xi1>, vector<2x128xf32>
    %357 = vector.extract_strided_slice %356 {offsets = [0, 0], sizes = [2, 32], strides = [1, 1]} : vector<2x128xf32> to vector<2x32xf32>
    %358 = vector.extract_strided_slice %356 {offsets = [0, 32], sizes = [2, 32], strides = [1, 1]} : vector<2x128xf32> to vector<2x32xf32>
    %359 = vector.extract_strided_slice %356 {offsets = [0, 64], sizes = [2, 32], strides = [1, 1]} : vector<2x128xf32> to vector<2x32xf32>
    %360 = vector.extract_strided_slice %356 {offsets = [0, 96], sizes = [2, 32], strides = [1, 1]} : vector<2x128xf32> to vector<2x32xf32>
    %361 = arith.mulf %358, %240 : vector<2x32xf32>
    %362 = arith.mulf %357, %359 : vector<2x32xf32>
    %363 = arith.addf %361, %362 : vector<2x32xf32>
    %364 = math.tanh %363 : vector<2x32xf32>
    %365 = arith.mulf %360, %364 : vector<2x32xf32>
    %c3_116 = arith.constant 3 : index
    %c0_117 = arith.constant 0 : index
    %c0_118 = arith.constant 0 : index
    %366 = vector.load %arg3[%c3_116, %c0_117, %c0_118] : memref<8x32x128xf32, #tpu.memory_space<vmem>>, vector<1x32x128xf32>
    %367 = vector.shape_cast %366 : vector<1x32x128xf32> to vector<32x128xf32>
    %cst_119 = arith.constant dense<0.000000e+00> : vector<2x128xf32>
    %368 = tpu.matmul %365, %367, %cst_119 {dimension_numbers = #tpu.dot_dimension_numbers<[1], [0], [0], [1], [0, 0, 1, 1], [], []>, precision = #tpu.contract_precision<fp32>} : vector<2x32xf32>, vector<32x128xf32>, vector<2x128xf32> -> vector<2x128xf32>
    %c3_120 = arith.constant 3 : index
    %c0_121 = arith.constant 0 : index
    %c0_122 = arith.constant 0 : index
    %369 = vector.load %arg4[%c3_120, %c0_121, %c0_122] : memref<8x1x128xf32, #tpu.memory_space<vmem>>, vector<1x1x128xf32>
    %370 = vector.shape_cast %369 : vector<1x1x128xf32> to vector<1x128xf32>
    %371 = vector.broadcast %370 : vector<1x128xf32> to vector<2x128xf32>
    %372 = arith.addf %368, %371 : vector<2x128xf32>
    %373 = math.tanh %372 : vector<2x128xf32>
    %cst_123 = arith.constant 2.500000e+00 : f32
    %374 = vector.broadcast %cst_123 : f32 to vector<2x128xf32>
    %375 = arith.mulf %374, %373 : vector<2x128xf32>
    %c3_124 = arith.constant 3 : index
    %c0_125 = arith.constant 0 : index
    %c0_126 = arith.constant 0 : index
    %376 = vector.load %arg6[%c3_124, %c0_125, %c0_126] : memref<8x2x128xf32, #tpu.memory_space<vmem>>, vector<1x2x128xf32>
    %377 = vector.shape_cast %376 : vector<1x2x128xf32> to vector<2x128xf32>
    %378 = vector.shape_cast %375 : vector<2x128xf32> to vector<1x2x128xf32>
    tpu.vector_store %arg6[%c3_124, %c0_125, %c0_126], %378 {strides = array<i32>} : memref<8x2x128xf32, #tpu.memory_space<vmem>>, vector<1x2x128xf32>,
    %c3_127 = arith.constant 3 : index
    %c0_128 = arith.constant 0 : index
    %c0_129 = arith.constant 0 : index
    %379 = vector.load %arg5[%c3_127, %c0_128, %c0_129] : memref<8x2x128xf32, #tpu.memory_space<vmem>>, vector<1x2x128xf32>
    %380 = vector.shape_cast %379 : vector<1x2x128xf32> to vector<2x128xf32>
    %381 = arith.addf %375, %380 : vector<2x128xf32>
    %cst_130 = arith.constant dense<0xFF800000> : vector<2xf32>
    %382 = vector.multi_reduction <maximumf>, %381, %cst_130 [1] : vector<2x128xf32> to vector<2xf32>
    %383 = vector.shape_cast %382 : vector<2xf32> to vector<2x1xf32>
    %384 = tpu.iota {dimensions = array<i32: 1>} : vector<2x128xi32>
    %385 = vector.broadcast %383 : vector<2x1xf32> to vector<2x128xf32>
    %386 = arith.cmpf oge, %381, %385 : vector<2x128xf32>
    %c128_i32_131 = arith.constant 128 : i32
    %387 = vector.broadcast %c128_i32_131 : i32 to vector<2x128xi32>
    %388 = arith.select %386, %384, %387 : vector<2x128xi1>, vector<2x128xi32>
    %cst_132 = arith.constant dense<2147483647> : vector<2xi32>
    %389 = vector.multi_reduction <minsi>, %388, %cst_132 [1] : vector<2x128xi32> to vector<2xi32>
    %390 = vector.shape_cast %389 : vector<2xi32> to vector<2x1xi32>
    %c3_133 = arith.constant 3 : index
    %c0_134 = arith.constant 0 : index
    %c0_135 = arith.constant 0 : index
    %391 = vector.load %arg7[%c3_133, %c0_134, %c0_135] : memref<8x2x1xi32, #tpu.memory_space<vmem>>, vector<1x2x1xi32>
    %392 = vector.shape_cast %391 : vector<1x2x1xi32> to vector<2x1xi32>
    %393 = vector.shape_cast %390 : vector<2x1xi32> to vector<1x2x1xi32>
    tpu.vector_store %arg7[%c3_133, %c0_134, %c0_135], %393 {strides = array<i32>} : memref<8x2x1xi32, #tpu.memory_space<vmem>>, vector<1x2x1xi32>,
    %cst_136 = arith.constant 0.000000e+00 : f32
    %394 = vector.broadcast %cst_136 : f32 to vector<2x32xf32>
    %c20 = arith.constant 20 : index
    %c0_137 = arith.constant 0 : index
    %395 = vector.load %arg0[%c20, %c0_137] : memref<48x32xf32, #tpu.memory_space<vmem>>, vector<1x32xf32>
    %c0_i32_138 = arith.constant 0 : i32
    %396 = vector.broadcast %c0_i32_138 : i32 to vector<2x1xi32>
    %397 = arith.cmpi eq, %390, %396 : vector<2x1xi32>
    %398 = arith.extui %397 : vector<2x1xi1> to vector<2x1xi32>
    %399 = arith.sitofp %398 : vector<2x1xi32> to vector<2x1xf32>
    %400 = vector.broadcast %399 : vector<2x1xf32> to vector<2x32xf32>
    %401 = vector.broadcast %395 : vector<1x32xf32> to vector<2x32xf32>
    %402 = arith.mulf %400, %401 : vector<2x32xf32>
    %403 = arith.addf %394, %402 : vector<2x32xf32>
    %c21 = arith.constant 21 : index
    %c0_139 = arith.constant 0 : index
    %404 = vector.load %arg0[%c21, %c0_139] : memref<48x32xf32, #tpu.memory_space<vmem>>, vector<1x32xf32>
    %c1_i32_140 = arith.constant 1 : i32
    %405 = vector.broadcast %c1_i32_140 : i32 to vector<2x1xi32>
    %406 = arith.cmpi eq, %390, %405 : vector<2x1xi32>
    %407 = arith.extui %406 : vector<2x1xi1> to vector<2x1xi32>
    %408 = arith.sitofp %407 : vector<2x1xi32> to vector<2x1xf32>
    %409 = vector.broadcast %408 : vector<2x1xf32> to vector<2x32xf32>
    %410 = vector.broadcast %404 : vector<1x32xf32> to vector<2x32xf32>
    %411 = arith.mulf %409, %410 : vector<2x32xf32>
    %412 = arith.addf %403, %411 : vector<2x32xf32>
    %c22 = arith.constant 22 : index
    %c0_141 = arith.constant 0 : index
    %413 = vector.load %arg0[%c22, %c0_141] : memref<48x32xf32, #tpu.memory_space<vmem>>, vector<1x32xf32>
    %c2_i32_142 = arith.constant 2 : i32
    %414 = vector.broadcast %c2_i32_142 : i32 to vector<2x1xi32>
    %415 = arith.cmpi eq, %390, %414 : vector<2x1xi32>
    %416 = arith.extui %415 : vector<2x1xi1> to vector<2x1xi32>
    %417 = arith.sitofp %416 : vector<2x1xi32> to vector<2x1xf32>
    %418 = vector.broadcast %417 : vector<2x1xf32> to vector<2x32xf32>
    %419 = vector.broadcast %413 : vector<1x32xf32> to vector<2x32xf32>
    %420 = arith.mulf %418, %419 : vector<2x32xf32>
    %421 = arith.addf %412, %420 : vector<2x32xf32>
    %c23 = arith.constant 23 : index
    %c0_143 = arith.constant 0 : index
    %422 = vector.load %arg0[%c23, %c0_143] : memref<48x32xf32, #tpu.memory_space<vmem>>, vector<1x32xf32>
    %c3_i32_144 = arith.constant 3 : i32
    %423 = vector.broadcast %c3_i32_144 : i32 to vector<2x1xi32>
    %424 = arith.cmpi eq, %390, %423 : vector<2x1xi32>
    %425 = arith.extui %424 : vector<2x1xi1> to vector<2x1xi32>
    %426 = arith.sitofp %425 : vector<2x1xi32> to vector<2x1xf32>
    %427 = vector.broadcast %426 : vector<2x1xf32> to vector<2x32xf32>
    %428 = vector.broadcast %422 : vector<1x32xf32> to vector<2x32xf32>
    %429 = arith.mulf %427, %428 : vector<2x32xf32>
    %430 = arith.addf %421, %429 : vector<2x32xf32>
    %431 = tpu.concatenate %430, %365 in 1 : vector<2x32xf32>, vector<2x32xf32> -> vector<2x64xf32>
    %cst_145 = arith.constant dense<0.000000e+00> : vector<2x128xf32>
    %432 = tpu.matmul %431, %0, %cst_145 {dimension_numbers = #tpu.dot_dimension_numbers<[1], [0], [0], [1], [0, 0, 1, 1], [], []>, precision = #tpu.contract_precision<fp32>} : vector<2x64xf32>, vector<64x128xf32>, vector<2x128xf32> -> vector<2x128xf32>
    %433 = vector.broadcast %1 : vector<1x128xf32> to vector<2x128xf32>
    %434 = arith.addf %432, %433 : vector<2x128xf32>
    %cst_146 = arith.constant 5.000000e-01 : f32
    %435 = vector.broadcast %cst_146 : f32 to vector<2x128xf32>
    %436 = arith.mulf %435, %434 : vector<2x128xf32>
    %437 = arith.select %7, %434, %436 : vector<2x128xi1>, vector<2x128xf32>
    %438 = math.tanh %437 : vector<2x128xf32>
    %cst_147 = arith.constant 1.000000e+00 : f32
    %439 = vector.broadcast %cst_147 : f32 to vector<2x128xf32>
    %440 = arith.addf %439, %438 : vector<2x128xf32>
    %cst_148 = arith.constant 5.000000e-01 : f32
    %441 = vector.broadcast %cst_148 : f32 to vector<2x128xf32>
    %442 = arith.mulf %441, %440 : vector<2x128xf32>
    %443 = arith.select %7, %438, %442 : vector<2x128xi1>, vector<2x128xf32>
    %444 = vector.extract_strided_slice %443 {offsets = [0, 0], sizes = [2, 32], strides = [1, 1]} : vector<2x128xf32> to vector<2x32xf32>
    %445 = vector.extract_strided_slice %443 {offsets = [0, 32], sizes = [2, 32], strides = [1, 1]} : vector<2x128xf32> to vector<2x32xf32>
    %446 = vector.extract_strided_slice %443 {offsets = [0, 64], sizes = [2, 32], strides = [1, 1]} : vector<2x128xf32> to vector<2x32xf32>
    %447 = vector.extract_strided_slice %443 {offsets = [0, 96], sizes = [2, 32], strides = [1, 1]} : vector<2x128xf32> to vector<2x32xf32>
    %448 = arith.mulf %445, %363 : vector<2x32xf32>
    %449 = arith.mulf %444, %446 : vector<2x32xf32>
    %450 = arith.addf %448, %449 : vector<2x32xf32>
    %451 = math.tanh %450 : vector<2x32xf32>
    %452 = arith.mulf %447, %451 : vector<2x32xf32>
    %c4_149 = arith.constant 4 : index
    %c0_150 = arith.constant 0 : index
    %c0_151 = arith.constant 0 : index
    %453 = vector.load %arg3[%c4_149, %c0_150, %c0_151] : memref<8x32x128xf32, #tpu.memory_space<vmem>>, vector<1x32x128xf32>
    %454 = vector.shape_cast %453 : vector<1x32x128xf32> to vector<32x128xf32>
    %cst_152 = arith.constant dense<0.000000e+00> : vector<2x128xf32>
    %455 = tpu.matmul %452, %454, %cst_152 {dimension_numbers = #tpu.dot_dimension_numbers<[1], [0], [0], [1], [0, 0, 1, 1], [], []>, precision = #tpu.contract_precision<fp32>} : vector<2x32xf32>, vector<32x128xf32>, vector<2x128xf32> -> vector<2x128xf32>
    %c4_153 = arith.constant 4 : index
    %c0_154 = arith.constant 0 : index
    %c0_155 = arith.constant 0 : index
    %456 = vector.load %arg4[%c4_153, %c0_154, %c0_155] : memref<8x1x128xf32, #tpu.memory_space<vmem>>, vector<1x1x128xf32>
    %457 = vector.shape_cast %456 : vector<1x1x128xf32> to vector<1x128xf32>
    %458 = vector.broadcast %457 : vector<1x128xf32> to vector<2x128xf32>
    %459 = arith.addf %455, %458 : vector<2x128xf32>
    %460 = math.tanh %459 : vector<2x128xf32>
    %cst_156 = arith.constant 2.500000e+00 : f32
    %461 = vector.broadcast %cst_156 : f32 to vector<2x128xf32>
    %462 = arith.mulf %461, %460 : vector<2x128xf32>
    %c4_157 = arith.constant 4 : index
    %c0_158 = arith.constant 0 : index
    %c0_159 = arith.constant 0 : index
    %463 = vector.load %arg6[%c4_157, %c0_158, %c0_159] : memref<8x2x128xf32, #tpu.memory_space<vmem>>, vector<1x2x128xf32>
    %464 = vector.shape_cast %463 : vector<1x2x128xf32> to vector<2x128xf32>
    %465 = vector.shape_cast %462 : vector<2x128xf32> to vector<1x2x128xf32>
    tpu.vector_store %arg6[%c4_157, %c0_158, %c0_159], %465 {strides = array<i32>} : memref<8x2x128xf32, #tpu.memory_space<vmem>>, vector<1x2x128xf32>,
    %c4_160 = arith.constant 4 : index
    %c0_161 = arith.constant 0 : index
    %c0_162 = arith.constant 0 : index
    %466 = vector.load %arg5[%c4_160, %c0_161, %c0_162] : memref<8x2x128xf32, #tpu.memory_space<vmem>>, vector<1x2x128xf32>
    %467 = vector.shape_cast %466 : vector<1x2x128xf32> to vector<2x128xf32>
    %468 = arith.addf %462, %467 : vector<2x128xf32>
    %cst_163 = arith.constant dense<0xFF800000> : vector<2xf32>
    %469 = vector.multi_reduction <maximumf>, %468, %cst_163 [1] : vector<2x128xf32> to vector<2xf32>
    %470 = vector.shape_cast %469 : vector<2xf32> to vector<2x1xf32>
    %471 = tpu.iota {dimensions = array<i32: 1>} : vector<2x128xi32>
    %472 = vector.broadcast %470 : vector<2x1xf32> to vector<2x128xf32>
    %473 = arith.cmpf oge, %468, %472 : vector<2x128xf32>
    %c128_i32_164 = arith.constant 128 : i32
    %474 = vector.broadcast %c128_i32_164 : i32 to vector<2x128xi32>
    %475 = arith.select %473, %471, %474 : vector<2x128xi1>, vector<2x128xi32>
    %cst_165 = arith.constant dense<2147483647> : vector<2xi32>
    %476 = vector.multi_reduction <minsi>, %475, %cst_165 [1] : vector<2x128xi32> to vector<2xi32>
    %477 = vector.shape_cast %476 : vector<2xi32> to vector<2x1xi32>
    %c4_166 = arith.constant 4 : index
    %c0_167 = arith.constant 0 : index
    %c0_168 = arith.constant 0 : index
    %478 = vector.load %arg7[%c4_166, %c0_167, %c0_168] : memref<8x2x1xi32, #tpu.memory_space<vmem>>, vector<1x2x1xi32>
    %479 = vector.shape_cast %478 : vector<1x2x1xi32> to vector<2x1xi32>
    %480 = vector.shape_cast %477 : vector<2x1xi32> to vector<1x2x1xi32>
    tpu.vector_store %arg7[%c4_166, %c0_167, %c0_168], %480 {strides = array<i32>} : memref<8x2x1xi32, #tpu.memory_space<vmem>>, vector<1x2x1xi32>,
    %cst_169 = arith.constant 0.000000e+00 : f32
    %481 = vector.broadcast %cst_169 : f32 to vector<2x32xf32>
    %c24 = arith.constant 24 : index
    %c0_170 = arith.constant 0 : index
    %482 = vector.load %arg0[%c24, %c0_170] : memref<48x32xf32, #tpu.memory_space<vmem>>, vector<1x32xf32>
    %c0_i32_171 = arith.constant 0 : i32
    %483 = vector.broadcast %c0_i32_171 : i32 to vector<2x1xi32>
    %484 = arith.cmpi eq, %477, %483 : vector<2x1xi32>
    %485 = arith.extui %484 : vector<2x1xi1> to vector<2x1xi32>
    %486 = arith.sitofp %485 : vector<2x1xi32> to vector<2x1xf32>
    %487 = vector.broadcast %486 : vector<2x1xf32> to vector<2x32xf32>
    %488 = vector.broadcast %482 : vector<1x32xf32> to vector<2x32xf32>
    %489 = arith.mulf %487, %488 : vector<2x32xf32>
    %490 = arith.addf %481, %489 : vector<2x32xf32>
    %c25 = arith.constant 25 : index
    %c0_172 = arith.constant 0 : index
    %491 = vector.load %arg0[%c25, %c0_172] : memref<48x32xf32, #tpu.memory_space<vmem>>, vector<1x32xf32>
    %c1_i32_173 = arith.constant 1 : i32
    %492 = vector.broadcast %c1_i32_173 : i32 to vector<2x1xi32>
    %493 = arith.cmpi eq, %477, %492 : vector<2x1xi32>
    %494 = arith.extui %493 : vector<2x1xi1> to vector<2x1xi32>
    %495 = arith.sitofp %494 : vector<2x1xi32> to vector<2x1xf32>
    %496 = vector.broadcast %495 : vector<2x1xf32> to vector<2x32xf32>
    %497 = vector.broadcast %491 : vector<1x32xf32> to vector<2x32xf32>
    %498 = arith.mulf %496, %497 : vector<2x32xf32>
    %499 = arith.addf %490, %498 : vector<2x32xf32>
    %c26 = arith.constant 26 : index
    %c0_174 = arith.constant 0 : index
    %500 = vector.load %arg0[%c26, %c0_174] : memref<48x32xf32, #tpu.memory_space<vmem>>, vector<1x32xf32>
    %c2_i32_175 = arith.constant 2 : i32
    %501 = vector.broadcast %c2_i32_175 : i32 to vector<2x1xi32>
    %502 = arith.cmpi eq, %477, %501 : vector<2x1xi32>
    %503 = arith.extui %502 : vector<2x1xi1> to vector<2x1xi32>
    %504 = arith.sitofp %503 : vector<2x1xi32> to vector<2x1xf32>
    %505 = vector.broadcast %504 : vector<2x1xf32> to vector<2x32xf32>
    %506 = vector.broadcast %500 : vector<1x32xf32> to vector<2x32xf32>
    %507 = arith.mulf %505, %506 : vector<2x32xf32>
    %508 = arith.addf %499, %507 : vector<2x32xf32>
    %c27 = arith.constant 27 : index
    %c0_176 = arith.constant 0 : index
    %509 = vector.load %arg0[%c27, %c0_176] : memref<48x32xf32, #tpu.memory_space<vmem>>, vector<1x32xf32>
    %c3_i32_177 = arith.constant 3 : i32
    %510 = vector.broadcast %c3_i32_177 : i32 to vector<2x1xi32>
    %511 = arith.cmpi eq, %477, %510 : vector<2x1xi32>
    %512 = arith.extui %511 : vector<2x1xi1> to vector<2x1xi32>
    %513 = arith.sitofp %512 : vector<2x1xi32> to vector<2x1xf32>
    %514 = vector.broadcast %513 : vector<2x1xf32> to vector<2x32xf32>
    %515 = vector.broadcast %509 : vector<1x32xf32> to vector<2x32xf32>
    %516 = arith.mulf %514, %515 : vector<2x32xf32>
    %517 = arith.addf %508, %516 : vector<2x32xf32>
    %c28 = arith.constant 28 : index
    %c0_178 = arith.constant 0 : index
    %518 = vector.load %arg0[%c28, %c0_178] : memref<48x32xf32, #tpu.memory_space<vmem>>, vector<1x32xf32>
    %c4_i32_179 = arith.constant 4 : i32
    %519 = vector.broadcast %c4_i32_179 : i32 to vector<2x1xi32>
    %520 = arith.cmpi eq, %477, %519 : vector<2x1xi32>
    %521 = arith.extui %520 : vector<2x1xi1> to vector<2x1xi32>
    %522 = arith.sitofp %521 : vector<2x1xi32> to vector<2x1xf32>
    %523 = vector.broadcast %522 : vector<2x1xf32> to vector<2x32xf32>
    %524 = vector.broadcast %518 : vector<1x32xf32> to vector<2x32xf32>
    %525 = arith.mulf %523, %524 : vector<2x32xf32>
    %526 = arith.addf %517, %525 : vector<2x32xf32>
    %c29 = arith.constant 29 : index
    %c0_180 = arith.constant 0 : index
    %527 = vector.load %arg0[%c29, %c0_180] : memref<48x32xf32, #tpu.memory_space<vmem>>, vector<1x32xf32>
    %c5_i32_181 = arith.constant 5 : i32
    %528 = vector.broadcast %c5_i32_181 : i32 to vector<2x1xi32>
    %529 = arith.cmpi eq, %477, %528 : vector<2x1xi32>
    %530 = arith.extui %529 : vector<2x1xi1> to vector<2x1xi32>
    %531 = arith.sitofp %530 : vector<2x1xi32> to vector<2x1xf32>
    %532 = vector.broadcast %531 : vector<2x1xf32> to vector<2x32xf32>
    %533 = vector.broadcast %527 : vector<1x32xf32> to vector<2x32xf32>
    %534 = arith.mulf %532, %533 : vector<2x32xf32>
    %535 = arith.addf %526, %534 : vector<2x32xf32>
    %c30 = arith.constant 30 : index
    %c0_182 = arith.constant 0 : index
    %536 = vector.load %arg0[%c30, %c0_182] : memref<48x32xf32, #tpu.memory_space<vmem>>, vector<1x32xf32>
    %c6_i32_183 = arith.constant 6 : i32
    %537 = vector.broadcast %c6_i32_183 : i32 to vector<2x1xi32>
    %538 = arith.cmpi eq, %477, %537 : vector<2x1xi32>
    %539 = arith.extui %538 : vector<2x1xi1> to vector<2x1xi32>
    %540 = arith.sitofp %539 : vector<2x1xi32> to vector<2x1xf32>
    %541 = vector.broadcast %540 : vector<2x1xf32> to vector<2x32xf32>
    %542 = vector.broadcast %536 : vector<1x32xf32> to vector<2x32xf32>
    %543 = arith.mulf %541, %542 : vector<2x32xf32>
    %544 = arith.addf %535, %543 : vector<2x32xf32>
    %c31 = arith.constant 31 : index
    %c0_184 = arith.constant 0 : index
    %545 = vector.load %arg0[%c31, %c0_184] : memref<48x32xf32, #tpu.memory_space<vmem>>, vector<1x32xf32>
    %c7_i32_185 = arith.constant 7 : i32
    %546 = vector.broadcast %c7_i32_185 : i32 to vector<2x1xi32>
    %547 = arith.cmpi eq, %477, %546 : vector<2x1xi32>
    %548 = arith.extui %547 : vector<2x1xi1> to vector<2x1xi32>
    %549 = arith.sitofp %548 : vector<2x1xi32> to vector<2x1xf32>
    %550 = vector.broadcast %549 : vector<2x1xf32> to vector<2x32xf32>
    %551 = vector.broadcast %545 : vector<1x32xf32> to vector<2x32xf32>
    %552 = arith.mulf %550, %551 : vector<2x32xf32>
    %553 = arith.addf %544, %552 : vector<2x32xf32>
    %554 = tpu.concatenate %553, %452 in 1 : vector<2x32xf32>, vector<2x32xf32> -> vector<2x64xf32>
    %cst_186 = arith.constant dense<0.000000e+00> : vector<2x128xf32>
    %555 = tpu.matmul %554, %0, %cst_186 {dimension_numbers = #tpu.dot_dimension_numbers<[1], [0], [0], [1], [0, 0, 1, 1], [], []>, precision = #tpu.contract_precision<fp32>} : vector<2x64xf32>, vector<64x128xf32>, vector<2x128xf32> -> vector<2x128xf32>
    %556 = vector.broadcast %1 : vector<1x128xf32> to vector<2x128xf32>
    %557 = arith.addf %555, %556 : vector<2x128xf32>
    %cst_187 = arith.constant 5.000000e-01 : f32
    %558 = vector.broadcast %cst_187 : f32 to vector<2x128xf32>
    %559 = arith.mulf %558, %557 : vector<2x128xf32>
    %560 = arith.select %7, %557, %559 : vector<2x128xi1>, vector<2x128xf32>
    %561 = math.tanh %560 : vector<2x128xf32>
    %cst_188 = arith.constant 1.000000e+00 : f32
    %562 = vector.broadcast %cst_188 : f32 to vector<2x128xf32>
    %563 = arith.addf %562, %561 : vector<2x128xf32>
    %cst_189 = arith.constant 5.000000e-01 : f32
    %564 = vector.broadcast %cst_189 : f32 to vector<2x128xf32>
    %565 = arith.mulf %564, %563 : vector<2x128xf32>
    %566 = arith.select %7, %561, %565 : vector<2x128xi1>, vector<2x128xf32>
    %567 = vector.extract_strided_slice %566 {offsets = [0, 0], sizes = [2, 32], strides = [1, 1]} : vector<2x128xf32> to vector<2x32xf32>
    %568 = vector.extract_strided_slice %566 {offsets = [0, 32], sizes = [2, 32], strides = [1, 1]} : vector<2x128xf32> to vector<2x32xf32>
    %569 = vector.extract_strided_slice %566 {offsets = [0, 64], sizes = [2, 32], strides = [1, 1]} : vector<2x128xf32> to vector<2x32xf32>
    %570 = vector.extract_strided_slice %566 {offsets = [0, 96], sizes = [2, 32], strides = [1, 1]} : vector<2x128xf32> to vector<2x32xf32>
    %571 = arith.mulf %568, %450 : vector<2x32xf32>
    %572 = arith.mulf %567, %569 : vector<2x32xf32>
    %573 = arith.addf %571, %572 : vector<2x32xf32>
    %574 = math.tanh %573 : vector<2x32xf32>
    %575 = arith.mulf %570, %574 : vector<2x32xf32>
    %c5_190 = arith.constant 5 : index
    %c0_191 = arith.constant 0 : index
    %c0_192 = arith.constant 0 : index
    %576 = vector.load %arg3[%c5_190, %c0_191, %c0_192] : memref<8x32x128xf32, #tpu.memory_space<vmem>>, vector<1x32x128xf32>
    %577 = vector.shape_cast %576 : vector<1x32x128xf32> to vector<32x128xf32>
    %cst_193 = arith.constant dense<0.000000e+00> : vector<2x128xf32>
    %578 = tpu.matmul %575, %577, %cst_193 {dimension_numbers = #tpu.dot_dimension_numbers<[1], [0], [0], [1], [0, 0, 1, 1], [], []>, precision = #tpu.contract_precision<fp32>} : vector<2x32xf32>, vector<32x128xf32>, vector<2x128xf32> -> vector<2x128xf32>
    %c5_194 = arith.constant 5 : index
    %c0_195 = arith.constant 0 : index
    %c0_196 = arith.constant 0 : index
    %579 = vector.load %arg4[%c5_194, %c0_195, %c0_196] : memref<8x1x128xf32, #tpu.memory_space<vmem>>, vector<1x1x128xf32>
    %580 = vector.shape_cast %579 : vector<1x1x128xf32> to vector<1x128xf32>
    %581 = vector.broadcast %580 : vector<1x128xf32> to vector<2x128xf32>
    %582 = arith.addf %578, %581 : vector<2x128xf32>
    %583 = math.tanh %582 : vector<2x128xf32>
    %cst_197 = arith.constant 2.500000e+00 : f32
    %584 = vector.broadcast %cst_197 : f32 to vector<2x128xf32>
    %585 = arith.mulf %584, %583 : vector<2x128xf32>
    %c5_198 = arith.constant 5 : index
    %c0_199 = arith.constant 0 : index
    %c0_200 = arith.constant 0 : index
    %586 = vector.load %arg6[%c5_198, %c0_199, %c0_200] : memref<8x2x128xf32, #tpu.memory_space<vmem>>, vector<1x2x128xf32>
    %587 = vector.shape_cast %586 : vector<1x2x128xf32> to vector<2x128xf32>
    %588 = vector.shape_cast %585 : vector<2x128xf32> to vector<1x2x128xf32>
    tpu.vector_store %arg6[%c5_198, %c0_199, %c0_200], %588 {strides = array<i32>} : memref<8x2x128xf32, #tpu.memory_space<vmem>>, vector<1x2x128xf32>,
    %c5_201 = arith.constant 5 : index
    %c0_202 = arith.constant 0 : index
    %c0_203 = arith.constant 0 : index
    %589 = vector.load %arg5[%c5_201, %c0_202, %c0_203] : memref<8x2x128xf32, #tpu.memory_space<vmem>>, vector<1x2x128xf32>
    %590 = vector.shape_cast %589 : vector<1x2x128xf32> to vector<2x128xf32>
    %591 = arith.addf %585, %590 : vector<2x128xf32>
    %cst_204 = arith.constant dense<0xFF800000> : vector<2xf32>
    %592 = vector.multi_reduction <maximumf>, %591, %cst_204 [1] : vector<2x128xf32> to vector<2xf32>
    %593 = vector.shape_cast %592 : vector<2xf32> to vector<2x1xf32>
    %594 = tpu.iota {dimensions = array<i32: 1>} : vector<2x128xi32>
    %595 = vector.broadcast %593 : vector<2x1xf32> to vector<2x128xf32>
    %596 = arith.cmpf oge, %591, %595 : vector<2x128xf32>
    %c128_i32_205 = arith.constant 128 : i32
    %597 = vector.broadcast %c128_i32_205 : i32 to vector<2x128xi32>
    %598 = arith.select %596, %594, %597 : vector<2x128xi1>, vector<2x128xi32>
    %cst_206 = arith.constant dense<2147483647> : vector<2xi32>
    %599 = vector.multi_reduction <minsi>, %598, %cst_206 [1] : vector<2x128xi32> to vector<2xi32>
    %600 = vector.shape_cast %599 : vector<2xi32> to vector<2x1xi32>
    %c5_207 = arith.constant 5 : index
    %c0_208 = arith.constant 0 : index
    %c0_209 = arith.constant 0 : index
    %601 = vector.load %arg7[%c5_207, %c0_208, %c0_209] : memref<8x2x1xi32, #tpu.memory_space<vmem>>, vector<1x2x1xi32>
    %602 = vector.shape_cast %601 : vector<1x2x1xi32> to vector<2x1xi32>
    %603 = vector.shape_cast %600 : vector<2x1xi32> to vector<1x2x1xi32>
    tpu.vector_store %arg7[%c5_207, %c0_208, %c0_209], %603 {strides = array<i32>} : memref<8x2x1xi32, #tpu.memory_space<vmem>>, vector<1x2x1xi32>,
    %cst_210 = arith.constant 0.000000e+00 : f32
    %604 = vector.broadcast %cst_210 : f32 to vector<2x32xf32>
    %c32 = arith.constant 32 : index
    %c0_211 = arith.constant 0 : index
    %605 = vector.load %arg0[%c32, %c0_211] : memref<48x32xf32, #tpu.memory_space<vmem>>, vector<1x32xf32>
    %c0_i32_212 = arith.constant 0 : i32
    %606 = vector.broadcast %c0_i32_212 : i32 to vector<2x1xi32>
    %607 = arith.cmpi eq, %600, %606 : vector<2x1xi32>
    %608 = arith.extui %607 : vector<2x1xi1> to vector<2x1xi32>
    %609 = arith.sitofp %608 : vector<2x1xi32> to vector<2x1xf32>
    %610 = vector.broadcast %609 : vector<2x1xf32> to vector<2x32xf32>
    %611 = vector.broadcast %605 : vector<1x32xf32> to vector<2x32xf32>
    %612 = arith.mulf %610, %611 : vector<2x32xf32>
    %613 = arith.addf %604, %612 : vector<2x32xf32>
    %c33 = arith.constant 33 : index
    %c0_213 = arith.constant 0 : index
    %614 = vector.load %arg0[%c33, %c0_213] : memref<48x32xf32, #tpu.memory_space<vmem>>, vector<1x32xf32>
    %c1_i32_214 = arith.constant 1 : i32
    %615 = vector.broadcast %c1_i32_214 : i32 to vector<2x1xi32>
    %616 = arith.cmpi eq, %600, %615 : vector<2x1xi32>
    %617 = arith.extui %616 : vector<2x1xi1> to vector<2x1xi32>
    %618 = arith.sitofp %617 : vector<2x1xi32> to vector<2x1xf32>
    %619 = vector.broadcast %618 : vector<2x1xf32> to vector<2x32xf32>
    %620 = vector.broadcast %614 : vector<1x32xf32> to vector<2x32xf32>
    %621 = arith.mulf %619, %620 : vector<2x32xf32>
    %622 = arith.addf %613, %621 : vector<2x32xf32>
    %c34 = arith.constant 34 : index
    %c0_215 = arith.constant 0 : index
    %623 = vector.load %arg0[%c34, %c0_215] : memref<48x32xf32, #tpu.memory_space<vmem>>, vector<1x32xf32>
    %c2_i32_216 = arith.constant 2 : i32
    %624 = vector.broadcast %c2_i32_216 : i32 to vector<2x1xi32>
    %625 = arith.cmpi eq, %600, %624 : vector<2x1xi32>
    %626 = arith.extui %625 : vector<2x1xi1> to vector<2x1xi32>
    %627 = arith.sitofp %626 : vector<2x1xi32> to vector<2x1xf32>
    %628 = vector.broadcast %627 : vector<2x1xf32> to vector<2x32xf32>
    %629 = vector.broadcast %623 : vector<1x32xf32> to vector<2x32xf32>
    %630 = arith.mulf %628, %629 : vector<2x32xf32>
    %631 = arith.addf %622, %630 : vector<2x32xf32>
    %c35 = arith.constant 35 : index
    %c0_217 = arith.constant 0 : index
    %632 = vector.load %arg0[%c35, %c0_217] : memref<48x32xf32, #tpu.memory_space<vmem>>, vector<1x32xf32>
    %c3_i32_218 = arith.constant 3 : i32
    %633 = vector.broadcast %c3_i32_218 : i32 to vector<2x1xi32>
    %634 = arith.cmpi eq, %600, %633 : vector<2x1xi32>
    %635 = arith.extui %634 : vector<2x1xi1> to vector<2x1xi32>
    %636 = arith.sitofp %635 : vector<2x1xi32> to vector<2x1xf32>
    %637 = vector.broadcast %636 : vector<2x1xf32> to vector<2x32xf32>
    %638 = vector.broadcast %632 : vector<1x32xf32> to vector<2x32xf32>
    %639 = arith.mulf %637, %638 : vector<2x32xf32>
    %640 = arith.addf %631, %639 : vector<2x32xf32>
    %641 = tpu.concatenate %640, %575 in 1 : vector<2x32xf32>, vector<2x32xf32> -> vector<2x64xf32>
    %cst_219 = arith.constant dense<0.000000e+00> : vector<2x128xf32>
    %642 = tpu.matmul %641, %0, %cst_219 {dimension_numbers = #tpu.dot_dimension_numbers<[1], [0], [0], [1], [0, 0, 1, 1], [], []>, precision = #tpu.contract_precision<fp32>} : vector<2x64xf32>, vector<64x128xf32>, vector<2x128xf32> -> vector<2x128xf32>
    %643 = vector.broadcast %1 : vector<1x128xf32> to vector<2x128xf32>
    %644 = arith.addf %642, %643 : vector<2x128xf32>
    %cst_220 = arith.constant 5.000000e-01 : f32
    %645 = vector.broadcast %cst_220 : f32 to vector<2x128xf32>
    %646 = arith.mulf %645, %644 : vector<2x128xf32>
    %647 = arith.select %7, %644, %646 : vector<2x128xi1>, vector<2x128xf32>
    %648 = math.tanh %647 : vector<2x128xf32>
    %cst_221 = arith.constant 1.000000e+00 : f32
    %649 = vector.broadcast %cst_221 : f32 to vector<2x128xf32>
    %650 = arith.addf %649, %648 : vector<2x128xf32>
    %cst_222 = arith.constant 5.000000e-01 : f32
    %651 = vector.broadcast %cst_222 : f32 to vector<2x128xf32>
    %652 = arith.mulf %651, %650 : vector<2x128xf32>
    %653 = arith.select %7, %648, %652 : vector<2x128xi1>, vector<2x128xf32>
    %654 = vector.extract_strided_slice %653 {offsets = [0, 0], sizes = [2, 32], strides = [1, 1]} : vector<2x128xf32> to vector<2x32xf32>
    %655 = vector.extract_strided_slice %653 {offsets = [0, 32], sizes = [2, 32], strides = [1, 1]} : vector<2x128xf32> to vector<2x32xf32>
    %656 = vector.extract_strided_slice %653 {offsets = [0, 64], sizes = [2, 32], strides = [1, 1]} : vector<2x128xf32> to vector<2x32xf32>
    %657 = vector.extract_strided_slice %653 {offsets = [0, 96], sizes = [2, 32], strides = [1, 1]} : vector<2x128xf32> to vector<2x32xf32>
    %658 = arith.mulf %655, %573 : vector<2x32xf32>
    %659 = arith.mulf %654, %656 : vector<2x32xf32>
    %660 = arith.addf %658, %659 : vector<2x32xf32>
    %661 = math.tanh %660 : vector<2x32xf32>
    %662 = arith.mulf %657, %661 : vector<2x32xf32>
    %c6_223 = arith.constant 6 : index
    %c0_224 = arith.constant 0 : index
    %c0_225 = arith.constant 0 : index
    %663 = vector.load %arg3[%c6_223, %c0_224, %c0_225] : memref<8x32x128xf32, #tpu.memory_space<vmem>>, vector<1x32x128xf32>
    %664 = vector.shape_cast %663 : vector<1x32x128xf32> to vector<32x128xf32>
    %cst_226 = arith.constant dense<0.000000e+00> : vector<2x128xf32>
    %665 = tpu.matmul %662, %664, %cst_226 {dimension_numbers = #tpu.dot_dimension_numbers<[1], [0], [0], [1], [0, 0, 1, 1], [], []>, precision = #tpu.contract_precision<fp32>} : vector<2x32xf32>, vector<32x128xf32>, vector<2x128xf32> -> vector<2x128xf32>
    %c6_227 = arith.constant 6 : index
    %c0_228 = arith.constant 0 : index
    %c0_229 = arith.constant 0 : index
    %666 = vector.load %arg4[%c6_227, %c0_228, %c0_229] : memref<8x1x128xf32, #tpu.memory_space<vmem>>, vector<1x1x128xf32>
    %667 = vector.shape_cast %666 : vector<1x1x128xf32> to vector<1x128xf32>
    %668 = vector.broadcast %667 : vector<1x128xf32> to vector<2x128xf32>
    %669 = arith.addf %665, %668 : vector<2x128xf32>
    %670 = math.tanh %669 : vector<2x128xf32>
    %cst_230 = arith.constant 2.500000e+00 : f32
    %671 = vector.broadcast %cst_230 : f32 to vector<2x128xf32>
    %672 = arith.mulf %671, %670 : vector<2x128xf32>
    %c6_231 = arith.constant 6 : index
    %c0_232 = arith.constant 0 : index
    %c0_233 = arith.constant 0 : index
    %673 = vector.load %arg6[%c6_231, %c0_232, %c0_233] : memref<8x2x128xf32, #tpu.memory_space<vmem>>, vector<1x2x128xf32>
    %674 = vector.shape_cast %673 : vector<1x2x128xf32> to vector<2x128xf32>
    %675 = vector.shape_cast %672 : vector<2x128xf32> to vector<1x2x128xf32>
    tpu.vector_store %arg6[%c6_231, %c0_232, %c0_233], %675 {strides = array<i32>} : memref<8x2x128xf32, #tpu.memory_space<vmem>>, vector<1x2x128xf32>,
    %c6_234 = arith.constant 6 : index
    %c0_235 = arith.constant 0 : index
    %c0_236 = arith.constant 0 : index
    %676 = vector.load %arg5[%c6_234, %c0_235, %c0_236] : memref<8x2x128xf32, #tpu.memory_space<vmem>>, vector<1x2x128xf32>
    %677 = vector.shape_cast %676 : vector<1x2x128xf32> to vector<2x128xf32>
    %678 = arith.addf %672, %677 : vector<2x128xf32>
    %cst_237 = arith.constant dense<0xFF800000> : vector<2xf32>
    %679 = vector.multi_reduction <maximumf>, %678, %cst_237 [1] : vector<2x128xf32> to vector<2xf32>
    %680 = vector.shape_cast %679 : vector<2xf32> to vector<2x1xf32>
    %681 = tpu.iota {dimensions = array<i32: 1>} : vector<2x128xi32>
    %682 = vector.broadcast %680 : vector<2x1xf32> to vector<2x128xf32>
    %683 = arith.cmpf oge, %678, %682 : vector<2x128xf32>
    %c128_i32_238 = arith.constant 128 : i32
    %684 = vector.broadcast %c128_i32_238 : i32 to vector<2x128xi32>
    %685 = arith.select %683, %681, %684 : vector<2x128xi1>, vector<2x128xi32>
    %cst_239 = arith.constant dense<2147483647> : vector<2xi32>
    %686 = vector.multi_reduction <minsi>, %685, %cst_239 [1] : vector<2x128xi32> to vector<2xi32>
    %687 = vector.shape_cast %686 : vector<2xi32> to vector<2x1xi32>
    %c6_240 = arith.constant 6 : index
    %c0_241 = arith.constant 0 : index
    %c0_242 = arith.constant 0 : index
    %688 = vector.load %arg7[%c6_240, %c0_241, %c0_242] : memref<8x2x1xi32, #tpu.memory_space<vmem>>, vector<1x2x1xi32>
    %689 = vector.shape_cast %688 : vector<1x2x1xi32> to vector<2x1xi32>
    %690 = vector.shape_cast %687 : vector<2x1xi32> to vector<1x2x1xi32>
    tpu.vector_store %arg7[%c6_240, %c0_241, %c0_242], %690 {strides = array<i32>} : memref<8x2x1xi32, #tpu.memory_space<vmem>>, vector<1x2x1xi32>,
    %cst_243 = arith.constant 0.000000e+00 : f32
    %691 = vector.broadcast %cst_243 : f32 to vector<2x32xf32>
    %c36 = arith.constant 36 : index
    %c0_244 = arith.constant 0 : index
    %692 = vector.load %arg0[%c36, %c0_244] : memref<48x32xf32, #tpu.memory_space<vmem>>, vector<1x32xf32>
    %c0_i32_245 = arith.constant 0 : i32
    %693 = vector.broadcast %c0_i32_245 : i32 to vector<2x1xi32>
    %694 = arith.cmpi eq, %687, %693 : vector<2x1xi32>
    %695 = arith.extui %694 : vector<2x1xi1> to vector<2x1xi32>
    %696 = arith.sitofp %695 : vector<2x1xi32> to vector<2x1xf32>
    %697 = vector.broadcast %696 : vector<2x1xf32> to vector<2x32xf32>
    %698 = vector.broadcast %692 : vector<1x32xf32> to vector<2x32xf32>
    %699 = arith.mulf %697, %698 : vector<2x32xf32>
    %700 = arith.addf %691, %699 : vector<2x32xf32>
    %c37 = arith.constant 37 : index
    %c0_246 = arith.constant 0 : index
    %701 = vector.load %arg0[%c37, %c0_246] : memref<48x32xf32, #tpu.memory_space<vmem>>, vector<1x32xf32>
    %c1_i32_247 = arith.constant 1 : i32
    %702 = vector.broadcast %c1_i32_247 : i32 to vector<2x1xi32>
    %703 = arith.cmpi eq, %687, %702 : vector<2x1xi32>
    %704 = arith.extui %703 : vector<2x1xi1> to vector<2x1xi32>
    %705 = arith.sitofp %704 : vector<2x1xi32> to vector<2x1xf32>
    %706 = vector.broadcast %705 : vector<2x1xf32> to vector<2x32xf32>
    %707 = vector.broadcast %701 : vector<1x32xf32> to vector<2x32xf32>
    %708 = arith.mulf %706, %707 : vector<2x32xf32>
    %709 = arith.addf %700, %708 : vector<2x32xf32>
    %c38 = arith.constant 38 : index
    %c0_248 = arith.constant 0 : index
    %710 = vector.load %arg0[%c38, %c0_248] : memref<48x32xf32, #tpu.memory_space<vmem>>, vector<1x32xf32>
    %c2_i32_249 = arith.constant 2 : i32
    %711 = vector.broadcast %c2_i32_249 : i32 to vector<2x1xi32>
    %712 = arith.cmpi eq, %687, %711 : vector<2x1xi32>
    %713 = arith.extui %712 : vector<2x1xi1> to vector<2x1xi32>
    %714 = arith.sitofp %713 : vector<2x1xi32> to vector<2x1xf32>
    %715 = vector.broadcast %714 : vector<2x1xf32> to vector<2x32xf32>
    %716 = vector.broadcast %710 : vector<1x32xf32> to vector<2x32xf32>
    %717 = arith.mulf %715, %716 : vector<2x32xf32>
    %718 = arith.addf %709, %717 : vector<2x32xf32>
    %c39 = arith.constant 39 : index
    %c0_250 = arith.constant 0 : index
    %719 = vector.load %arg0[%c39, %c0_250] : memref<48x32xf32, #tpu.memory_space<vmem>>, vector<1x32xf32>
    %c3_i32_251 = arith.constant 3 : i32
    %720 = vector.broadcast %c3_i32_251 : i32 to vector<2x1xi32>
    %721 = arith.cmpi eq, %687, %720 : vector<2x1xi32>
    %722 = arith.extui %721 : vector<2x1xi1> to vector<2x1xi32>
    %723 = arith.sitofp %722 : vector<2x1xi32> to vector<2x1xf32>
    %724 = vector.broadcast %723 : vector<2x1xf32> to vector<2x32xf32>
    %725 = vector.broadcast %719 : vector<1x32xf32> to vector<2x32xf32>
    %726 = arith.mulf %724, %725 : vector<2x32xf32>
    %727 = arith.addf %718, %726 : vector<2x32xf32>
    %c40 = arith.constant 40 : index
    %c0_252 = arith.constant 0 : index
    %728 = vector.load %arg0[%c40, %c0_252] : memref<48x32xf32, #tpu.memory_space<vmem>>, vector<1x32xf32>
    %c4_i32_253 = arith.constant 4 : i32
    %729 = vector.broadcast %c4_i32_253 : i32 to vector<2x1xi32>
    %730 = arith.cmpi eq, %687, %729 : vector<2x1xi32>
    %731 = arith.extui %730 : vector<2x1xi1> to vector<2x1xi32>
    %732 = arith.sitofp %731 : vector<2x1xi32> to vector<2x1xf32>
    %733 = vector.broadcast %732 : vector<2x1xf32> to vector<2x32xf32>
    %734 = vector.broadcast %728 : vector<1x32xf32> to vector<2x32xf32>
    %735 = arith.mulf %733, %734 : vector<2x32xf32>
    %736 = arith.addf %727, %735 : vector<2x32xf32>
    %c41 = arith.constant 41 : index
    %c0_254 = arith.constant 0 : index
    %737 = vector.load %arg0[%c41, %c0_254] : memref<48x32xf32, #tpu.memory_space<vmem>>, vector<1x32xf32>
    %c5_i32_255 = arith.constant 5 : i32
    %738 = vector.broadcast %c5_i32_255 : i32 to vector<2x1xi32>
    %739 = arith.cmpi eq, %687, %738 : vector<2x1xi32>
    %740 = arith.extui %739 : vector<2x1xi1> to vector<2x1xi32>
    %741 = arith.sitofp %740 : vector<2x1xi32> to vector<2x1xf32>
    %742 = vector.broadcast %741 : vector<2x1xf32> to vector<2x32xf32>
    %743 = vector.broadcast %737 : vector<1x32xf32> to vector<2x32xf32>
    %744 = arith.mulf %742, %743 : vector<2x32xf32>
    %745 = arith.addf %736, %744 : vector<2x32xf32>
    %c42 = arith.constant 42 : index
    %c0_256 = arith.constant 0 : index
    %746 = vector.load %arg0[%c42, %c0_256] : memref<48x32xf32, #tpu.memory_space<vmem>>, vector<1x32xf32>
    %c6_i32_257 = arith.constant 6 : i32
    %747 = vector.broadcast %c6_i32_257 : i32 to vector<2x1xi32>
    %748 = arith.cmpi eq, %687, %747 : vector<2x1xi32>
    %749 = arith.extui %748 : vector<2x1xi1> to vector<2x1xi32>
    %750 = arith.sitofp %749 : vector<2x1xi32> to vector<2x1xf32>
    %751 = vector.broadcast %750 : vector<2x1xf32> to vector<2x32xf32>
    %752 = vector.broadcast %746 : vector<1x32xf32> to vector<2x32xf32>
    %753 = arith.mulf %751, %752 : vector<2x32xf32>
    %754 = arith.addf %745, %753 : vector<2x32xf32>
    %c43 = arith.constant 43 : index
    %c0_258 = arith.constant 0 : index
    %755 = vector.load %arg0[%c43, %c0_258] : memref<48x32xf32, #tpu.memory_space<vmem>>, vector<1x32xf32>
    %c7_i32_259 = arith.constant 7 : i32
    %756 = vector.broadcast %c7_i32_259 : i32 to vector<2x1xi32>
    %757 = arith.cmpi eq, %687, %756 : vector<2x1xi32>
    %758 = arith.extui %757 : vector<2x1xi1> to vector<2x1xi32>
    %759 = arith.sitofp %758 : vector<2x1xi32> to vector<2x1xf32>
    %760 = vector.broadcast %759 : vector<2x1xf32> to vector<2x32xf32>
    %761 = vector.broadcast %755 : vector<1x32xf32> to vector<2x32xf32>
    %762 = arith.mulf %760, %761 : vector<2x32xf32>
    %763 = arith.addf %754, %762 : vector<2x32xf32>
    %764 = tpu.concatenate %763, %662 in 1 : vector<2x32xf32>, vector<2x32xf32> -> vector<2x64xf32>
    %cst_260 = arith.constant dense<0.000000e+00> : vector<2x128xf32>
    %765 = tpu.matmul %764, %0, %cst_260 {dimension_numbers = #tpu.dot_dimension_numbers<[1], [0], [0], [1], [0, 0, 1, 1], [], []>, precision = #tpu.contract_precision<fp32>} : vector<2x64xf32>, vector<64x128xf32>, vector<2x128xf32> -> vector<2x128xf32>
    %766 = vector.broadcast %1 : vector<1x128xf32> to vector<2x128xf32>
    %767 = arith.addf %765, %766 : vector<2x128xf32>
    %cst_261 = arith.constant 5.000000e-01 : f32
    %768 = vector.broadcast %cst_261 : f32 to vector<2x128xf32>
    %769 = arith.mulf %768, %767 : vector<2x128xf32>
    %770 = arith.select %7, %767, %769 : vector<2x128xi1>, vector<2x128xf32>
    %771 = math.tanh %770 : vector<2x128xf32>
    %cst_262 = arith.constant 1.000000e+00 : f32
    %772 = vector.broadcast %cst_262 : f32 to vector<2x128xf32>
    %773 = arith.addf %772, %771 : vector<2x128xf32>
    %cst_263 = arith.constant 5.000000e-01 : f32
    %774 = vector.broadcast %cst_263 : f32 to vector<2x128xf32>
    %775 = arith.mulf %774, %773 : vector<2x128xf32>
    %776 = arith.select %7, %771, %775 : vector<2x128xi1>, vector<2x128xf32>
    %777 = vector.extract_strided_slice %776 {offsets = [0, 0], sizes = [2, 32], strides = [1, 1]} : vector<2x128xf32> to vector<2x32xf32>
    %778 = vector.extract_strided_slice %776 {offsets = [0, 32], sizes = [2, 32], strides = [1, 1]} : vector<2x128xf32> to vector<2x32xf32>
    %779 = vector.extract_strided_slice %776 {offsets = [0, 64], sizes = [2, 32], strides = [1, 1]} : vector<2x128xf32> to vector<2x32xf32>
    %780 = vector.extract_strided_slice %776 {offsets = [0, 96], sizes = [2, 32], strides = [1, 1]} : vector<2x128xf32> to vector<2x32xf32>
    %781 = arith.mulf %778, %660 : vector<2x32xf32>
    %782 = arith.mulf %777, %779 : vector<2x32xf32>
    %783 = arith.addf %781, %782 : vector<2x32xf32>
    %784 = math.tanh %783 : vector<2x32xf32>
    %785 = arith.mulf %780, %784 : vector<2x32xf32>
    %c7_264 = arith.constant 7 : index
    %c0_265 = arith.constant 0 : index
    %c0_266 = arith.constant 0 : index
    %786 = vector.load %arg3[%c7_264, %c0_265, %c0_266] : memref<8x32x128xf32, #tpu.memory_space<vmem>>, vector<1x32x128xf32>
    %787 = vector.shape_cast %786 : vector<1x32x128xf32> to vector<32x128xf32>
    %cst_267 = arith.constant dense<0.000000e+00> : vector<2x128xf32>
    %788 = tpu.matmul %785, %787, %cst_267 {dimension_numbers = #tpu.dot_dimension_numbers<[1], [0], [0], [1], [0, 0, 1, 1], [], []>, precision = #tpu.contract_precision<fp32>} : vector<2x32xf32>, vector<32x128xf32>, vector<2x128xf32> -> vector<2x128xf32>
    %c7_268 = arith.constant 7 : index
    %c0_269 = arith.constant 0 : index
    %c0_270 = arith.constant 0 : index
    %789 = vector.load %arg4[%c7_268, %c0_269, %c0_270] : memref<8x1x128xf32, #tpu.memory_space<vmem>>, vector<1x1x128xf32>
    %790 = vector.shape_cast %789 : vector<1x1x128xf32> to vector<1x128xf32>
    %791 = vector.broadcast %790 : vector<1x128xf32> to vector<2x128xf32>
    %792 = arith.addf %788, %791 : vector<2x128xf32>
    %793 = math.tanh %792 : vector<2x128xf32>
    %cst_271 = arith.constant 2.500000e+00 : f32
    %794 = vector.broadcast %cst_271 : f32 to vector<2x128xf32>
    %795 = arith.mulf %794, %793 : vector<2x128xf32>
    %c7_272 = arith.constant 7 : index
    %c0_273 = arith.constant 0 : index
    %c0_274 = arith.constant 0 : index
    %796 = vector.load %arg6[%c7_272, %c0_273, %c0_274] : memref<8x2x128xf32, #tpu.memory_space<vmem>>, vector<1x2x128xf32>
    %797 = vector.shape_cast %796 : vector<1x2x128xf32> to vector<2x128xf32>
    %798 = vector.shape_cast %795 : vector<2x128xf32> to vector<1x2x128xf32>
    tpu.vector_store %arg6[%c7_272, %c0_273, %c0_274], %798 {strides = array<i32>} : memref<8x2x128xf32, #tpu.memory_space<vmem>>, vector<1x2x128xf32>,
    %c7_275 = arith.constant 7 : index
    %c0_276 = arith.constant 0 : index
    %c0_277 = arith.constant 0 : index
    %799 = vector.load %arg5[%c7_275, %c0_276, %c0_277] : memref<8x2x128xf32, #tpu.memory_space<vmem>>, vector<1x2x128xf32>
    %800 = vector.shape_cast %799 : vector<1x2x128xf32> to vector<2x128xf32>
    %801 = arith.addf %795, %800 : vector<2x128xf32>
    %cst_278 = arith.constant dense<0xFF800000> : vector<2xf32>
    %802 = vector.multi_reduction <maximumf>, %801, %cst_278 [1] : vector<2x128xf32> to vector<2xf32>
    %803 = vector.shape_cast %802 : vector<2xf32> to vector<2x1xf32>
    %804 = tpu.iota {dimensions = array<i32: 1>} : vector<2x128xi32>
    %805 = vector.broadcast %803 : vector<2x1xf32> to vector<2x128xf32>
    %806 = arith.cmpf oge, %801, %805 : vector<2x128xf32>
    %c128_i32_279 = arith.constant 128 : i32
    %807 = vector.broadcast %c128_i32_279 : i32 to vector<2x128xi32>
    %808 = arith.select %806, %804, %807 : vector<2x128xi1>, vector<2x128xi32>
    %cst_280 = arith.constant dense<2147483647> : vector<2xi32>
    %809 = vector.multi_reduction <minsi>, %808, %cst_280 [1] : vector<2x128xi32> to vector<2xi32>
    %810 = vector.shape_cast %809 : vector<2xi32> to vector<2x1xi32>
    %c7_281 = arith.constant 7 : index
    %c0_282 = arith.constant 0 : index
    %c0_283 = arith.constant 0 : index
    %811 = vector.load %arg7[%c7_281, %c0_282, %c0_283] : memref<8x2x1xi32, #tpu.memory_space<vmem>>, vector<1x2x1xi32>
    %812 = vector.shape_cast %811 : vector<1x2x1xi32> to vector<2x1xi32>
    %813 = vector.shape_cast %810 : vector<2x1xi32> to vector<1x2x1xi32>
    tpu.vector_store %arg7[%c7_281, %c0_282, %c0_283], %813 {strides = array<i32>} : memref<8x2x1xi32, #tpu.memory_space<vmem>>, vector<1x2x1xi32>,
    %c0_284 = arith.constant 0 : index
    %c0_285 = arith.constant 0 : index
    %814 = vector.load %arg8[%c0_284, %c0_285] : memref<2x32xf32, #tpu.memory_space<vmem>>, vector<2x32xf32>
    tpu.vector_store %arg8[%c0_284, %c0_285], %785 {strides = array<i32>} : memref<2x32xf32, #tpu.memory_space<vmem>>, vector<2x32xf32>,
    %c0_286 = arith.constant 0 : index
    %c0_287 = arith.constant 0 : index
    %815 = vector.load %arg9[%c0_286, %c0_287] : memref<2x32xf32, #tpu.memory_space<vmem>>, vector<2x32xf32>
    tpu.vector_store %arg9[%c0_286, %c0_287], %783 {strides = array<i32>} : memref<2x32xf32, #tpu.memory_space<vmem>>, vector<2x32xf32>,
    return
  }
}

</mosaic_0001>

<bundles_post_ra>
// kernel: tpu_custom_call.1
= control target key start
LH: loop header
LB: loop body
LE: loop exit
PB: predicated region body
PF: predicated region fallthrough
CT: control target
= control target key end

     0   :  { %15 = vsyncpa [#allocation3], 0  ;;  %s14193_s0 = inlined_call_operand.vmem [shape: f32[48,32], index: 0, kind: input, shape index: {}]   ;;  %s14194_s1 = inlined_call_operand.vmem [shape: f32[64,128], index: 1, kind: input, shape index: {}]   ;;  %s14195_s2 = inlined_call_operand.vmem [shape: f32[1,128], index: 2, kind: input, shape index: {}]   ;;  %s14196_s3 = inlined_call_operand.hbm [shape: f32[8,32,128], index: 3, kind: input, shape index: {}]   ;;  %s14197_s4 = inlined_call_operand.vmem [shape: f32[8,1,128], index: 4, kind: input, shape index: {}]   ;;  %s14198_s5 = inlined_call_operand.vmem [shape: f32[8,2,128], index: 5, kind: input, shape index: {}]   ;;  %s14199_s6 = inlined_call_operand.hbm [shape: f32[8,2,128], index: 6, kind: output, shape index: {0}]   ;;  %s14200_s7 = inlined_call_operand.vmem [shape: s32[8,2,1], index: 7, kind: output, shape index: {1}]   ;;  %s14201_s8 = inlined_call_operand.hbm [shape: f32[2,32], index: 8, kind: output, shape index: {2}]   ;;  %s14202_s9 = inlined_call_operand.hbm [shape: f32[2,32], index: 9, kind: output, shape index: {3}]  }
   0x1   :  { %16 = vsyncpa [#allocation4], 0 }
   0x2   :  { %17 = vsyncpa [#allocation7], 0  ;;  %s12773_s30 = smov [#allocation2]   ;;  %s12679_s13 = scalar_lea.hbm %s14196_s3, 4096 }
   0x3   :  { %s29_s10 = sshll.u32 %s12773_s30, 4  ;;  %p12680_p0 = scmp.ne.s32.totalorder %s14196_s3, %s12679_s13  ;;  %s30_s10 = int_to_ptr.vmem [resolvable:$true] %s29_s10 }
   0x4   :  { %p12683_p1 = scmp.lt.u32.totalorder %s12679_s13, %s14196_s3 }
   0x6   :  { %p12685_p2 = pnand %p12683_p1, %p12680_p0 }
   0x8   :  { %12688 = shalt.err (!%p12685_p2)
}
   0x9   :  { %s12689_s18 = scalar_lea.vmem %s30_s10, 4096  ;;  %p12694_p4 = scmp.lt.s32.totalorder %s30_s10, %s30_s10 }
   0xa   :  { %p12690_p3 = scmp.ne.s32.totalorder %s30_s10, %s12689_s18  ;;  %p12695_p5 = scmp.lt.s32.totalorder %s12689_s18, %s12689_s18 }
   0xc   :  { %p12696_p6 = por %p12695_p5, %p12694_p4 }
   0xe   :  { %p12697_p7 = pnand %p12696_p6, %p12690_p3 }
  0x10   :  { %12700 = shalt.err (!%p12697_p7)
}
  0x11   :  { %s12774_s19 = smov 128   ;;  %s12775_s20 = smov 8  }
  0x12   :  { %35 = dma.hbm_to_vmem [thread:$0]  %s14196_s3, 4096, %s30_s10, [#allocation3], %s12774_s19, %s12774_s19, %s12775_s20  }
  0x13   :  { %12767 = dma.done.wait [#allocation3], 4096  }
  0x14   :  { %12768 = vsyncadd [#allocation3], 4294963200  ;;  %v12776_v0 = vmov 0.0|0.0   ;;  %vm12777_vm0 = vmmov 0   ;;  %v12778_v1 = vmov 0.0   ;;  %v43_v2 = vld [vmem:[%s14194_s1] sm:$0xff] }
  0x15   :  { %11576 = vmatprep.subr.bf16.mxu0 %v12776_v0  ;;  %10152 = vmatprep.mubr.msk.f32.mxu0 %vm12777_vm0, %v12778_v1  ;;  %v44_v3 = vld [vmem:[%s14194_s1 + $0x8] sm:$0xff]  ;;  %v45_v4 = vld [vmem:[%s14194_s1 + $0x10] sm:$0xff]  ;;  %v68_v5 = vand.u32 4294901760, %v43_v2  ;;  %v46_v7 = vld [vmem:[%s14194_s1 + $0x18] sm:$0xff]  ;;  %s12779_s18 = smov 64   ;;  %s12780_s19 = smov 32  }
  0x16   :  { %11648 = vmatprep.subr.bf16.mxu1 %v12776_v0  ;;  %10258 = vmatprep.mubr.msk.f32.mxu1 %vm12777_vm0, %v12778_v1  ;;  %v71_v6 = vand.u32 4294901760, %v44_v3  ;;  %v74_v8 = vand.u32 4294901760, %v45_v4  ;;  %v47_v9 = vld [vmem:[%s14194_s1 + $0x20] sm:$0xff]  ;;  %v48_v10 = vld [vmem:[%s14194_s1 + $0x28] sm:$0xff]  ;;  %v77_v11 = vand.u32 4294901760, %v46_v7  ;;  %v49_v16 = vld [vmem:[%s14194_s1 + $0x30] sm:$0xff] }
  0x17   :  { %v12874_v13 = vsub.f32 %v43_v2, %v68_v5  ;;  %v80_v14 = vand.u32 4294901760, %v47_v9  ;;  %v83_v15 = vand.u32 4294901760, %v48_v10  ;;  %v50_v17 = vld [vmem:[%s14194_s1 + $0x38] sm:$0xff]  ;;  %v86_v24 = vand.u32 4294901760, %v49_v16  ;;  %s12782_s27 = smov [#allocation5]  }
  0x18   :  { %v12872_v12 = vpack.c.bf16 %v71_v6, %v68_v5  ;;  %v12882_v18 = vsub.f32 %v44_v3, %v71_v6  ;;  %v12884_v19 = vsub.f32 %v45_v4, %v74_v8  ;;  %v12887_v20 = vpack.c.bf16 %v77_v11, %v74_v8  ;;  %v13041_v6 = vld [vmem:[%s14195_s2] ss:$0 sm:$0xff]  ;;  %s9303_s28 = sshll.u32 %s12782_s27, 4  ;;  %s14142_s28 = int_to_ptr.vmem [resolvable:$true] %s9303_s28 }
  0x19   :  { %v153_v21 = vand.u32 4294901760, %v12874_v13  ;;  %v12890_v22 = vsub.f32 %v46_v7, %v77_v11  ;;  %v89_v25 = vand.u32 4294901760, %v50_v17  ;;  %v12894_v26 = vpack.c.bf16 %v83_v15, %v80_v14 }
  0x1a   :  { %11578 = vmatpush3.bf16.msra.mxu0 %v12872_v12  ;;  %v160_v23 = vand.u32 4294901760, %v12882_v18  ;;  %v167_v27 = vand.u32 4294901760, %v12884_v19  ;;  %v12897_v28 = vsub.f32 %v47_v9, %v80_v14  ;;  %v12907_v32 = vsub.f32 %v48_v10, %v83_v15 }
  0x1b   :  { %11579 = vmatprep.subr.bf16.mxu0 %v12776_v0  ;;  %v154_v29 = vsub.f32 %v12874_v13, %v153_v21  ;;  %v174_v31 = vand.u32 4294901760, %v12890_v22  ;;  %v12910_v33 = vpack.c.bf16 %v89_v25, %v86_v24  ;;  %v12916_v36 = vsub.f32 %v49_v16, %v86_v24 }
  0x1c   :  { %v161_v30 = vsub.f32 %v12882_v18, %v160_v23  ;;  %v168_v34 = vsub.f32 %v12884_v19, %v167_v27  ;;  %v181_v35 = vand.u32 4294901760, %v12897_v28  ;;  %v12918_v37 = vsub.f32 %v50_v17, %v89_v25  ;;  %v627_v25 = vld [vmem:[#allocation2] sm:$0xff] }
  0x1d   :  { %v155_v38 = vand.u32 4294901760, %v154_v29  ;;  %v175_v40 = vsub.f32 %v12890_v22, %v174_v31  ;;  %v188_v41 = vand.u32 4294901760, %v12907_v32  ;;  %v195_v43 = vand.u32 4294901760, %v12916_v36 }
  0x1e   :  { %11581 = vmatpush3.bf16.msra.mxu0 %v12887_v20  ;;  %v162_v39 = vand.u32 4294901760, %v161_v30  ;;  %v182_v42 = vsub.f32 %v12897_v28, %v181_v35  ;;  %v202_v44 = vand.u32 4294901760, %v12918_v37  ;;  %v169_v46 = vand.u32 4294901760, %v168_v34  ;;  %v629_v34 = vld [vmem:[#allocation2 + $0x10] sm:$0xff] }
  0x1f   :  { %11582 = vmatprep.subr.bf16.mxu0 %v12776_v0  ;;  %v176_v47 = vand.u32 4294901760, %v175_v40  ;;  %v189_v48 = vsub.f32 %v12907_v32, %v188_v41  ;;  %v196_v49 = vsub.f32 %v12916_v36, %v195_v43  ;;  %v12956_v58 = vpack.c.bf16 %v12882_v18, %v12874_v13 }
  0x20   :  { %v12932_v45 = vpack.c.bf16 %v162_v39, %v155_v38  ;;  %v183_v51 = vand.u32 4294901760, %v182_v42  ;;  %v203_v53 = vsub.f32 %v12918_v37, %v202_v44  ;;  %v12963_v59 = vpack.c.bf16 %v12890_v22, %v12884_v19 }
  0x21   :  { %v12939_v50 = vpack.c.bf16 %v176_v47, %v169_v46  ;;  %v190_v52 = vand.u32 4294901760, %v189_v48  ;;  %v197_v55 = vand.u32 4294901760, %v196_v49  ;;  %v12971_v60 = vpack.c.bf16 %v12907_v32, %v12897_v28 }
  0x22   :  { %11584 = vmatpush3.bf16.msra.mxu0 %v12894_v26  ;;  %v204_v56 = vand.u32 4294901760, %v203_v53  ;;  %v12977_v61 = vpack.c.bf16 %v12918_v37, %v12916_v36  ;;  %v12996_v62 = vpack.c.bf16 %v160_v23, %v153_v21  ;;  %v13005_v63 = vpack.c.bf16 %v174_v31, %v167_v27  ;;  %v628_v27 = vld [vmem:[#allocation2 + $0x8] sm:$0xff] }
  0x23   :  { %11585 = vmatprep.subr.bf16.mxu0 %v12776_v0  ;;  %v12946_v54 = vpack.c.bf16 %v190_v52, %v183_v51  ;;  %v13013_v2 = vpack.c.bf16 %v188_v41, %v181_v35  ;;  %v13017_v3 = vpack.c.bf16 %v202_v44, %v195_v43  ;;  %v52_v4 = vlaneseq  ;;  %v630_v35 = vld [vmem:[#allocation2 + $0x18] sm:$0xff] }
  0x24   :  { %v12950_v57 = vpack.c.bf16 %v204_v56, %v197_v55  ;;  %v645_v28 = vand.u32 4294901760, %v627_v25  ;;  %v648_v29 = vand.u32 4294901760, %v628_v27  ;;  %v651_v36 = vand.u32 4294901760, %v629_v34 }
  0x25   :  { %v13036_v5 = vand.u32 127, %v52_v4  ;;  %v654_v37 = vand.u32 4294901760, %v630_v35  ;;  %vm641_vm4 = vcmask 261120   ;;  %vm1134_vm5 = vcmask 1041408  }
  0x26   :  { %11587 = vmatpush3.bf16.msra.mxu0 %v12910_v33  ;;  %v13060_v30 = vpack.c.bf16 %v648_v29, %v645_v28  ;;  %v725_v31 = vsub.f32 %v627_v25, %v645_v28  ;;  %v732_v32 = vsub.f32 %v628_v27, %v648_v29  ;;  %v739_v41 = vsub.f32 %v629_v34, %v651_v36 }
  0x27   :  { %11588 = vmatprep.subr.bf16.mxu0 %v12776_v0  ;;  %vm54_vm1 = vcmp.ge.s32.totalorder %v13036_v5, 64  ;;  %vm55_vm2 = vcmp.lt.s32.totalorder %v13036_v5, 96  ;;  %v11652_v40 = vpack.c.bf16 %v654_v37, %v651_v36  ;;  %v746_v42 = vsub.f32 %v630_v35, %v654_v37 }
  0x28   :  { %vm13046_vm3 = vmand %vm54_vm1, %vm55_vm2  ;;  %11650 = vmatpush3.bf16.msra.mxu1 %v13060_v30  ;;  %v726_v38 = vand.u32 4294901760, %v725_v31  ;;  %v733_v39 = vand.u32 4294901760, %v732_v32  ;;  %v740_v47 = vand.u32 4294901760, %v739_v41  ;;  %vm1155_vm8 = vcmask 1024  }
  0x29   :  { %10153 = vmatmul.mubr.f32.vlgmr.msra.gmra.mrb[0].mxu0 %v12778_v1  ;;  %11651 = vmatprep.subr.bf16.mxu1 %v12776_v0  ;;  %v747_v48 = vand.u32 4294901760, %v746_v42  ;;  %vm63_vm2 = vcmask 523264  }
  0x2a   :  { %11590 = vmatpush3.bf16.msra.mxu0 %v12932_v45  ;;  %10171 = vmatprep.mubr.msk.f32.mxu0 %vm12777_vm0, %v12778_v1  ;;  %v727_v43 = vsub.f32 %v725_v31, %v726_v38  ;;  %v734_v44 = vsub.f32 %v732_v32, %v733_v39  ;;  %v741_v52 = vsub.f32 %v739_v41, %v740_v47 }
  0x2b   :  { %11591 = vmatprep.subr.bf16.mxu0 %v12776_v0  ;;  %v748_v53 = vsub.f32 %v746_v42, %v747_v48 }
  0x2c   :  { %11653 = vmatpush3.bf16.msra.mxu1 %v11652_v40  ;;  %v728_v46 = vand.u32 4294901760, %v727_v43  ;;  %v735_v49 = vand.u32 4294901760, %v734_v44  ;;  %v742_v4 = vand.u32 4294901760, %v741_v52  ;;  %v9351_v52 = vld [vmem:[%s14193_s0 + $0x1] ss:$0 sm:$0xff] }
  0x2d   :  { %11654 = vmatprep.subr.bf16.mxu1 %v12776_v0 }
  0x2e   :  { %11593 = vmatpush3.bf16.msra.mxu0 %v12939_v50  ;;  %v11655_v56 = vpack.c.bf16 %v735_v49, %v728_v46 }
  0x2f   :  { %11594 = vmatprep.subr.bf16.mxu0 %v12776_v0 }
  0x32   :  { %11596 = vmatpush3.bf16.msra.mxu0 %v12946_v54 }
  0x33   :  { %11597 = vmatprep.subr.bf16.mxu0 %v12776_v0 }
  0x36   :  { %11599 = vmatpush3.bf16.msra.mxu0 %v12950_v57 }
  0x37   :  { %11600 = vmatprep.subr.bf16.mxu0 %v12776_v0 }
  0x39   :  { %10172 = vmatmul.mubr.f32.vlgmr.msra.gmra.mrb[0].mxu0 %v12778_v1 }
  0x3a   :  { %11602 = vmatpush3.bf16.msra.mxu0 %v12956_v58  ;;  %10190 = vmatprep.mubr.msk.f32.mxu0 %vm12777_vm0, %v12778_v1 }
  0x3b   :  { %11603 = vmatprep.subr.bf16.mxu0 %v12776_v0 }
  0x3e   :  { %11605 = vmatpush3.bf16.msra.mxu0 %v12963_v59 }
  0x3f   :  { %11606 = vmatprep.subr.bf16.mxu0 %v12776_v0 }
  0x42   :  { %11608 = vmatpush3.bf16.msra.mxu0 %v12971_v60 }
  0x43   :  { %11609 = vmatprep.subr.bf16.mxu0 %v12776_v0 }
  0x46   :  { %11611 = vmatpush3.bf16.msra.mxu0 %v12977_v61 }
  0x47   :  { %11612 = vmatprep.subr.bf16.mxu0 %v12776_v0 }
  0x49   :  { %10191 = vmatmul.mubr.f32.vlgmr.msra.gmra.mrb[0].mxu0 %v12778_v1 }
  0x4a   :  { %11614 = vmatpush3.bf16.msra.mxu0 %v12872_v12  ;;  %10209 = vmatprep.mubr.msk.f32.mxu0 %vm12777_vm0, %v12778_v1 }
  0x4b   :  { %11615 = vmatprep.subr.bf16.mxu0 %v12776_v0 }
  0x4e   :  { %11617 = vmatpush3.bf16.msra.mxu0 %v12887_v20 }
  0x4f   :  { %11618 = vmatprep.subr.bf16.mxu0 %v12776_v0 }
  0x52   :  { %11620 = vmatpush3.bf16.msra.mxu0 %v12894_v26 }
  0x53   :  { %11621 = vmatprep.subr.bf16.mxu0 %v12776_v0 }
  0x56   :  { %11623 = vmatpush3.bf16.msra.mxu0 %v12910_v33 }
  0x57   :  { %11624 = vmatprep.subr.bf16.mxu0 %v12776_v0 }
  0x59   :  { %10210 = vmatmul.mubr.f32.vlgmr.msra.gmra.mrb[0].mxu0 %v12778_v1 }
  0x5a   :  { %11626 = vmatpush3.bf16.msra.mxu0 %v12996_v62  ;;  %10228 = vmatprep.mubr.msk.f32.mxu0 %vm12777_vm0, %v12778_v1 }
  0x5b   :  { %11627 = vmatprep.subr.bf16.mxu0 %v12776_v0 }
  0x5e   :  { %11629 = vmatpush3.bf16.msra.mxu0 %v13005_v63 }
  0x5f   :  { %11630 = vmatprep.subr.bf16.mxu0 %v12776_v0 }
  0x62   :  { %11632 = vmatpush3.bf16.msra.mxu0 %v13013_v2 }
  0x63   :  { %11633 = vmatprep.subr.bf16.mxu0 %v12776_v0 }
  0x66   :  { %11635 = vmatpush3.bf16.msra.mxu0 %v13017_v3 }
  0x67   :  { %11636 = vmatprep.subr.bf16.mxu0 %v12776_v0 }
  0x69   :  { %10229 = vmatmul.mubr.f32.vlgmr.msra.gmra.mrb[0].mxu0 %v12778_v1 }
  0x6a   :  { %11638 = vmatpush3.bf16.msra.mxu0 %v12872_v12  ;;  %10247 = vmatprep.mubr.msk.f32.mxu0 %vm12777_vm0, %v12778_v1 }
  0x6b   :  { %11639 = vmatprep.subr.bf16.mxu0 %v12776_v0 }
  0x6e   :  { %11641 = vmatpush3.bf16.msra.mxu0 %v12887_v20 }
  0x6f   :  { %11642 = vmatprep.subr.bf16.mxu0 %v12776_v0 }
  0x72   :  { %11644 = vmatpush3.bf16.msra.mxu0 %v12894_v26 }
  0x73   :  { %11645 = vmatprep.subr.bf16.mxu0 %v12776_v0 }
  0x76   :  { %11647 = vmatpush3.bf16.msra.mxu0 %v12910_v33 }
  0x77   :  { %11756 = vmatprep.subr.bf16.mxu0 %v12776_v0 }
  0x79   :  { %10248 = vmatmul.mubr.f32.vlgmr.msra.gmra.mrb[0].mxu0 %v12778_v1 }
  0x7a   :  { %10438 = vmatprep.mubr.msk.f32.mxu0 %vm12777_vm0, %v12778_v1 }
 0x14c   :  { %v600_v7 = vpop.f32.mrb[0].mxu0 }
 0x14d   :  { %v12440_v8 = vadd.f32 %v13041_v6, %v600_v7  ;;  %v10249_v9 = vpop.f32.mrb[1].mxu0  ;;  %v749_v7 = vand.u32 4294901760, %v748_v53 }
 0x14e   :  { %v11661_v9 = vpack.c.bf16 %v732_v32, %v725_v31 }
 0x14f   :  { %v604_v11 = vmul.f32 0.5, %v12440_v8 }
 0x151   :  { %v605_v13 = vsel %vm13046_vm3, %v12440_v8, %v604_v11  ;;  %v11658_v8 = vpack.c.bf16 %v749_v7, %v742_v4  ;;  %v11664_v11 = vpack.c.bf16 %v746_v42, %v739_v41 }
 0x152   :  { %12629 = vtanh.f32 %v605_v13  ;;  %v11673_v13 = vpack.c.bf16 %v733_v39, %v726_v38 }
 0x15c   :  { %v12630_v14 = vpop.eup %12629 }
 0x15d   :  { %v607_v15 = vadd.f32 1.0, %v12630_v14 }
 0x15f   :  { %v608_v16 = vmul.f32 0.5, %v607_v15 }
 0x161   :  { %v609_v17 = vsel %vm13046_vm3, %v12630_v14, %v608_v16  ;;  %v11676_v14 = vpack.c.bf16 %v747_v48, %v740_v47 }
 0x162   :  { %612 = vrot.lane.b32.xlu0 %v609_v17, %s12779_s18  ;;  %v610_v21 = vmul.f32 0.0, %v609_v17 }
 0x1d4   :  { %v613_v18 = vpop.permute.xlu0 %612 }
 0x1d5   :  { %v615_v19 = vmul.f32 %v613_v18, %v609_v17 }
 0x1d7   :  { %617 = vrot.lane.b32.xlu0 %v615_v19, %s12780_s19 }
 0x249   :  { %v618_v22 = vpop.permute.xlu0 %617 }
 0x24a   :  { %v13056_v23 = vadd.f32 %v618_v22, %v610_v21 }
 0x24c   :  { %12631 = vtanh.f32 %v13056_v23 }
 0x256   :  { %v12632_v24 = vpop.eup %12631 }
 0x257   :  { %623 = vrot.lane.b32.xlu1 %v12632_v24, %s12779_s18  ;;  %v9347_v24 = vld [vmem:[%s14197_s4] ss:$0 sm:$0xff] }
 0x2c9   :  { %v624_v51 = vpop.permute.xlu1 %623 }
 0x2ca   :  { %v13065_v55 = vmul.f32 %v624_v51, %v609_v17  ;;  %v9349_v51 = vld [vmem:[%s14193_s0] ss:$0 sm:$0xff] }
 0x2cc   :  { %639 = vrot.lane.b32.xlu1 %v13065_v55, %s12780_s19 }
 0x33e   :  { %v640_v15 = vpop.permute.xlu1 %639 }
 0x33f   :  { %v642_v16 = vsel %vm641_vm4, %v640_v15, 0  ;;  %v9357_v15 = vld [vmem:[%s14193_s0 + $0x4] ss:$0 sm:$0xff] }
 0x340   :  { %v713_v18 = vand.u32 4294901760, %v642_v16 }
 0x342   :  { %v714_v19 = vsub.f32 %v642_v16, %v713_v18 }
 0x344   :  { %v715_v21 = vand.u32 4294901760, %v714_v19 }
 0x346   :  { %v716_v17 = vsub.f32 %v714_v19, %v715_v21 }
 0x348   :  { %v717_v22 = vand.u32 4294901760, %v716_v17 }
 0x34a   :  { %10259 = vmatmul.mubr.f32.vlgmr.msra.gmra.mrb[0].mxu1 %v717_v22 }
 0x34b   :  { %11656 = vmatpush3.bf16.msra.mxu1 %v11655_v56  ;;  %10269 = vmatprep.mubr.msk.f32.mxu1 %vm12777_vm0, %v12778_v1  ;;  %v9353_v56 = vld [vmem:[%s14193_s0 + $0x2] ss:$0 sm:$0xff] }
 0x34c   :  { %11657 = vmatprep.subr.bf16.mxu1 %v12776_v0 }
 0x34f   :  { %11659 = vmatpush3.bf16.msra.mxu1 %v11658_v8 }
 0x350   :  { %11660 = vmatprep.subr.bf16.mxu1 %v12776_v0 }
 0x352   :  { %10270 = vmatmul.mubr.f32.vlgmr.msra.gmra.mrb[0].mxu1 %v713_v18 }
 0x353   :  { %11662 = vmatpush3.bf16.msra.mxu1 %v11661_v9  ;;  %10280 = vmatprep.mubr.msk.f32.mxu1 %vm12777_vm0, %v12778_v1  ;;  %v9355_v9 = vld [vmem:[%s14193_s0 + $0x3] ss:$0 sm:$0xff] }
 0x354   :  { %11663 = vmatprep.subr.bf16.mxu1 %v12776_v0 }
 0x357   :  { %11665 = vmatpush3.bf16.msra.mxu1 %v11664_v11 }
 0x358   :  { %11666 = vmatprep.subr.bf16.mxu1 %v12776_v0 }
 0x35a   :  { %10281 = vmatmul.mubr.f32.vlgmr.msra.gmra.mrb[0].mxu1 %v714_v19 }
 0x35b   :  { %11668 = vmatpush3.bf16.msra.mxu1 %v13060_v30  ;;  %10291 = vmatprep.mubr.msk.f32.mxu1 %vm12777_vm0, %v12778_v1 }
 0x35c   :  { %11669 = vmatprep.subr.bf16.mxu1 %v12776_v0 }
 0x35f   :  { %11671 = vmatpush3.bf16.msra.mxu1 %v11652_v40 }
 0x360   :  { %11672 = vmatprep.subr.bf16.mxu1 %v12776_v0 }
 0x362   :  { %10292 = vmatmul.mubr.f32.vlgmr.msra.gmra.mrb[0].mxu1 %v715_v21  ;;  %v9359_v21 = vld [vmem:[%s14193_s0 + $0x5] ss:$0 sm:$0xff] }
 0x363   :  { %11674 = vmatpush3.bf16.msra.mxu1 %v11673_v13  ;;  %10302 = vmatprep.mubr.msk.f32.mxu1 %vm12777_vm0, %v12778_v1 }
 0x364   :  { %11675 = vmatprep.subr.bf16.mxu1 %v12776_v0 }
 0x367   :  { %11677 = vmatpush3.bf16.msra.mxu1 %v11676_v14 }
 0x368   :  { %11678 = vmatprep.subr.bf16.mxu1 %v12776_v0 }
 0x36a   :  { %10303 = vmatmul.mubr.f32.vlgmr.msra.gmra.mrb[0].mxu1 %v713_v18 }
 0x36b   :  { %11680 = vmatpush3.bf16.msra.mxu1 %v13060_v30  ;;  %10313 = vmatprep.mubr.msk.f32.mxu1 %vm12777_vm0, %v12778_v1  ;;  %v1132_v30 = vld [vmem:[%s14198_s5] sm:$0x3] }
 0x36c   :  { %11681 = vmatprep.subr.bf16.mxu1 %v12776_v0 }
 0x36f   :  { %11683 = vmatpush3.bf16.msra.mxu1 %v11652_v40 }
 0x370   :  { %11684 = vmatprep.subr.bf16.mxu1 %v12776_v0 }
 0x372   :  { %10314 = vmatmul.mubr.f32.vlgmr.msra.gmra.mrb[0].mxu1 %v713_v18 }
 0x373   :  { %11686 = vmatpush3.bf16.msra.mxu1 %v12872_v12  ;;  %10332 = vmatprep.mubr.msk.f32.mxu1 %vm12777_vm0, %v12778_v1 }
 0x374   :  { %11687 = vmatprep.subr.bf16.mxu1 %v12776_v0 }
 0x377   :  { %11689 = vmatpush3.bf16.msra.mxu1 %v12887_v20 }
 0x378   :  { %11690 = vmatprep.subr.bf16.mxu1 %v12776_v0 }
 0x37b   :  { %11692 = vmatpush3.bf16.msra.mxu1 %v12894_v26 }
 0x37c   :  { %11693 = vmatprep.subr.bf16.mxu1 %v12776_v0 }
 0x37f   :  { %11695 = vmatpush3.bf16.msra.mxu1 %v12910_v33 }
 0x380   :  { %11696 = vmatprep.subr.bf16.mxu1 %v12776_v0 }
 0x445   :  { %v1125_v25 = vpop.f32.mrb[0].mxu1 }
 0x446   :  { %v12441_v27 = vadd.f32 %v9347_v24, %v1125_v25  ;;  %v10315_v28 = vpop.f32.mrb[1].mxu1  ;;  %v9361_v25 = vld [vmem:[%s14193_s0 + $0x6] ss:$0 sm:$0xff] }
 0x448   :  { %12633 = vtanh.f32 %v12441_v27 }
 0x452   :  { %v12634_v29 = vpop.eup %12633 }
 0x453   :  { %v1130_v31 = vmul.f32 2.5, %v12634_v29 }
 0x455   :  { %1131 = vst [vmem:[#allocation5] sm:$0x3] %v1130_v31  ;;  %v1133_v32 = vadd.f32 %v1132_v30, %v1130_v31  ;;  %v9363_v30 = vld [vmem:[%s14193_s0 + $0x7] ss:$0 sm:$0xff] }
 0x457   :  { %v1135_v34 = vsel %vm1134_vm5, %v1133_v32, -inf }
 0x458   :  { %1136 = vmax.xlane.f32.xlu0 %v1135_v34 }
 0x4e5   :  { %v1137_v35 = vpop.xlane.xlu0 %1136 }
 0x4e6   :  { %vm1138_vm6 = vcmp.ge.f32.partialorder %v1133_v32, %v1137_v35 }
 0x4e7   :  { %v1139_v36 = vsel %vm1138_vm6, %v13036_v5, 128 }
 0x4e8   :  { %v1140_v37 = vsel %vm1134_vm5, %v1139_v36, 2147483647 }
 0x4e9   :  { %v1142_v38 = vshra.s32 %v1140_v37, 16  ;;  %v1141_v40 = vand.u32 65535, %v1140_v37 }
 0x4eb   :  { %v1144_v39 = vcvt.s32.f32 %v1142_v38  ;;  %v1143_v42 = vcvt.s32.f32 %v1141_v40 }
 0x4ed   :  { %1145 = vmin.xlane.f32.xlu1 %v1144_v39 }
 0x57a   :  { %v1146_v41 = vpop.xlane.xlu1 %1145 }
 0x57b   :  { %vm1147_vm7 = vcmp.eq.f32.partialorder %v1144_v39, %v1146_v41  ;;  %v1152_v44 = vcvt.f32.s32 %v1146_v41 }
 0x57c   :  { %v1148_v43 = vsel %vm1147_vm7, %v1143_v42, inf }
 0x57d   :  { %1149 = vmin.xlane.f32.xlu0 %v1148_v43  ;;  %v1153_v47 = vshll.u32 %v1152_v44, 16 }
 0x593   :  { %1237 = vrot.lane.b32.xlu0 %v13065_v55, %s12779_s18 }
 0x60a   :  { %v1150_v46 = vpop.xlane.xlu0 %1149 }
 0x60b   :  { %v1151_v48 = vcvt.f32.s32 %v1150_v46 }
 0x60d   :  { %v1154_v49 = vadd.s32 %v1153_v47, %v1151_v48 }
 0x60e   :  { %v1238_v38 = vpop.permute.xlu0 %1237 }
 0x60f   :  { %vm1158_vm9 = vcmp.eq.s32.totalorder %v1154_v49, 0  ;;  %vm1168_vm10 = vcmp.eq.s32.totalorder %v1154_v49, 1  ;;  %vm1178_vm11 = vcmp.eq.s32.totalorder %v1154_v49, 2  ;;  %vm1188_vm12 = vcmp.eq.s32.totalorder %v1154_v49, 3  ;;  %1156 = vst.msk [vmem:[%s14200_s7] sm:$0x3] %vm1155_vm8, %v1154_v49 }
 0x610   :  { %v9348_v53 = vsel %vm1158_vm9, 1.0, %v12778_v1  ;;  %v9350_v55 = vsel %vm1168_vm10, 1.0, %v12778_v1  ;;  %v9352_v4 = vsel %vm1178_vm11, 1.0, %v12778_v1  ;;  %v9354_v11 = vsel %vm1188_vm12, 1.0, %v12778_v1 }
 0x611   :  { %v1165_v7 = vmul.f32 %v9349_v51, %v9348_v53  ;;  %v1175_v8 = vmul.f32 %v9351_v52, %v9350_v55  ;;  %vm1198_vm13 = vcmp.eq.s32.totalorder %v1154_v49, 4  ;;  %v1185_v14 = vmul.f32 %v9353_v56, %v9352_v4 }
 0x612   :  { %vm1208_vm14 = vcmp.eq.s32.totalorder %v1154_v49, 5  ;;  %v9356_v16 = vsel %vm1198_vm13, 1.0, %v12778_v1  ;;  %v1195_v19 = vmul.f32 %v9355_v9, %v9354_v11  ;;  %vm1218_vm15 = vcmp.eq.s32.totalorder %v1154_v49, 6 }
 0x613   :  { %v1176_v13 = vadd.f32 %v1175_v8, %v1165_v7  ;;  %v9358_v17 = vsel %vm1208_vm14, 1.0, %v12778_v1  ;;  %v1205_v24 = vmul.f32 %v9357_v15, %v9356_v16  ;;  %vm1228_vm1 = vcmp.eq.s32.totalorder %v1154_v49, 7  ;;  %v1805_v15 = vld [vmem:[#allocation2 + $0x20] sm:$0xff]  ;;  %v1806_v16 = vld [vmem:[#allocation2 + $0x28] sm:$0xff] }
 0x614   :  { %v9360_v27 = vsel %vm1218_vm15, 1.0, %v12778_v1  ;;  %v1215_v29 = vmul.f32 %v9359_v21, %v9358_v17  ;;  %v9362_v31 = vsel %vm1228_vm1, 1.0, %v12778_v1 }
 0x615   :  { %v1186_v18 = vadd.f32 %v1185_v14, %v1176_v13  ;;  %v1225_v34 = vmul.f32 %v9361_v25, %v9360_v27  ;;  %v1235_v36 = vmul.f32 %v9363_v30, %v9362_v31  ;;  %v1808_v25 = vld [vmem:[#allocation2 + $0x38] sm:$0xff] }
 0x616   :  { %v1832_v27 = vand.u32 4294901760, %v1808_v25 }
 0x617   :  { %v1196_v22 = vadd.f32 %v1195_v19, %v1186_v18  ;;  %v1823_v18 = vand.u32 4294901760, %v1805_v15  ;;  %v1826_v19 = vand.u32 4294901760, %v1806_v16 }
 0x619   :  { %v1206_v28 = vadd.f32 %v1205_v24, %v1196_v22  ;;  %v13215_v21 = vpack.c.bf16 %v1826_v19, %v1823_v18  ;;  %v1903_v17 = vsub.f32 %v1805_v15, %v1823_v18  ;;  %v1910_v22 = vsub.f32 %v1806_v16, %v1826_v19  ;;  %v1807_v24 = vld [vmem:[#allocation2 + $0x30] sm:$0xff] }
 0x61b   :  { %v1216_v32 = vadd.f32 %v1215_v29, %v1206_v28  ;;  %11758 = vmatpush3.bf16.msra.mxu0 %v13215_v21  ;;  %v1904_v28 = vand.u32 4294901760, %v1903_v17  ;;  %v1911_v29 = vand.u32 4294901760, %v1910_v22 }
 0x61c   :  { %11759 = vmatprep.subr.bf16.mxu0 %v12776_v0 }
 0x61d   :  { %v1226_v35 = vadd.f32 %v1225_v34, %v1216_v32  ;;  %v1924_v32 = vsub.f32 %v1808_v25, %v1832_v27  ;;  %v1905_v34 = vsub.f32 %v1903_v17, %v1904_v28 }
 0x61f   :  { %v1236_v37 = vadd.f32 %v1235_v36, %v1226_v35  ;;  %v1912_v36 = vsub.f32 %v1910_v22, %v1911_v29 }
 0x621   :  { %v1240_v39 = vsel %vm641_vm4, %v1236_v37, %v1238_v38  ;;  %v1906_v38 = vand.u32 4294901760, %v1905_v34 }
 0x622   :  { %v1242_v40 = vsel %vm63_vm2, %v1240_v39, 0 }
 0x623   :  { %v1317_v41 = vand.u32 4294901760, %v1242_v40 }
 0x625   :  { %v1318_v42 = vsub.f32 %v1242_v40, %v1317_v41  ;;  %v1925_v40 = vand.u32 4294901760, %v1924_v32 }
 0x627   :  { %v1319_v43 = vand.u32 4294901760, %v1318_v42 }
 0x629   :  { %v1320_v44 = vsub.f32 %v1318_v42, %v1319_v43 }
 0x62b   :  { %v1321_v46 = vand.u32 4294901760, %v1320_v44 }
 0x62d   :  { %10333 = vmatmul.mubr.f32.vlgmr.msra.gmra.mrb[2].mxu1 %v1321_v46 }
 0x62e   :  { %11698 = vmatpush3.bf16.msra.mxu1 %v12932_v45  ;;  %10351 = vmatprep.mubr.msk.f32.mxu1 %vm12777_vm0, %v12778_v1 }
 0x62f   :  { %11699 = vmatprep.subr.bf16.mxu1 %v12776_v0 }
 0x632   :  { %11701 = vmatpush3.bf16.msra.mxu1 %v12939_v50 }
 0x633   :  { %11702 = vmatprep.subr.bf16.mxu1 %v12776_v0 }
 0x636   :  { %11704 = vmatpush3.bf16.msra.mxu1 %v12946_v54 }
 0x637   :  { %11705 = vmatprep.subr.bf16.mxu1 %v12776_v0 }
 0x63a   :  { %11707 = vmatpush3.bf16.msra.mxu1 %v12950_v57 }
 0x63b   :  { %11708 = vmatprep.subr.bf16.mxu1 %v12776_v0 }
 0x63d   :  { %10352 = vmatmul.mubr.f32.vlgmr.msra.gmra.mrb[2].mxu1 %v1317_v41 }
 0x63e   :  { %11710 = vmatpush3.bf16.msra.mxu1 %v12956_v58  ;;  %10370 = vmatprep.mubr.msk.f32.mxu1 %vm12777_vm0, %v12778_v1 }
 0x63f   :  { %11711 = vmatprep.subr.bf16.mxu1 %v12776_v0 }
 0x642   :  { %11713 = vmatpush3.bf16.msra.mxu1 %v12963_v59 }
 0x643   :  { %11714 = vmatprep.subr.bf16.mxu1 %v12776_v0 }
 0x646   :  { %11716 = vmatpush3.bf16.msra.mxu1 %v12971_v60 }
 0x647   :  { %11717 = vmatprep.subr.bf16.mxu1 %v12776_v0 }
 0x64a   :  { %11719 = vmatpush3.bf16.msra.mxu1 %v12977_v61 }
 0x64b   :  { %11720 = vmatprep.subr.bf16.mxu1 %v12776_v0 }
 0x64d   :  { %10371 = vmatmul.mubr.f32.vlgmr.msra.gmra.mrb[2].mxu1 %v1318_v42 }
 0x64e   :  { %11722 = vmatpush3.bf16.msra.mxu1 %v12872_v12  ;;  %10389 = vmatprep.mubr.msk.f32.mxu1 %vm12777_vm0, %v12778_v1 }
 0x64f   :  { %11723 = vmatprep.subr.bf16.mxu1 %v12776_v0 }
 0x652   :  { %11725 = vmatpush3.bf16.msra.mxu1 %v12887_v20 }
 0x653   :  { %11726 = vmatprep.subr.bf16.mxu1 %v12776_v0 }
 0x656   :  { %11728 = vmatpush3.bf16.msra.mxu1 %v12894_v26 }
 0x657   :  { %11729 = vmatprep.subr.bf16.mxu1 %v12776_v0 }
 0x65a   :  { %11731 = vmatpush3.bf16.msra.mxu1 %v12910_v33 }
 0x65b   :  { %11732 = vmatprep.subr.bf16.mxu1 %v12776_v0 }
 0x65d   :  { %10390 = vmatmul.mubr.f32.vlgmr.msra.gmra.mrb[2].mxu1 %v1319_v43  ;;  %v1926_v43 = vsub.f32 %v1924_v32, %v1925_v40 }
 0x65e   :  { %11734 = vmatpush3.bf16.msra.mxu1 %v12996_v62  ;;  %10408 = vmatprep.mubr.msk.f32.mxu1 %vm12777_vm0, %v12778_v1 }
 0x65f   :  { %11735 = vmatprep.subr.bf16.mxu1 %v12776_v0 }
 0x662   :  { %11737 = vmatpush3.bf16.msra.mxu1 %v13005_v63 }
 0x663   :  { %11738 = vmatprep.subr.bf16.mxu1 %v12776_v0 }
 0x666   :  { %11740 = vmatpush3.bf16.msra.mxu1 %v13013_v2 }
 0x667   :  { %11741 = vmatprep.subr.bf16.mxu1 %v12776_v0 }
 0x66a   :  { %11743 = vmatpush3.bf16.msra.mxu1 %v13017_v3 }
 0x66b   :  { %11744 = vmatprep.subr.bf16.mxu1 %v12776_v0 }
 0x66d   :  { %10409 = vmatmul.mubr.f32.vlgmr.msra.gmra.mrb[2].mxu1 %v1317_v41 }
 0x66e   :  { %11746 = vmatpush3.bf16.msra.mxu1 %v12872_v12  ;;  %10427 = vmatprep.mubr.msk.f32.mxu1 %vm12777_vm0, %v12778_v1 }
 0x66f   :  { %11747 = vmatprep.subr.bf16.mxu1 %v12776_v0 }
 0x672   :  { %11749 = vmatpush3.bf16.msra.mxu1 %v12887_v20 }
 0x673   :  { %11750 = vmatprep.subr.bf16.mxu1 %v12776_v0 }
 0x676   :  { %11752 = vmatpush3.bf16.msra.mxu1 %v12894_v26 }
 0x677   :  { %11753 = vmatprep.subr.bf16.mxu1 %v12776_v0 }
 0x67a   :  { %11755 = vmatpush3.bf16.msra.mxu1 %v12910_v33 }
 0x67b   :  { %11864 = vmatprep.subr.bf16.mxu1 %v12776_v0 }
 0x67d   :  { %10428 = vmatmul.mubr.f32.vlgmr.msra.gmra.mrb[2].mxu1 %v1317_v41  ;;  %v1913_v41 = vand.u32 4294901760, %v1912_v36 }
 0x67e   :  { %10618 = vmatprep.mubr.msk.f32.mxu1 %vm12777_vm0, %v12778_v1 }
 0x67f   :  { %v11763_v44 = vpack.c.bf16 %v1913_v41, %v1906_v38  ;;  %v9369_v41 = vld [vmem:[%s14193_s0 + $0x8] ss:$0 sm:$0xff] }
 0x750   :  { %v1777_v47 = vpop.f32.mrb[2].mxu1 }
 0x751   :  { %v12442_v48 = vadd.f32 %v13041_v6, %v1777_v47  ;;  %v10429_v49 = vpop.f32.mrb[3].mxu1  ;;  %v1927_v47 = vand.u32 4294901760, %v1926_v43 }
 0x752   :  { %v11769_v49 = vpack.c.bf16 %v1910_v22, %v1903_v17 }
 0x753   :  { %v1781_v51 = vmul.f32 0.5, %v12442_v48 }
 0x755   :  { %v1782_v52 = vsel %vm13046_vm3, %v12442_v48, %v1781_v51 }
 0x756   :  { %12635 = vtanh.f32 %v1782_v52  ;;  %v11781_v52 = vpack.c.bf16 %v1911_v29, %v1904_v28 }
 0x760   :  { %v12636_v53 = vpop.eup %12635 }
 0x761   :  { %v1784_v55 = vadd.f32 1.0, %v12636_v53 }
 0x763   :  { %v1785_v56 = vmul.f32 0.5, %v1784_v55 }
 0x765   :  { %v1786_v4 = vsel %vm13046_vm3, %v12636_v53, %v1785_v56 }
 0x766   :  { %1789 = vrot.lane.b32.xlu1 %v1786_v4, %s12779_s18  ;;  %v1787_v9 = vmul.f32 %v1786_v4, %v13056_v23  ;;  %v1829_v23 = vand.u32 4294901760, %v1807_v24 }
 0x768   :  { %v11760_v30 = vpack.c.bf16 %v1832_v27, %v1829_v23  ;;  %v1917_v31 = vsub.f32 %v1807_v24, %v1829_v23 }
 0x76a   :  { %11761 = vmatpush3.bf16.msra.mxu0 %v11760_v30  ;;  %v1918_v39 = vand.u32 4294901760, %v1917_v31  ;;  %v11772_v51 = vpack.c.bf16 %v1924_v32, %v1917_v31 }
 0x76b   :  { %11762 = vmatprep.subr.bf16.mxu0 %v12776_v0 }
 0x76c   :  { %v1919_v42 = vsub.f32 %v1917_v31, %v1918_v39  ;;  %v11784_v53 = vpack.c.bf16 %v1925_v40, %v1918_v39 }
 0x76e   :  { %v1920_v46 = vand.u32 4294901760, %v1919_v42  ;;  %v9371_v42 = vld [vmem:[%s14193_s0 + $0x9] ss:$0 sm:$0xff] }
 0x770   :  { %v11766_v48 = vpack.c.bf16 %v1927_v47, %v1920_v46 }
 0x7d8   :  { %v1790_v7 = vpop.permute.xlu1 %1789 }
 0x7d9   :  { %v1792_v8 = vmul.f32 %v1790_v7, %v1786_v4 }
 0x7db   :  { %1794 = vrot.lane.b32.xlu1 %v1792_v8, %s12780_s19 }
 0x84d   :  { %v1795_v11 = vpop.permute.xlu1 %1794 }
 0x84e   :  { %v13211_v13 = vadd.f32 %v1795_v11, %v1787_v9 }
 0x850   :  { %12637 = vtanh.f32 %v13211_v13 }
 0x85a   :  { %v12638_v14 = vpop.eup %12637 }
 0x85b   :  { %1800 = vrot.lane.b32.xlu0 %v12638_v14, %s12779_s18  ;;  %v9365_v14 = vld [vmem:[%s14197_s4 + $0x1] ss:$0 sm:$0xff] }
 0x8cd   :  { %v1801_v35 = vpop.permute.xlu0 %1800 }
 0x8ce   :  { %v13219_v37 = vmul.f32 %v1801_v35, %v1786_v4 }
 0x8d0   :  { %1818 = vrot.lane.b32.xlu1 %v13219_v37, %s12780_s19 }
 0x942   :  { %v1819_v55 = vpop.permute.xlu1 %1818 }
 0x943   :  { %v1820_v56 = vsel %vm641_vm4, %v1819_v55, 0 }
 0x944   :  { %v1891_v4 = vand.u32 4294901760, %v1820_v56 }
 0x946   :  { %v1892_v7 = vsub.f32 %v1820_v56, %v1891_v4 }
 0x948   :  { %v1893_v8 = vand.u32 4294901760, %v1892_v7 }
 0x94a   :  { %v1894_v9 = vsub.f32 %v1892_v7, %v1893_v8 }
 0x94c   :  { %v1895_v11 = vand.u32 4294901760, %v1894_v9 }
 0x94e   :  { %10439 = vmatmul.mubr.f32.vlgmr.msra.gmra.mrb[2].mxu0 %v1895_v11 }
 0x94f   :  { %11764 = vmatpush3.bf16.msra.mxu0 %v11763_v44  ;;  %10449 = vmatprep.mubr.msk.f32.mxu0 %vm12777_vm0, %v12778_v1  ;;  %v9373_v44 = vld [vmem:[%s14193_s0 + $0xa] ss:$0 sm:$0xff] }
 0x950   :  { %11765 = vmatprep.subr.bf16.mxu0 %v12776_v0 }
 0x953   :  { %11767 = vmatpush3.bf16.msra.mxu0 %v11766_v48 }
 0x954   :  { %11768 = vmatprep.subr.bf16.mxu0 %v12776_v0 }
 0x956   :  { %10450 = vmatmul.mubr.f32.vlgmr.msra.gmra.mrb[2].mxu0 %v1891_v4 }
 0x957   :  { %11770 = vmatpush3.bf16.msra.mxu0 %v11769_v49  ;;  %10460 = vmatprep.mubr.msk.f32.mxu0 %vm12777_vm0, %v12778_v1  ;;  %v9375_v49 = vld [vmem:[%s14193_s0 + $0xb] ss:$0 sm:$0xff] }
 0x958   :  { %11771 = vmatprep.subr.bf16.mxu0 %v12776_v0 }
 0x95b   :  { %11773 = vmatpush3.bf16.msra.mxu0 %v11772_v51 }
 0x95c   :  { %11774 = vmatprep.subr.bf16.mxu0 %v12776_v0 }
 0x95e   :  { %10461 = vmatmul.mubr.f32.vlgmr.msra.gmra.mrb[2].mxu0 %v1892_v7 }
 0x95f   :  { %11776 = vmatpush3.bf16.msra.mxu0 %v13215_v21  ;;  %10471 = vmatprep.mubr.msk.f32.mxu0 %vm12777_vm0, %v12778_v1 }
 0x960   :  { %11777 = vmatprep.subr.bf16.mxu0 %v12776_v0 }
 0x963   :  { %11779 = vmatpush3.bf16.msra.mxu0 %v11760_v30 }
 0x964   :  { %11780 = vmatprep.subr.bf16.mxu0 %v12776_v0 }
 0x966   :  { %10472 = vmatmul.mubr.f32.vlgmr.msra.gmra.mrb[2].mxu0 %v1893_v8 }
 0x967   :  { %11782 = vmatpush3.bf16.msra.mxu0 %v11781_v52  ;;  %10482 = vmatprep.mubr.msk.f32.mxu0 %vm12777_vm0, %v12778_v1 }
 0x968   :  { %11783 = vmatprep.subr.bf16.mxu0 %v12776_v0 }
 0x96b   :  { %11785 = vmatpush3.bf16.msra.mxu0 %v11784_v53 }
 0x96c   :  { %11786 = vmatprep.subr.bf16.mxu0 %v12776_v0 }
 0x96e   :  { %10483 = vmatmul.mubr.f32.vlgmr.msra.gmra.mrb[2].mxu0 %v1891_v4 }
 0x96f   :  { %11788 = vmatpush3.bf16.msra.mxu0 %v13215_v21  ;;  %10493 = vmatprep.mubr.msk.f32.mxu0 %vm12777_vm0, %v12778_v1  ;;  %v9366_v21 = vld [vmem:[%s14198_s5 + $0x2] sm:$0x3] }
 0x970   :  { %11789 = vmatprep.subr.bf16.mxu0 %v12776_v0 }
 0x973   :  { %11791 = vmatpush3.bf16.msra.mxu0 %v11760_v30 }
 0x974   :  { %11792 = vmatprep.subr.bf16.mxu0 %v12776_v0 }
 0x976   :  { %10494 = vmatmul.mubr.f32.vlgmr.msra.gmra.mrb[2].mxu0 %v1891_v4 }
 0x977   :  { %11794 = vmatpush3.bf16.msra.mxu0 %v12872_v12  ;;  %10512 = vmatprep.mubr.msk.f32.mxu0 %vm12777_vm0, %v12778_v1 }
 0x978   :  { %11795 = vmatprep.subr.bf16.mxu0 %v12776_v0 }
 0x97b   :  { %11797 = vmatpush3.bf16.msra.mxu0 %v12887_v20 }
 0x97c   :  { %11798 = vmatprep.subr.bf16.mxu0 %v12776_v0 }
 0x97f   :  { %11800 = vmatpush3.bf16.msra.mxu0 %v12894_v26 }
 0x980   :  { %11801 = vmatprep.subr.bf16.mxu0 %v12776_v0 }
 0x983   :  { %11803 = vmatpush3.bf16.msra.mxu0 %v12910_v33 }
 0x984   :  { %11804 = vmatprep.subr.bf16.mxu0 %v12776_v0 }
 0xa49   :  { %v2303_v15 = vpop.f32.mrb[2].mxu0 }
 0xa4a   :  { %v12443_v16 = vadd.f32 %v9365_v14, %v2303_v15  ;;  %v10495_v18 = vpop.f32.mrb[3].mxu0 }
 0xa4c   :  { %12639 = vtanh.f32 %v12443_v16 }
 0xa56   :  { %v12640_v19 = vpop.eup %12639 }
 0xa57   :  { %v2308_v17 = vmul.f32 2.5, %v12640_v19 }
 0xa59   :  { %2310 = vst [vmem:[#allocation5 + $0x2] sm:$0x3] %v2308_v17  ;;  %v2313_v22 = vadd.f32 %v9366_v21, %v2308_v17 }
 0xa5b   :  { %v2314_v24 = vsel %vm1134_vm5, %v2313_v22, -inf }
 0xa5c   :  { %2315 = vmax.xlane.f32.xlu0 %v2314_v24 }
 0xae9   :  { %v2316_v25 = vpop.xlane.xlu0 %2315 }
 0xaea   :  { %vm2317_vm6 = vcmp.ge.f32.partialorder %v2313_v22, %v2316_v25 }
 0xaeb   :  { %v2318_v23 = vsel %vm2317_vm6, %v13036_v5, 128 }
 0xaec   :  { %v2319_v27 = vsel %vm1134_vm5, %v2318_v23, 2147483647 }
 0xaed   :  { %v2321_v28 = vshra.s32 %v2319_v27, 16  ;;  %v2320_v30 = vand.u32 65535, %v2319_v27 }
 0xaef   :  { %v2323_v29 = vcvt.s32.f32 %v2321_v28  ;;  %v2322_v32 = vcvt.s32.f32 %v2320_v30 }
 0xaf1   :  { %2324 = vmin.xlane.f32.xlu1 %v2323_v29 }
 0xb7e   :  { %v2325_v31 = vpop.xlane.xlu1 %2324 }
 0xb7f   :  { %vm2326_vm7 = vcmp.eq.f32.partialorder %v2323_v29, %v2325_v31  ;;  %v2331_v35 = vcvt.f32.s32 %v2325_v31 }
 0xb80   :  { %v2327_v34 = vsel %vm2326_vm7, %v2322_v32, inf }
 0xb81   :  { %2328 = vmin.xlane.f32.xlu0 %v2327_v34  ;;  %v2332_v38 = vshll.u32 %v2331_v35, 16  ;;  %v2944_v35 = vld [vmem:[#allocation2 + $0x40] sm:$0xff] }
 0xb97   :  { %2376 = vrot.lane.b32.xlu0 %v13219_v37, %s12779_s18 }
 0xc0e   :  { %v2329_v36 = vpop.xlane.xlu0 %2328 }
 0xc0f   :  { %v2330_v39 = vcvt.f32.s32 %v2329_v36  ;;  %v2945_v36 = vld [vmem:[#allocation2 + $0x48] sm:$0xff] }
 0xc11   :  { %v2333_v40 = vadd.s32 %v2332_v38, %v2330_v39  ;;  %v2962_v38 = vand.u32 4294901760, %v2944_v35  ;;  %v2965_v39 = vand.u32 4294901760, %v2945_v36 }
 0xc12   :  { %v2377_v7 = vpop.permute.xlu0 %2376 }
 0xc13   :  { %9367 = vst.msk [vmem:[%s14200_s7 + $0x2] sm:$0x3] %vm1155_vm8, %v2333_v40  ;;  %vm2337_vm9 = vcmp.eq.s32.totalorder %v2333_v40, 0  ;;  %vm2347_vm10 = vcmp.eq.s32.totalorder %v2333_v40, 1  ;;  %vm2357_vm11 = vcmp.eq.s32.totalorder %v2333_v40, 2  ;;  %vm2367_vm12 = vcmp.eq.s32.totalorder %v2333_v40, 3 }
 0xc14   :  { %v9368_v37 = vsel %vm2337_vm9, 1.0, %v12778_v1  ;;  %v9370_v43 = vsel %vm2347_vm10, 1.0, %v12778_v1  ;;  %v9372_v46 = vsel %vm2357_vm11, 1.0, %v12778_v1  ;;  %v9374_v51 = vsel %vm2367_vm12, 1.0, %v12778_v1 }
 0xc15   :  { %v2344_v47 = vmul.f32 %v9369_v41, %v9368_v37  ;;  %v2354_v48 = vmul.f32 %v9371_v42, %v9370_v43  ;;  %v2364_v53 = vmul.f32 %v9373_v44, %v9372_v46  ;;  %v2374_v56 = vmul.f32 %v9375_v49, %v9374_v51  ;;  %v2946_v37 = vld [vmem:[#allocation2 + $0x50] sm:$0xff]  ;;  %v2947_v43 = vld [vmem:[#allocation2 + $0x58] sm:$0xff] }
 0xc16   :  { %v13354_v40 = vpack.c.bf16 %v2965_v39, %v2962_v38  ;;  %v3042_v41 = vsub.f32 %v2944_v35, %v2962_v38  ;;  %v3049_v42 = vsub.f32 %v2945_v36, %v2965_v39  ;;  %v2971_v44 = vand.u32 4294901760, %v2947_v43  ;;  %v9378_v39 = vld [vmem:[%s14198_s5 + $0x4] sm:$0x3] }
 0xc17   :  { %v2355_v52 = vadd.f32 %v2354_v48, %v2344_v47 }
 0xc18   :  { %11866 = vmatpush3.bf16.msra.mxu1 %v13354_v40  ;;  %v3043_v46 = vand.u32 4294901760, %v3042_v41  ;;  %v3050_v47 = vand.u32 4294901760, %v3049_v42  ;;  %v3063_v51 = vsub.f32 %v2947_v43, %v2971_v44 }
 0xc19   :  { %v2365_v55 = vadd.f32 %v2364_v53, %v2355_v52  ;;  %11867 = vmatprep.subr.bf16.mxu1 %v12776_v0 }
 0xc1a   :  { %v3044_v52 = vsub.f32 %v3042_v41, %v3043_v46  ;;  %v3051_v53 = vsub.f32 %v3049_v42, %v3050_v47 }
 0xc1b   :  { %v2375_v4 = vadd.f32 %v2374_v56, %v2365_v55 }
 0xc1c   :  { %v3045_v56 = vand.u32 4294901760, %v3044_v52 }
 0xc1d   :  { %v2379_v8 = vsel %vm641_vm4, %v2375_v4, %v2377_v7  ;;  %v3064_v7 = vand.u32 4294901760, %v3063_v51 }
 0xc1e   :  { %v2381_v9 = vsel %vm63_vm2, %v2379_v8, 0 }
 0xc1f   :  { %v2456_v11 = vand.u32 4294901760, %v2381_v9 }
 0xc21   :  { %v2457_v14 = vsub.f32 %v2381_v9, %v2456_v11  ;;  %v3052_v9 = vand.u32 4294901760, %v3051_v53 }
 0xc23   :  { %v2458_v15 = vand.u32 4294901760, %v2457_v14 }
 0xc25   :  { %v2459_v16 = vsub.f32 %v2457_v14, %v2458_v15 }
 0xc27   :  { %v2460_v18 = vand.u32 4294901760, %v2459_v16 }
 0xc29   :  { %10513 = vmatmul.mubr.f32.vlgmr.msra.gmra.mrb[4].mxu0 %v2460_v18 }
 0xc2a   :  { %11806 = vmatpush3.bf16.msra.mxu0 %v12932_v45  ;;  %10531 = vmatprep.mubr.msk.f32.mxu0 %vm12777_vm0, %v12778_v1 }
 0xc2b   :  { %11807 = vmatprep.subr.bf16.mxu0 %v12776_v0 }
 0xc2e   :  { %11809 = vmatpush3.bf16.msra.mxu0 %v12939_v50 }
 0xc2f   :  { %11810 = vmatprep.subr.bf16.mxu0 %v12776_v0 }
 0xc32   :  { %11812 = vmatpush3.bf16.msra.mxu0 %v12946_v54 }
 0xc33   :  { %11813 = vmatprep.subr.bf16.mxu0 %v12776_v0 }
 0xc36   :  { %11815 = vmatpush3.bf16.msra.mxu0 %v12950_v57 }
 0xc37   :  { %11816 = vmatprep.subr.bf16.mxu0 %v12776_v0 }
 0xc39   :  { %10532 = vmatmul.mubr.f32.vlgmr.msra.gmra.mrb[4].mxu0 %v2456_v11 }
 0xc3a   :  { %11818 = vmatpush3.bf16.msra.mxu0 %v12956_v58  ;;  %10550 = vmatprep.mubr.msk.f32.mxu0 %vm12777_vm0, %v12778_v1 }
 0xc3b   :  { %11819 = vmatprep.subr.bf16.mxu0 %v12776_v0 }
 0xc3e   :  { %11821 = vmatpush3.bf16.msra.mxu0 %v12963_v59 }
 0xc3f   :  { %11822 = vmatprep.subr.bf16.mxu0 %v12776_v0 }
 0xc42   :  { %11824 = vmatpush3.bf16.msra.mxu0 %v12971_v60 }
 0xc43   :  { %11825 = vmatprep.subr.bf16.mxu0 %v12776_v0 }
 0xc46   :  { %11827 = vmatpush3.bf16.msra.mxu0 %v12977_v61 }
 0xc47   :  { %11828 = vmatprep.subr.bf16.mxu0 %v12776_v0 }
 0xc49   :  { %10551 = vmatmul.mubr.f32.vlgmr.msra.gmra.mrb[4].mxu0 %v2457_v14  ;;  %v3065_v14 = vsub.f32 %v3063_v51, %v3064_v7 }
 0xc4a   :  { %11830 = vmatpush3.bf16.msra.mxu0 %v12872_v12  ;;  %10569 = vmatprep.mubr.msk.f32.mxu0 %vm12777_vm0, %v12778_v1 }
 0xc4b   :  { %11831 = vmatprep.subr.bf16.mxu0 %v12776_v0  ;;  %v3066_v18 = vand.u32 4294901760, %v3065_v14  ;;  %v9385_v14 = vld [vmem:[%s14193_s0 + $0xe] ss:$0 sm:$0xff] }
 0xc4e   :  { %11833 = vmatpush3.bf16.msra.mxu0 %v12887_v20 }
 0xc4f   :  { %11834 = vmatprep.subr.bf16.mxu0 %v12776_v0 }
 0xc52   :  { %11836 = vmatpush3.bf16.msra.mxu0 %v12894_v26 }
 0xc53   :  { %11837 = vmatprep.subr.bf16.mxu0 %v12776_v0 }
 0xc56   :  { %11839 = vmatpush3.bf16.msra.mxu0 %v12910_v33 }
 0xc57   :  { %11840 = vmatprep.subr.bf16.mxu0 %v12776_v0 }
 0xc59   :  { %10570 = vmatmul.mubr.f32.vlgmr.msra.gmra.mrb[4].mxu0 %v2458_v15  ;;  %v11871_v15 = vpack.c.bf16 %v3052_v9, %v3045_v56  ;;  %v9383_v9 = vld [vmem:[%s14193_s0 + $0xd] ss:$0 sm:$0xff] }
 0xc5a   :  { %11842 = vmatpush3.bf16.msra.mxu0 %v12996_v62  ;;  %10588 = vmatprep.mubr.msk.f32.mxu0 %vm12777_vm0, %v12778_v1 }
 0xc5b   :  { %11843 = vmatprep.subr.bf16.mxu0 %v12776_v0 }
 0xc5e   :  { %11845 = vmatpush3.bf16.msra.mxu0 %v13005_v63 }
 0xc5f   :  { %11846 = vmatprep.subr.bf16.mxu0 %v12776_v0 }
 0xc62   :  { %11848 = vmatpush3.bf16.msra.mxu0 %v13013_v2 }
 0xc63   :  { %11849 = vmatprep.subr.bf16.mxu0 %v12776_v0 }
 0xc66   :  { %11851 = vmatpush3.bf16.msra.mxu0 %v13017_v3 }
 0xc67   :  { %11852 = vmatprep.subr.bf16.mxu0 %v12776_v0 }
 0xc69   :  { %10589 = vmatmul.mubr.f32.vlgmr.msra.gmra.mrb[4].mxu0 %v2456_v11 }
 0xc6a   :  { %11854 = vmatpush3.bf16.msra.mxu0 %v12872_v12  ;;  %10607 = vmatprep.mubr.msk.f32.mxu0 %vm12777_vm0, %v12778_v1 }
 0xc6b   :  { %11855 = vmatprep.subr.bf16.mxu0 %v12776_v0 }
 0xc6e   :  { %11857 = vmatpush3.bf16.msra.mxu0 %v12887_v20 }
 0xc6f   :  { %11858 = vmatprep.subr.bf16.mxu0 %v12776_v0 }
 0xc72   :  { %11860 = vmatpush3.bf16.msra.mxu0 %v12894_v26 }
 0xc73   :  { %11861 = vmatprep.subr.bf16.mxu0 %v12776_v0 }
 0xc76   :  { %11863 = vmatpush3.bf16.msra.mxu0 %v12910_v33 }
 0xc77   :  { %11972 = vmatprep.subr.bf16.mxu0 %v12776_v0 }
 0xc79   :  { %10608 = vmatmul.mubr.f32.vlgmr.msra.gmra.mrb[4].mxu0 %v2456_v11 }
 0xc7a   :  { %10798 = vmatprep.mubr.msk.f32.mxu0 %vm12777_vm0, %v12778_v1 }
 0xd4c   :  { %v2916_v19 = vpop.f32.mrb[4].mxu0 }
 0xd4d   :  { %v12444_v21 = vadd.f32 %v13041_v6, %v2916_v19  ;;  %v10609_v17 = vpop.f32.mrb[5].mxu0 }
 0xd4f   :  { %v2920_v22 = vmul.f32 0.5, %v12444_v21 }
 0xd51   :  { %v2921_v24 = vsel %vm13046_vm3, %v12444_v21, %v2920_v22  ;;  %v11877_v21 = vpack.c.bf16 %v3049_v42, %v3042_v41  ;;  %v11889_v22 = vpack.c.bf16 %v3050_v47, %v3043_v46 }
 0xd52   :  { %12641 = vtanh.f32 %v2921_v24 }
 0xd5c   :  { %v12642_v25 = vpop.eup %12641 }
 0xd5d   :  { %v2923_v23 = vadd.f32 1.0, %v12642_v25 }
 0xd5f   :  { %v2924_v27 = vmul.f32 0.5, %v2923_v23 }
 0xd61   :  { %v2925_v28 = vsel %vm13046_vm3, %v12642_v25, %v2924_v27 }
 0xd62   :  { %2928 = vrot.lane.b32.xlu1 %v2925_v28, %s12779_s18  ;;  %v2926_v6 = vmul.f32 %v2925_v28, %v13211_v13  ;;  %v2968_v13 = vand.u32 4294901760, %v2946_v37 }
 0xd64   :  { %v11868_v48 = vpack.c.bf16 %v2971_v44, %v2968_v13  ;;  %v3056_v49 = vsub.f32 %v2946_v37, %v2968_v13 }
 0xd66   :  { %11869 = vmatpush3.bf16.msra.mxu1 %v11868_v48  ;;  %v3057_v4 = vand.u32 4294901760, %v3056_v49  ;;  %v11880_v17 = vpack.c.bf16 %v3063_v51, %v3056_v49 }
 0xd67   :  { %11870 = vmatprep.subr.bf16.mxu1 %v12776_v0 }
 0xd68   :  { %v3058_v11 = vsub.f32 %v3056_v49, %v3057_v4  ;;  %v11892_v24 = vpack.c.bf16 %v3064_v7, %v3057_v4  ;;  %v9381_v7 = vld [vmem:[%s14193_s0 + $0xc] ss:$0 sm:$0xff] }
 0xd6a   :  { %v3059_v16 = vand.u32 4294901760, %v3058_v11 }
 0xd6c   :  { %v11874_v19 = vpack.c.bf16 %v3066_v18, %v3059_v16 }
 0xdd4   :  { %v2929_v29 = vpop.permute.xlu1 %2928 }
 0xdd5   :  { %v2931_v30 = vmul.f32 %v2929_v29, %v2925_v28 }
 0xdd7   :  { %2933 = vrot.lane.b32.xlu1 %v2931_v30, %s12780_s19 }
 0xe49   :  { %v2934_v31 = vpop.permute.xlu1 %2933 }
 0xe4a   :  { %v13350_v32 = vadd.f32 %v2934_v31, %v2926_v6  ;;  %v9377_v31 = vld [vmem:[%s14197_s4 + $0x2] ss:$0 sm:$0xff] }
 0xe4c   :  { %12643 = vtanh.f32 %v13350_v32 }
 0xe56   :  { %v12644_v34 = vpop.eup %12643 }
 0xe57   :  { %2939 = vrot.lane.b32.xlu0 %v12644_v34, %s12779_s18 }
 0xec9   :  { %v2940_v55 = vpop.permute.xlu0 %2939 }
 0xeca   :  { %v13358_v8 = vmul.f32 %v2940_v55, %v2925_v28 }
 0xecc   :  { %2957 = vrot.lane.b32.xlu1 %v13358_v8, %s12780_s19 }
 0xf3e   :  { %v2958_v25 = vpop.permute.xlu1 %2957 }
 0xf3f   :  { %v2959_v23 = vsel %vm641_vm4, %v2958_v25, 0 }
 0xf40   :  { %v3030_v27 = vand.u32 4294901760, %v2959_v23 }
 0xf42   :  { %v3031_v28 = vsub.f32 %v2959_v23, %v3030_v27 }
 0xf44   :  { %v3032_v29 = vand.u32 4294901760, %v3031_v28 }
 0xf46   :  { %v3033_v30 = vsub.f32 %v3031_v28, %v3032_v29 }
 0xf48   :  { %v3034_v6 = vand.u32 4294901760, %v3033_v30 }
 0xf4a   :  { %10619 = vmatmul.mubr.f32.vlgmr.msra.gmra.mrb[4].mxu1 %v3034_v6 }
 0xf4b   :  { %11872 = vmatpush3.bf16.msra.mxu1 %v11871_v15  ;;  %10629 = vmatprep.mubr.msk.f32.mxu1 %vm12777_vm0, %v12778_v1 }
 0xf4c   :  { %11873 = vmatprep.subr.bf16.mxu1 %v12776_v0 }
 0xf4f   :  { %11875 = vmatpush3.bf16.msra.mxu1 %v11874_v19  ;;  %v9387_v19 = vld [vmem:[%s14193_s0 + $0xf] ss:$0 sm:$0xff] }
 0xf50   :  { %11876 = vmatprep.subr.bf16.mxu1 %v12776_v0 }
 0xf52   :  { %10630 = vmatmul.mubr.f32.vlgmr.msra.gmra.mrb[4].mxu1 %v3030_v27 }
 0xf53   :  { %11878 = vmatpush3.bf16.msra.mxu1 %v11877_v21  ;;  %10640 = vmatprep.mubr.msk.f32.mxu1 %vm12777_vm0, %v12778_v1 }
 0xf54   :  { %11879 = vmatprep.subr.bf16.mxu1 %v12776_v0 }
 0xf57   :  { %11881 = vmatpush3.bf16.msra.mxu1 %v11880_v17 }
 0xf58   :  { %11882 = vmatprep.subr.bf16.mxu1 %v12776_v0 }
 0xf5a   :  { %10641 = vmatmul.mubr.f32.vlgmr.msra.gmra.mrb[4].mxu1 %v3031_v28  ;;  %v9391_v28 = vld [vmem:[%s14193_s0 + $0x11] ss:$0 sm:$0xff] }
 0xf5b   :  { %11884 = vmatpush3.bf16.msra.mxu1 %v13354_v40  ;;  %10651 = vmatprep.mubr.msk.f32.mxu1 %vm12777_vm0, %v12778_v1 }
 0xf5c   :  { %11885 = vmatprep.subr.bf16.mxu1 %v12776_v0 }
 0xf5f   :  { %11887 = vmatpush3.bf16.msra.mxu1 %v11868_v48 }
 0xf60   :  { %11888 = vmatprep.subr.bf16.mxu1 %v12776_v0 }
 0xf62   :  { %10652 = vmatmul.mubr.f32.vlgmr.msra.gmra.mrb[4].mxu1 %v3032_v29 }
 0xf63   :  { %11890 = vmatpush3.bf16.msra.mxu1 %v11889_v22  ;;  %10662 = vmatprep.mubr.msk.f32.mxu1 %vm12777_vm0, %v12778_v1 }
 0xf64   :  { %11891 = vmatprep.subr.bf16.mxu1 %v12776_v0 }
 0xf67   :  { %11893 = vmatpush3.bf16.msra.mxu1 %v11892_v24  ;;  %v9389_v24 = vld [vmem:[%s14193_s0 + $0x10] ss:$0 sm:$0xff] }
 0xf68   :  { %11894 = vmatprep.subr.bf16.mxu1 %v12776_v0 }
 0xf6a   :  { %10663 = vmatmul.mubr.f32.vlgmr.msra.gmra.mrb[4].mxu1 %v3030_v27 }
 0xf6b   :  { %11896 = vmatpush3.bf16.msra.mxu1 %v13354_v40  ;;  %10673 = vmatprep.mubr.msk.f32.mxu1 %vm12777_vm0, %v12778_v1 }
 0xf6c   :  { %11897 = vmatprep.subr.bf16.mxu1 %v12776_v0 }
 0xf6f   :  { %11899 = vmatpush3.bf16.msra.mxu1 %v11868_v48 }
 0xf70   :  { %11900 = vmatprep.subr.bf16.mxu1 %v12776_v0 }
 0xf72   :  { %10674 = vmatmul.mubr.f32.vlgmr.msra.gmra.mrb[4].mxu1 %v3030_v27 }
 0xf73   :  { %11902 = vmatpush3.bf16.msra.mxu1 %v12872_v12  ;;  %10692 = vmatprep.mubr.msk.f32.mxu1 %vm12777_vm0, %v12778_v1 }
 0xf74   :  { %11903 = vmatprep.subr.bf16.mxu1 %v12776_v0 }
 0xf77   :  { %11905 = vmatpush3.bf16.msra.mxu1 %v12887_v20 }
 0xf78   :  { %11906 = vmatprep.subr.bf16.mxu1 %v12776_v0 }
 0xf7b   :  { %11908 = vmatpush3.bf16.msra.mxu1 %v12894_v26 }
 0xf7c   :  { %11909 = vmatprep.subr.bf16.mxu1 %v12776_v0 }
 0xf7f   :  { %11911 = vmatpush3.bf16.msra.mxu1 %v12910_v33 }
 0xf80   :  { %11912 = vmatprep.subr.bf16.mxu1 %v12776_v0 }
0x1045   :  { %v3442_v34 = vpop.f32.mrb[4].mxu1 }
0x1046   :  { %v12445_v35 = vadd.f32 %v9377_v31, %v3442_v34  ;;  %v10675_v36 = vpop.f32.mrb[5].mxu1  ;;  %v9393_v31 = vld [vmem:[%s14193_s0 + $0x12] ss:$0 sm:$0xff] }
0x1048   :  { %12645 = vtanh.f32 %v12445_v35 }
0x1052   :  { %v12646_v38 = vpop.eup %12645 }
0x1053   :  { %v3447_v40 = vmul.f32 2.5, %v12646_v38  ;;  %v9395_v38 = vld [vmem:[%s14193_s0 + $0x13] ss:$0 sm:$0xff] }
0x1055   :  { %3449 = vst [vmem:[#allocation5 + $0x4] sm:$0x3] %v3447_v40  ;;  %v3452_v41 = vadd.f32 %v9378_v39, %v3447_v40 }
0x1057   :  { %v3453_v42 = vsel %vm1134_vm5, %v3452_v41, -inf }
0x1058   :  { %3454 = vmax.xlane.f32.xlu0 %v3453_v42 }
0x10e5   :  { %v3455_v37 = vpop.xlane.xlu0 %3454 }
0x10e6   :  { %vm3456_vm13 = vcmp.ge.f32.partialorder %v3452_v41, %v3455_v37 }
0x10e7   :  { %v3457_v43 = vsel %vm3456_vm13, %v13036_v5, 128 }
0x10e8   :  { %v3458_v13 = vsel %vm1134_vm5, %v3457_v43, 2147483647 }
0x10e9   :  { %v3460_v44 = vshra.s32 %v3458_v13, 16  ;;  %v3459_v47 = vand.u32 65535, %v3458_v13 }
0x10eb   :  { %v3462_v46 = vcvt.s32.f32 %v3460_v44  ;;  %v3461_v49 = vcvt.s32.f32 %v3459_v47 }
0x10ed   :  { %3463 = vmin.xlane.f32.xlu1 %v3462_v46 }
0x117a   :  { %v3464_v48 = vpop.xlane.xlu1 %3463 }
0x117b   :  { %vm3465_vm14 = vcmp.eq.f32.partialorder %v3462_v46, %v3464_v48  ;;  %v3470_v52 = vcvt.f32.s32 %v3464_v48 }
0x117c   :  { %v3466_v51 = vsel %vm3465_vm14, %v3461_v49, inf }
0x117d   :  { %3467 = vmin.xlane.f32.xlu0 %v3466_v51  ;;  %v3471_v55 = vshll.u32 %v3470_v52, 16 }
0x1193   :  { %3555 = vrot.lane.b32.xlu0 %v13358_v8, %s12779_s18 }
0x120a   :  { %v3468_v53 = vpop.xlane.xlu0 %3467 }
0x120b   :  { %v3469_v56 = vcvt.f32.s32 %v3468_v53 }
0x120d   :  { %v3472_v4 = vadd.s32 %v3471_v55, %v3469_v56  ;;  %v13500_v55 = vld [vmem:[%s14195_s2] ss:$0 sm:$0xff] }
0x120e   :  { %v3556_v13 = vpop.permute.xlu0 %3555 }
0x120f   :  { %9379 = vst.msk [vmem:[%s14200_s7 + $0x4] sm:$0x3] %vm1155_vm8, %v3472_v4  ;;  %vm3476_vm15 = vcmp.eq.s32.totalorder %v3472_v4, 0  ;;  %vm3486_vm1 = vcmp.eq.s32.totalorder %v3472_v4, 1  ;;  %vm3496_vm6 = vcmp.eq.s32.totalorder %v3472_v4, 2  ;;  %vm3506_vm7 = vcmp.eq.s32.totalorder %v3472_v4, 3 }
0x1210   :  { %v9380_v8 = vsel %vm3476_vm15, 1.0, %v12778_v1  ;;  %v9382_v11 = vsel %vm3486_vm1, 1.0, %v12778_v1  ;;  %v9384_v15 = vsel %vm3496_vm6, 1.0, %v12778_v1  ;;  %v9386_v21 = vsel %vm3506_vm7, 1.0, %v12778_v1 }
0x1211   :  { %v3483_v16 = vmul.f32 %v9381_v7, %v9380_v8  ;;  %v3493_v18 = vmul.f32 %v9383_v9, %v9382_v11  ;;  %vm3516_vm9 = vcmp.eq.s32.totalorder %v3472_v4, 4  ;;  %v3503_v22 = vmul.f32 %v9385_v14, %v9384_v15 }
0x1212   :  { %vm3526_vm10 = vcmp.eq.s32.totalorder %v3472_v4, 5  ;;  %v9388_v25 = vsel %vm3516_vm9, 1.0, %v12778_v1  ;;  %v3513_v27 = vmul.f32 %v9387_v19, %v9386_v21  ;;  %vm3536_vm11 = vcmp.eq.s32.totalorder %v3472_v4, 6 }
0x1213   :  { %v3494_v17 = vadd.f32 %v3493_v18, %v3483_v16  ;;  %v9390_v29 = vsel %vm3526_vm10, 1.0, %v12778_v1  ;;  %v3523_v6 = vmul.f32 %v9389_v24, %v9388_v25  ;;  %vm3546_vm12 = vcmp.eq.s32.totalorder %v3472_v4, 7  ;;  %v4123_v24 = vld [vmem:[#allocation2 + $0x60] sm:$0xff]  ;;  %v4124_v25 = vld [vmem:[#allocation2 + $0x68] sm:$0xff] }
0x1214   :  { %v9392_v34 = vsel %vm3536_vm11, 1.0, %v12778_v1  ;;  %v3533_v36 = vmul.f32 %v9391_v28, %v9390_v29  ;;  %v9394_v39 = vsel %vm3546_vm12, 1.0, %v12778_v1 }
0x1215   :  { %v3504_v23 = vadd.f32 %v3503_v22, %v3494_v17  ;;  %v3543_v41 = vmul.f32 %v9393_v31, %v9392_v34  ;;  %v3553_v37 = vmul.f32 %v9395_v38, %v9394_v39  ;;  %v4126_v31 = vld [vmem:[#allocation2 + $0x78] sm:$0xff] }
0x1216   :  { %v4150_v34 = vand.u32 4294901760, %v4126_v31 }
0x1217   :  { %v3514_v30 = vadd.f32 %v3513_v27, %v3504_v23  ;;  %v4141_v23 = vand.u32 4294901760, %v4123_v24  ;;  %v4144_v27 = vand.u32 4294901760, %v4124_v25 }
0x1219   :  { %v3524_v35 = vadd.f32 %v3523_v6, %v3514_v30  ;;  %v13514_v28 = vpack.c.bf16 %v4144_v27, %v4141_v23  ;;  %v4221_v29 = vsub.f32 %v4123_v24, %v4141_v23  ;;  %v4228_v30 = vsub.f32 %v4124_v25, %v4144_v27  ;;  %v4125_v6 = vld [vmem:[#allocation2 + $0x70] sm:$0xff] }
0x121b   :  { %v3534_v40 = vadd.f32 %v3533_v36, %v3524_v35  ;;  %11974 = vmatpush3.bf16.msra.mxu0 %v13514_v28  ;;  %v4222_v35 = vand.u32 4294901760, %v4221_v29  ;;  %v4229_v36 = vand.u32 4294901760, %v4228_v30 }
0x121c   :  { %11975 = vmatprep.subr.bf16.mxu0 %v12776_v0 }
0x121d   :  { %v3544_v42 = vadd.f32 %v3543_v41, %v3534_v40  ;;  %v4242_v40 = vsub.f32 %v4126_v31, %v4150_v34  ;;  %v4223_v41 = vsub.f32 %v4221_v29, %v4222_v35 }
0x121f   :  { %v3554_v43 = vadd.f32 %v3553_v37, %v3544_v42  ;;  %v4230_v37 = vsub.f32 %v4228_v30, %v4229_v36 }
0x1221   :  { %v3558_v44 = vsel %vm641_vm4, %v3554_v43, %v3556_v13  ;;  %v4224_v13 = vand.u32 4294901760, %v4223_v41 }
0x1222   :  { %v3560_v46 = vsel %vm63_vm2, %v3558_v44, 0 }
0x1223   :  { %v3635_v47 = vand.u32 4294901760, %v3560_v46 }
0x1225   :  { %v3636_v48 = vsub.f32 %v3560_v46, %v3635_v47  ;;  %v4243_v46 = vand.u32 4294901760, %v4242_v40 }
0x1227   :  { %v3637_v49 = vand.u32 4294901760, %v3636_v48 }
0x1229   :  { %v3638_v51 = vsub.f32 %v3636_v48, %v3637_v49 }
0x122b   :  { %v3639_v52 = vand.u32 4294901760, %v3638_v51 }
0x122d   :  { %10693 = vmatmul.mubr.f32.vlgmr.msra.gmra.mrb[6].mxu1 %v3639_v52 }
0x122e   :  { %11914 = vmatpush3.bf16.msra.mxu1 %v12932_v45  ;;  %10711 = vmatprep.mubr.msk.f32.mxu1 %vm12777_vm0, %v12778_v1 }
0x122f   :  { %11915 = vmatprep.subr.bf16.mxu1 %v12776_v0 }
0x1232   :  { %11917 = vmatpush3.bf16.msra.mxu1 %v12939_v50 }
0x1233   :  { %11918 = vmatprep.subr.bf16.mxu1 %v12776_v0 }
0x1236   :  { %11920 = vmatpush3.bf16.msra.mxu1 %v12946_v54 }
0x1237   :  { %11921 = vmatprep.subr.bf16.mxu1 %v12776_v0 }
0x123a   :  { %11923 = vmatpush3.bf16.msra.mxu1 %v12950_v57 }
0x123b   :  { %11924 = vmatprep.subr.bf16.mxu1 %v12776_v0 }
0x123d   :  { %10712 = vmatmul.mubr.f32.vlgmr.msra.gmra.mrb[6].mxu1 %v3635_v47 }
0x123e   :  { %11926 = vmatpush3.bf16.msra.mxu1 %v12956_v58  ;;  %10730 = vmatprep.mubr.msk.f32.mxu1 %vm12777_vm0, %v12778_v1 }
0x123f   :  { %11927 = vmatprep.subr.bf16.mxu1 %v12776_v0 }
0x1242   :  { %11929 = vmatpush3.bf16.msra.mxu1 %v12963_v59 }
0x1243   :  { %11930 = vmatprep.subr.bf16.mxu1 %v12776_v0 }
0x1246   :  { %11932 = vmatpush3.bf16.msra.mxu1 %v12971_v60 }
0x1247   :  { %11933 = vmatprep.subr.bf16.mxu1 %v12776_v0 }
0x124a   :  { %11935 = vmatpush3.bf16.msra.mxu1 %v12977_v61 }
0x124b   :  { %11936 = vmatprep.subr.bf16.mxu1 %v12776_v0 }
0x124d   :  { %10731 = vmatmul.mubr.f32.vlgmr.msra.gmra.mrb[6].mxu1 %v3636_v48 }
0x124e   :  { %11938 = vmatpush3.bf16.msra.mxu1 %v12872_v12  ;;  %10749 = vmatprep.mubr.msk.f32.mxu1 %vm12777_vm0, %v12778_v1 }
0x124f   :  { %11939 = vmatprep.subr.bf16.mxu1 %v12776_v0 }
0x1252   :  { %11941 = vmatpush3.bf16.msra.mxu1 %v12887_v20 }
0x1253   :  { %11942 = vmatprep.subr.bf16.mxu1 %v12776_v0 }
0x1256   :  { %11944 = vmatpush3.bf16.msra.mxu1 %v12894_v26 }
0x1257   :  { %11945 = vmatprep.subr.bf16.mxu1 %v12776_v0 }
0x125a   :  { %11947 = vmatpush3.bf16.msra.mxu1 %v12910_v33 }
0x125b   :  { %11948 = vmatprep.subr.bf16.mxu1 %v12776_v0 }
0x125d   :  { %10750 = vmatmul.mubr.f32.vlgmr.msra.gmra.mrb[6].mxu1 %v3637_v49  ;;  %v4244_v49 = vsub.f32 %v4242_v40, %v4243_v46 }
0x125e   :  { %11950 = vmatpush3.bf16.msra.mxu1 %v12996_v62  ;;  %10768 = vmatprep.mubr.msk.f32.mxu1 %vm12777_vm0, %v12778_v1 }
0x125f   :  { %11951 = vmatprep.subr.bf16.mxu1 %v12776_v0 }
0x1262   :  { %11953 = vmatpush3.bf16.msra.mxu1 %v13005_v63 }
0x1263   :  { %11954 = vmatprep.subr.bf16.mxu1 %v12776_v0 }
0x1266   :  { %11956 = vmatpush3.bf16.msra.mxu1 %v13013_v2 }
0x1267   :  { %11957 = vmatprep.subr.bf16.mxu1 %v12776_v0 }
0x126a   :  { %11959 = vmatpush3.bf16.msra.mxu1 %v13017_v3 }
0x126b   :  { %11960 = vmatprep.subr.bf16.mxu1 %v12776_v0 }
0x126d   :  { %10769 = vmatmul.mubr.f32.vlgmr.msra.gmra.mrb[6].mxu1 %v3635_v47 }
0x126e   :  { %11962 = vmatpush3.bf16.msra.mxu1 %v12872_v12  ;;  %10787 = vmatprep.mubr.msk.f32.mxu1 %vm12777_vm0, %v12778_v1 }
0x126f   :  { %11963 = vmatprep.subr.bf16.mxu1 %v12776_v0 }
0x1272   :  { %11965 = vmatpush3.bf16.msra.mxu1 %v12887_v20 }
0x1273   :  { %11966 = vmatprep.subr.bf16.mxu1 %v12776_v0 }
0x1276   :  { %11968 = vmatpush3.bf16.msra.mxu1 %v12894_v26 }
0x1277   :  { %11969 = vmatprep.subr.bf16.mxu1 %v12776_v0 }
0x127a   :  { %11971 = vmatpush3.bf16.msra.mxu1 %v12910_v33 }
0x127b   :  { %12080 = vmatprep.subr.bf16.mxu1 %v12776_v0 }
0x127d   :  { %10788 = vmatmul.mubr.f32.vlgmr.msra.gmra.mrb[6].mxu1 %v3635_v47  ;;  %v4231_v47 = vand.u32 4294901760, %v4230_v37 }
0x127e   :  { %10978 = vmatprep.mubr.msk.f32.mxu1 %vm12777_vm0, %v12778_v1 }
0x127f   :  { %v11979_v51 = vpack.c.bf16 %v4231_v47, %v4224_v13  ;;  %v9401_v47 = vld [vmem:[%s14193_s0 + $0x14] ss:$0 sm:$0xff] }
0x1350   :  { %v4095_v53 = vpop.f32.mrb[6].mxu1 }
0x1351   :  { %v12446_v56 = vadd.f32 %v13500_v55, %v4095_v53  ;;  %v10789_v4 = vpop.f32.mrb[7].mxu1  ;;  %v4245_v53 = vand.u32 4294901760, %v4244_v49 }
0x1352   :  { %v11985_v4 = vpack.c.bf16 %v4228_v30, %v4221_v29 }
0x1353   :  { %v4099_v7 = vmul.f32 0.5, %v12446_v56 }
0x1355   :  { %v4100_v9 = vsel %vm13046_vm3, %v12446_v56, %v4099_v7 }
0x1356   :  { %12647 = vtanh.f32 %v4100_v9  ;;  %v11997_v9 = vpack.c.bf16 %v4229_v36, %v4222_v35 }
0x1360   :  { %v12648_v8 = vpop.eup %12647 }
0x1361   :  { %v4102_v11 = vadd.f32 1.0, %v12648_v8 }
0x1363   :  { %v4103_v14 = vmul.f32 0.5, %v4102_v11 }
0x1365   :  { %v4104_v15 = vsel %vm13046_vm3, %v12648_v8, %v4103_v14 }
0x1366   :  { %4107 = vrot.lane.b32.xlu1 %v4104_v15, %s12779_s18  ;;  %v4105_v19 = vmul.f32 %v4104_v15, %v13350_v32  ;;  %v4147_v32 = vand.u32 4294901760, %v4125_v6 }
0x1368   :  { %v11976_v38 = vpack.c.bf16 %v4150_v34, %v4147_v32  ;;  %v4235_v39 = vsub.f32 %v4125_v6, %v4147_v32 }
0x136a   :  { %11977 = vmatpush3.bf16.msra.mxu0 %v11976_v38  ;;  %v4236_v44 = vand.u32 4294901760, %v4235_v39  ;;  %v11988_v7 = vpack.c.bf16 %v4242_v40, %v4235_v39 }
0x136b   :  { %11978 = vmatprep.subr.bf16.mxu0 %v12776_v0 }
0x136c   :  { %v4237_v48 = vsub.f32 %v4235_v39, %v4236_v44  ;;  %v12000_v8 = vpack.c.bf16 %v4243_v46, %v4236_v44 }
0x136e   :  { %v4238_v52 = vand.u32 4294901760, %v4237_v48  ;;  %v9403_v48 = vld [vmem:[%s14193_s0 + $0x15] ss:$0 sm:$0xff] }
0x1370   :  { %v11982_v56 = vpack.c.bf16 %v4245_v53, %v4238_v52 }
0x13d8   :  { %v4108_v16 = vpop.permute.xlu1 %4107 }
0x13d9   :  { %v4110_v18 = vmul.f32 %v4108_v16, %v4104_v15 }
0x13db   :  { %4112 = vrot.lane.b32.xlu1 %v4110_v18, %s12780_s19 }
0x144d   :  { %v4113_v21 = vpop.permute.xlu1 %4112 }
0x144e   :  { %v13510_v17 = vadd.f32 %v4113_v21, %v4105_v19 }
0x1450   :  { %12649 = vtanh.f32 %v13510_v17 }
0x145a   :  { %v12650_v22 = vpop.eup %12649 }
0x145b   :  { %4118 = vrot.lane.b32.xlu0 %v12650_v22, %s12779_s18  ;;  %v9397_v22 = vld [vmem:[%s14197_s4 + $0x3] ss:$0 sm:$0xff] }
0x14cd   :  { %v4119_v42 = vpop.permute.xlu0 %4118 }
0x14ce   :  { %v13518_v43 = vmul.f32 %v4119_v42, %v4104_v15 }
0x14d0   :  { %4136 = vrot.lane.b32.xlu1 %v13518_v43, %s12780_s19 }
0x1542   :  { %v4137_v11 = vpop.permute.xlu1 %4136 }
0x1543   :  { %v4138_v14 = vsel %vm641_vm4, %v4137_v11, 0 }
0x1544   :  { %v4209_v15 = vand.u32 4294901760, %v4138_v14 }
0x1546   :  { %v4210_v16 = vsub.f32 %v4138_v14, %v4209_v15 }
0x1548   :  { %v4211_v18 = vand.u32 4294901760, %v4210_v16 }
0x154a   :  { %v4212_v19 = vsub.f32 %v4210_v16, %v4211_v18 }
0x154c   :  { %v4213_v21 = vand.u32 4294901760, %v4212_v19 }
0x154e   :  { %10799 = vmatmul.mubr.f32.vlgmr.msra.gmra.mrb[6].mxu0 %v4213_v21 }
0x154f   :  { %11980 = vmatpush3.bf16.msra.mxu0 %v11979_v51  ;;  %10809 = vmatprep.mubr.msk.f32.mxu0 %vm12777_vm0, %v12778_v1  ;;  %v9405_v51 = vld [vmem:[%s14193_s0 + $0x16] ss:$0 sm:$0xff] }
0x1550   :  { %11981 = vmatprep.subr.bf16.mxu0 %v12776_v0 }
0x1553   :  { %11983 = vmatpush3.bf16.msra.mxu0 %v11982_v56 }
0x1554   :  { %11984 = vmatprep.subr.bf16.mxu0 %v12776_v0 }
0x1556   :  { %10810 = vmatmul.mubr.f32.vlgmr.msra.gmra.mrb[6].mxu0 %v4209_v15 }
0x1557   :  { %11986 = vmatpush3.bf16.msra.mxu0 %v11985_v4  ;;  %10820 = vmatprep.mubr.msk.f32.mxu0 %vm12777_vm0, %v12778_v1  ;;  %v9407_v4 = vld [vmem:[%s14193_s0 + $0x17] ss:$0 sm:$0xff] }
0x1558   :  { %11987 = vmatprep.subr.bf16.mxu0 %v12776_v0 }
0x155b   :  { %11989 = vmatpush3.bf16.msra.mxu0 %v11988_v7 }
0x155c   :  { %11990 = vmatprep.subr.bf16.mxu0 %v12776_v0 }
0x155e   :  { %10821 = vmatmul.mubr.f32.vlgmr.msra.gmra.mrb[6].mxu0 %v4210_v16 }
0x155f   :  { %11992 = vmatpush3.bf16.msra.mxu0 %v13514_v28  ;;  %10831 = vmatprep.mubr.msk.f32.mxu0 %vm12777_vm0, %v12778_v1 }
0x1560   :  { %11993 = vmatprep.subr.bf16.mxu0 %v12776_v0 }
0x1563   :  { %11995 = vmatpush3.bf16.msra.mxu0 %v11976_v38 }
0x1564   :  { %11996 = vmatprep.subr.bf16.mxu0 %v12776_v0 }
0x1566   :  { %10832 = vmatmul.mubr.f32.vlgmr.msra.gmra.mrb[6].mxu0 %v4211_v18 }
0x1567   :  { %11998 = vmatpush3.bf16.msra.mxu0 %v11997_v9  ;;  %10842 = vmatprep.mubr.msk.f32.mxu0 %vm12777_vm0, %v12778_v1 }
0x1568   :  { %11999 = vmatprep.subr.bf16.mxu0 %v12776_v0 }
0x156b   :  { %12001 = vmatpush3.bf16.msra.mxu0 %v12000_v8 }
0x156c   :  { %12002 = vmatprep.subr.bf16.mxu0 %v12776_v0 }
0x156e   :  { %10843 = vmatmul.mubr.f32.vlgmr.msra.gmra.mrb[6].mxu0 %v4209_v15 }
0x156f   :  { %12004 = vmatpush3.bf16.msra.mxu0 %v13514_v28  ;;  %10853 = vmatprep.mubr.msk.f32.mxu0 %vm12777_vm0, %v12778_v1  ;;  %v9398_v28 = vld [vmem:[%s14198_s5 + $0x6] sm:$0x3] }
0x1570   :  { %12005 = vmatprep.subr.bf16.mxu0 %v12776_v0 }
0x1573   :  { %12007 = vmatpush3.bf16.msra.mxu0 %v11976_v38 }
0x1574   :  { %12008 = vmatprep.subr.bf16.mxu0 %v12776_v0 }
0x1576   :  { %10854 = vmatmul.mubr.f32.vlgmr.msra.gmra.mrb[6].mxu0 %v4209_v15 }
0x1577   :  { %12010 = vmatpush3.bf16.msra.mxu0 %v12872_v12  ;;  %10872 = vmatprep.mubr.msk.f32.mxu0 %vm12777_vm0, %v12778_v1 }
0x1578   :  { %12011 = vmatprep.subr.bf16.mxu0 %v12776_v0 }
0x157b   :  { %12013 = vmatpush3.bf16.msra.mxu0 %v12887_v20 }
0x157c   :  { %12014 = vmatprep.subr.bf16.mxu0 %v12776_v0 }
0x157f   :  { %12016 = vmatpush3.bf16.msra.mxu0 %v12894_v26 }
0x1580   :  { %12017 = vmatprep.subr.bf16.mxu0 %v12776_v0 }
0x1583   :  { %12019 = vmatpush3.bf16.msra.mxu0 %v12910_v33 }
0x1584   :  { %12020 = vmatprep.subr.bf16.mxu0 %v12776_v0 }
0x1649   :  { %v4621_v24 = vpop.f32.mrb[6].mxu0 }
0x164a   :  { %v12447_v25 = vadd.f32 %v9397_v22, %v4621_v24  ;;  %v10855_v23 = vpop.f32.mrb[7].mxu0 }
0x164c   :  { %12651 = vtanh.f32 %v12447_v25 }
0x1656   :  { %v12652_v27 = vpop.eup %12651 }
0x1657   :  { %v4626_v29 = vmul.f32 2.5, %v12652_v27 }
0x1659   :  { %4628 = vst [vmem:[#allocation5 + $0x6] sm:$0x3] %v4626_v29  ;;  %v4631_v30 = vadd.f32 %v9398_v28, %v4626_v29 }
0x165b   :  { %v4632_v6 = vsel %vm1134_vm5, %v4631_v30, -inf }
0x165c   :  { %4633 = vmax.xlane.f32.xlu0 %v4632_v6 }
0x16e9   :  { %v4634_v31 = vpop.xlane.xlu0 %4633 }
0x16ea   :  { %vm4635_vm13 = vcmp.ge.f32.partialorder %v4631_v30, %v4634_v31 }
0x16eb   :  { %v4636_v32 = vsel %vm4635_vm13, %v13036_v5, 128 }
0x16ec   :  { %v4637_v34 = vsel %vm1134_vm5, %v4636_v32, 2147483647 }
0x16ed   :  { %v4639_v35 = vshra.s32 %v4637_v34, 16  ;;  %v4638_v38 = vand.u32 65535, %v4637_v34 }
0x16ef   :  { %v4641_v36 = vcvt.s32.f32 %v4639_v35  ;;  %v4640_v40 = vcvt.s32.f32 %v4638_v38 }
0x16f1   :  { %4642 = vmin.xlane.f32.xlu1 %v4641_v36 }
0x177e   :  { %v4643_v39 = vpop.xlane.xlu1 %4642 }
0x177f   :  { %vm4644_vm14 = vcmp.eq.f32.partialorder %v4641_v36, %v4643_v39  ;;  %v4649_v42 = vcvt.f32.s32 %v4643_v39 }
0x1780   :  { %v4645_v41 = vsel %vm4644_vm14, %v4640_v40, inf }
0x1781   :  { %4646 = vmin.xlane.f32.xlu0 %v4645_v41  ;;  %v4650_v13 = vshll.u32 %v4649_v42, 16 }
0x1797   :  { %4694 = vrot.lane.b32.xlu0 %v13518_v43, %s12779_s18 }
0x180e   :  { %v4647_v37 = vpop.xlane.xlu0 %4646 }
0x180f   :  { %v4648_v44 = vcvt.f32.s32 %v4647_v37  ;;  %v5262_v37 = vld [vmem:[#allocation2 + $0x80] sm:$0xff] }
0x1811   :  { %v4651_v46 = vadd.s32 %v4650_v13, %v4648_v44  ;;  %v5263_v13 = vld [vmem:[#allocation2 + $0x88] sm:$0xff]  ;;  %v5280_v44 = vand.u32 4294901760, %v5262_v37 }
0x1812   :  { %v4695_v16 = vpop.permute.xlu0 %4694 }
0x1813   :  { %9399 = vst.msk [vmem:[%s14200_s7 + $0x6] sm:$0x3] %vm1155_vm8, %v4651_v46  ;;  %vm4655_vm15 = vcmp.eq.s32.totalorder %v4651_v46, 0  ;;  %vm4665_vm1 = vcmp.eq.s32.totalorder %v4651_v46, 1  ;;  %vm4675_vm6 = vcmp.eq.s32.totalorder %v4651_v46, 2  ;;  %vm4685_vm7 = vcmp.eq.s32.totalorder %v4651_v46, 3 }
0x1814   :  { %v9400_v43 = vsel %vm4655_vm15, 1.0, %v12778_v1  ;;  %v9402_v49 = vsel %vm4665_vm1, 1.0, %v12778_v1  ;;  %v9404_v52 = vsel %vm4675_vm6, 1.0, %v12778_v1  ;;  %v9406_v7 = vsel %vm4685_vm7, 1.0, %v12778_v1 }
0x1815   :  { %v4662_v53 = vmul.f32 %v9401_v47, %v9400_v43  ;;  %v4672_v56 = vmul.f32 %v9403_v48, %v9402_v49  ;;  %v4682_v8 = vmul.f32 %v9405_v51, %v9404_v52  ;;  %v4692_v14 = vmul.f32 %v9407_v4, %v9406_v7  ;;  %v5264_v49 = vld [vmem:[#allocation2 + $0x90] sm:$0xff]  ;;  %v5265_v51 = vld [vmem:[#allocation2 + $0x98] sm:$0xff] }
0x1816   :  { %v5283_v46 = vand.u32 4294901760, %v5263_v13  ;;  %v5360_v48 = vsub.f32 %v5262_v37, %v5280_v44  ;;  %v5289_v52 = vand.u32 4294901760, %v5265_v51 }
0x1817   :  { %v4673_v9 = vadd.f32 %v4672_v56, %v4662_v53 }
0x1818   :  { %v13653_v47 = vpack.c.bf16 %v5283_v46, %v5280_v44  ;;  %v5367_v43 = vsub.f32 %v5263_v13, %v5283_v46  ;;  %v5361_v53 = vand.u32 4294901760, %v5360_v48 }
0x1819   :  { %v4683_v11 = vadd.f32 %v4682_v8, %v4673_v9  ;;  %v5381_v9 = vsub.f32 %v5265_v51, %v5289_v52 }
0x181a   :  { %12082 = vmatpush3.bf16.msra.mxu1 %v13653_v47  ;;  %v5368_v56 = vand.u32 4294901760, %v5367_v43  ;;  %v5362_v8 = vsub.f32 %v5360_v48, %v5361_v53 }
0x181b   :  { %v4693_v15 = vadd.f32 %v4692_v14, %v4683_v11  ;;  %12083 = vmatprep.subr.bf16.mxu1 %v12776_v0 }
0x181c   :  { %v5369_v11 = vsub.f32 %v5367_v43, %v5368_v56 }
0x181d   :  { %v4697_v18 = vsel %vm641_vm4, %v4693_v15, %v4695_v16  ;;  %v5363_v15 = vand.u32 4294901760, %v5362_v8 }
0x181e   :  { %v4699_v19 = vsel %vm63_vm2, %v4697_v18, 0  ;;  %v5382_v18 = vand.u32 4294901760, %v5381_v9 }
0x181f   :  { %v4774_v21 = vand.u32 4294901760, %v4699_v19 }
0x1821   :  { %v4775_v22 = vsub.f32 %v4699_v19, %v4774_v21 }
0x1823   :  { %v4776_v24 = vand.u32 4294901760, %v4775_v22 }
0x1825   :  { %v4777_v25 = vsub.f32 %v4775_v22, %v4776_v24 }
0x1827   :  { %v4778_v23 = vand.u32 4294901760, %v4777_v25 }
0x1829   :  { %10873 = vmatmul.mubr.f32.vlgmr.msra.gmra.mrb[8].mxu0 %v4778_v23 }
0x182a   :  { %12022 = vmatpush3.bf16.msra.mxu0 %v12932_v45  ;;  %10891 = vmatprep.mubr.msk.f32.mxu0 %vm12777_vm0, %v12778_v1 }
0x182b   :  { %12023 = vmatprep.subr.bf16.mxu0 %v12776_v0 }
0x182e   :  { %12025 = vmatpush3.bf16.msra.mxu0 %v12939_v50 }
0x182f   :  { %12026 = vmatprep.subr.bf16.mxu0 %v12776_v0 }
0x1832   :  { %12028 = vmatpush3.bf16.msra.mxu0 %v12946_v54 }
0x1833   :  { %12029 = vmatprep.subr.bf16.mxu0 %v12776_v0 }
0x1836   :  { %12031 = vmatpush3.bf16.msra.mxu0 %v12950_v57 }
0x1837   :  { %12032 = vmatprep.subr.bf16.mxu0 %v12776_v0 }
0x1839   :  { %10892 = vmatmul.mubr.f32.vlgmr.msra.gmra.mrb[8].mxu0 %v4774_v21 }
0x183a   :  { %12034 = vmatpush3.bf16.msra.mxu0 %v12956_v58  ;;  %10910 = vmatprep.mubr.msk.f32.mxu0 %vm12777_vm0, %v12778_v1 }
0x183b   :  { %12035 = vmatprep.subr.bf16.mxu0 %v12776_v0 }
0x183e   :  { %12037 = vmatpush3.bf16.msra.mxu0 %v12963_v59 }
0x183f   :  { %12038 = vmatprep.subr.bf16.mxu0 %v12776_v0 }
0x1842   :  { %12040 = vmatpush3.bf16.msra.mxu0 %v12971_v60 }
0x1843   :  { %12041 = vmatprep.subr.bf16.mxu0 %v12776_v0 }
0x1846   :  { %12043 = vmatpush3.bf16.msra.mxu0 %v12977_v61 }
0x1847   :  { %12044 = vmatprep.subr.bf16.mxu0 %v12776_v0 }
0x1849   :  { %10911 = vmatmul.mubr.f32.vlgmr.msra.gmra.mrb[8].mxu0 %v4775_v22 }
0x184a   :  { %12046 = vmatpush3.bf16.msra.mxu0 %v12872_v12  ;;  %10929 = vmatprep.mubr.msk.f32.mxu0 %vm12777_vm0, %v12778_v1 }
0x184b   :  { %12047 = vmatprep.subr.bf16.mxu0 %v12776_v0 }
0x184e   :  { %12049 = vmatpush3.bf16.msra.mxu0 %v12887_v20 }
0x184f   :  { %12050 = vmatprep.subr.bf16.mxu0 %v12776_v0 }
0x1852   :  { %12052 = vmatpush3.bf16.msra.mxu0 %v12894_v26 }
0x1853   :  { %12053 = vmatprep.subr.bf16.mxu0 %v12776_v0 }
0x1856   :  { %12055 = vmatpush3.bf16.msra.mxu0 %v12910_v33 }
0x1857   :  { %12056 = vmatprep.subr.bf16.mxu0 %v12776_v0 }
0x1859   :  { %10930 = vmatmul.mubr.f32.vlgmr.msra.gmra.mrb[8].mxu0 %v4776_v24  ;;  %v5383_v24 = vsub.f32 %v5381_v9, %v5382_v18 }
0x185a   :  { %12058 = vmatpush3.bf16.msra.mxu0 %v12996_v62  ;;  %10948 = vmatprep.mubr.msk.f32.mxu0 %vm12777_vm0, %v12778_v1 }
0x185b   :  { %12059 = vmatprep.subr.bf16.mxu0 %v12776_v0 }
0x185e   :  { %12061 = vmatpush3.bf16.msra.mxu0 %v13005_v63 }
0x185f   :  { %12062 = vmatprep.subr.bf16.mxu0 %v12776_v0 }
0x1862   :  { %12064 = vmatpush3.bf16.msra.mxu0 %v13013_v2 }
0x1863   :  { %12065 = vmatprep.subr.bf16.mxu0 %v12776_v0 }
0x1866   :  { %12067 = vmatpush3.bf16.msra.mxu0 %v13017_v3 }
0x1867   :  { %12068 = vmatprep.subr.bf16.mxu0 %v12776_v0 }
0x1869   :  { %10949 = vmatmul.mubr.f32.vlgmr.msra.gmra.mrb[8].mxu0 %v4774_v21 }
0x186a   :  { %12070 = vmatpush3.bf16.msra.mxu0 %v12872_v12  ;;  %10967 = vmatprep.mubr.msk.f32.mxu0 %vm12777_vm0, %v12778_v1 }
0x186b   :  { %12071 = vmatprep.subr.bf16.mxu0 %v12776_v0 }
0x186e   :  { %12073 = vmatpush3.bf16.msra.mxu0 %v12887_v20 }
0x186f   :  { %12074 = vmatprep.subr.bf16.mxu0 %v12776_v0 }
0x1872   :  { %12076 = vmatpush3.bf16.msra.mxu0 %v12894_v26 }
0x1873   :  { %12077 = vmatprep.subr.bf16.mxu0 %v12776_v0 }
0x1876   :  { %12079 = vmatpush3.bf16.msra.mxu0 %v12910_v33 }
0x1877   :  { %12188 = vmatprep.subr.bf16.mxu0 %v12776_v0 }
0x1879   :  { %10968 = vmatmul.mubr.f32.vlgmr.msra.gmra.mrb[8].mxu0 %v4774_v21  ;;  %v5370_v21 = vand.u32 4294901760, %v5369_v11 }
0x187a   :  { %11158 = vmatprep.mubr.msk.f32.mxu0 %vm12777_vm0, %v12778_v1 }
0x187b   :  { %v12087_v25 = vpack.c.bf16 %v5370_v21, %v5363_v15  ;;  %v9413_v21 = vld [vmem:[%s14193_s0 + $0x18] ss:$0 sm:$0xff] }
0x194c   :  { %v5234_v27 = vpop.f32.mrb[8].mxu0 }
0x194d   :  { %v12448_v28 = vadd.f32 %v13500_v55, %v5234_v27  ;;  %v10969_v29 = vpop.f32.mrb[9].mxu0  ;;  %v5384_v27 = vand.u32 4294901760, %v5383_v24 }
0x194e   :  { %v12093_v29 = vpack.c.bf16 %v5367_v43, %v5360_v48 }
0x194f   :  { %v5238_v30 = vmul.f32 0.5, %v12448_v28 }
0x1951   :  { %v5239_v6 = vsel %vm13046_vm3, %v12448_v28, %v5238_v30 }
0x1952   :  { %12653 = vtanh.f32 %v5239_v6  ;;  %v12105_v6 = vpack.c.bf16 %v5368_v56, %v5361_v53 }
0x195c   :  { %v12654_v31 = vpop.eup %12653 }
0x195d   :  { %v5241_v32 = vadd.f32 1.0, %v12654_v31 }
0x195f   :  { %v5242_v34 = vmul.f32 0.5, %v5241_v32 }
0x1961   :  { %v5243_v35 = vsel %vm13046_vm3, %v12654_v31, %v5242_v34 }
0x1962   :  { %5246 = vrot.lane.b32.xlu1 %v5243_v35, %s12779_s18  ;;  %v5244_v39 = vmul.f32 %v5243_v35, %v13510_v17  ;;  %v5286_v17 = vand.u32 4294901760, %v5264_v49 }
0x1964   :  { %v12084_v4 = vpack.c.bf16 %v5289_v52, %v5286_v17  ;;  %v5374_v7 = vsub.f32 %v5264_v49, %v5286_v17 }
0x1966   :  { %12085 = vmatpush3.bf16.msra.mxu1 %v12084_v4  ;;  %v5375_v16 = vand.u32 4294901760, %v5374_v7  ;;  %v12096_v30 = vpack.c.bf16 %v5381_v9, %v5374_v7 }
0x1967   :  { %12086 = vmatprep.subr.bf16.mxu1 %v12776_v0 }
0x1968   :  { %v5376_v22 = vsub.f32 %v5374_v7, %v5375_v16  ;;  %v12108_v31 = vpack.c.bf16 %v5382_v18, %v5375_v16 }
0x196a   :  { %v5377_v23 = vand.u32 4294901760, %v5376_v22  ;;  %v9415_v22 = vld [vmem:[%s14193_s0 + $0x19] ss:$0 sm:$0xff] }
0x196c   :  { %v12090_v28 = vpack.c.bf16 %v5384_v27, %v5377_v23 }
0x19d4   :  { %v5247_v36 = vpop.permute.xlu1 %5246 }
0x19d5   :  { %v5249_v38 = vmul.f32 %v5247_v36, %v5243_v35 }
0x19d7   :  { %5251 = vrot.lane.b32.xlu1 %v5249_v38, %s12780_s19 }
0x1a49   :  { %v5252_v40 = vpop.permute.xlu1 %5251 }
0x1a4a   :  { %v13649_v41 = vadd.f32 %v5252_v40, %v5244_v39 }
0x1a4c   :  { %12655 = vtanh.f32 %v13649_v41 }
0x1a56   :  { %v12656_v42 = vpop.eup %12655 }
0x1a57   :  { %5257 = vrot.lane.b32.xlu0 %v12656_v42, %s12779_s18  ;;  %v9409_v42 = vld [vmem:[%s14197_s4 + $0x4] ss:$0 sm:$0xff] }
0x1ac9   :  { %v5258_v14 = vpop.permute.xlu0 %5257 }
0x1aca   :  { %v13657_v19 = vmul.f32 %v5258_v14, %v5243_v35 }
0x1acc   :  { %5275 = vrot.lane.b32.xlu1 %v13657_v19, %s12780_s19 }
0x1b3e   :  { %v5276_v32 = vpop.permute.xlu1 %5275 }
0x1b3f   :  { %v5277_v34 = vsel %vm641_vm4, %v5276_v32, 0  ;;  %v9421_v32 = vld [vmem:[%s14193_s0 + $0x1c] ss:$0 sm:$0xff] }
0x1b40   :  { %v5348_v35 = vand.u32 4294901760, %v5277_v34 }
0x1b42   :  { %v5349_v36 = vsub.f32 %v5277_v34, %v5348_v35 }
0x1b44   :  { %v5350_v38 = vand.u32 4294901760, %v5349_v36 }
0x1b46   :  { %v5351_v39 = vsub.f32 %v5349_v36, %v5350_v38 }
0x1b48   :  { %v5352_v40 = vand.u32 4294901760, %v5351_v39 }
0x1b4a   :  { %10979 = vmatmul.mubr.f32.vlgmr.msra.gmra.mrb[8].mxu1 %v5352_v40 }
0x1b4b   :  { %12088 = vmatpush3.bf16.msra.mxu1 %v12087_v25  ;;  %10989 = vmatprep.mubr.msk.f32.mxu1 %vm12777_vm0, %v12778_v1  ;;  %v9417_v25 = vld [vmem:[%s14193_s0 + $0x1a] ss:$0 sm:$0xff] }
0x1b4c   :  { %12089 = vmatprep.subr.bf16.mxu1 %v12776_v0 }
0x1b4f   :  { %12091 = vmatpush3.bf16.msra.mxu1 %v12090_v28 }
0x1b50   :  { %12092 = vmatprep.subr.bf16.mxu1 %v12776_v0 }
0x1b52   :  { %10990 = vmatmul.mubr.f32.vlgmr.msra.gmra.mrb[8].mxu1 %v5348_v35 }
0x1b53   :  { %12094 = vmatpush3.bf16.msra.mxu1 %v12093_v29  ;;  %11000 = vmatprep.mubr.msk.f32.mxu1 %vm12777_vm0, %v12778_v1  ;;  %v9419_v29 = vld [vmem:[%s14193_s0 + $0x1b] ss:$0 sm:$0xff] }
0x1b54   :  { %12095 = vmatprep.subr.bf16.mxu1 %v12776_v0 }
0x1b57   :  { %12097 = vmatpush3.bf16.msra.mxu1 %v12096_v30 }
0x1b58   :  { %12098 = vmatprep.subr.bf16.mxu1 %v12776_v0 }
0x1b5a   :  { %11001 = vmatmul.mubr.f32.vlgmr.msra.gmra.mrb[8].mxu1 %v5349_v36 }
0x1b5b   :  { %12100 = vmatpush3.bf16.msra.mxu1 %v13653_v47  ;;  %11011 = vmatprep.mubr.msk.f32.mxu1 %vm12777_vm0, %v12778_v1 }
0x1b5c   :  { %12101 = vmatprep.subr.bf16.mxu1 %v12776_v0 }
0x1b5f   :  { %12103 = vmatpush3.bf16.msra.mxu1 %v12084_v4 }
0x1b60   :  { %12104 = vmatprep.subr.bf16.mxu1 %v12776_v0 }
0x1b62   :  { %11012 = vmatmul.mubr.f32.vlgmr.msra.gmra.mrb[8].mxu1 %v5350_v38  ;;  %v9423_v38 = vld [vmem:[%s14193_s0 + $0x1d] ss:$0 sm:$0xff] }
0x1b63   :  { %12106 = vmatpush3.bf16.msra.mxu1 %v12105_v6  ;;  %11022 = vmatprep.mubr.msk.f32.mxu1 %vm12777_vm0, %v12778_v1 }
0x1b64   :  { %12107 = vmatprep.subr.bf16.mxu1 %v12776_v0 }
0x1b67   :  { %12109 = vmatpush3.bf16.msra.mxu1 %v12108_v31 }
0x1b68   :  { %12110 = vmatprep.subr.bf16.mxu1 %v12776_v0 }
0x1b6a   :  { %11023 = vmatmul.mubr.f32.vlgmr.msra.gmra.mrb[8].mxu1 %v5348_v35 }
0x1b6b   :  { %12112 = vmatpush3.bf16.msra.mxu1 %v13653_v47  ;;  %11033 = vmatprep.mubr.msk.f32.mxu1 %vm12777_vm0, %v12778_v1  ;;  %v9410_v47 = vld [vmem:[%s14198_s5 + $0x8] sm:$0x3] }
0x1b6c   :  { %12113 = vmatprep.subr.bf16.mxu1 %v12776_v0 }
0x1b6f   :  { %12115 = vmatpush3.bf16.msra.mxu1 %v12084_v4 }
0x1b70   :  { %12116 = vmatprep.subr.bf16.mxu1 %v12776_v0 }
0x1b72   :  { %11034 = vmatmul.mubr.f32.vlgmr.msra.gmra.mrb[8].mxu1 %v5348_v35 }
0x1b73   :  { %12118 = vmatpush3.bf16.msra.mxu1 %v12872_v12  ;;  %11052 = vmatprep.mubr.msk.f32.mxu1 %vm12777_vm0, %v12778_v1 }
0x1b74   :  { %12119 = vmatprep.subr.bf16.mxu1 %v12776_v0 }
0x1b77   :  { %12121 = vmatpush3.bf16.msra.mxu1 %v12887_v20 }
0x1b78   :  { %12122 = vmatprep.subr.bf16.mxu1 %v12776_v0 }
0x1b7b   :  { %12124 = vmatpush3.bf16.msra.mxu1 %v12894_v26 }
0x1b7c   :  { %12125 = vmatprep.subr.bf16.mxu1 %v12776_v0 }
0x1b7f   :  { %12127 = vmatpush3.bf16.msra.mxu1 %v12910_v33 }
0x1b80   :  { %12128 = vmatprep.subr.bf16.mxu1 %v12776_v0 }
0x1c45   :  { %v5760_v37 = vpop.f32.mrb[8].mxu1 }
0x1c46   :  { %v12449_v13 = vadd.f32 %v9409_v42, %v5760_v37  ;;  %v11035_v44 = vpop.f32.mrb[9].mxu1  ;;  %v9425_v37 = vld [vmem:[%s14193_s0 + $0x1e] ss:$0 sm:$0xff] }
0x1c48   :  { %12657 = vtanh.f32 %v12449_v13 }
0x1c52   :  { %v12658_v46 = vpop.eup %12657 }
0x1c53   :  { %v5765_v48 = vmul.f32 2.5, %v12658_v46 }
0x1c55   :  { %5767 = vst [vmem:[#allocation5 + $0x8] sm:$0x3] %v5765_v48  ;;  %v5770_v43 = vadd.f32 %v9410_v47, %v5765_v48  ;;  %v9427_v47 = vld [vmem:[%s14193_s0 + $0x1f] ss:$0 sm:$0xff] }
0x1c57   :  { %v5771_v49 = vsel %vm1134_vm5, %v5770_v43, -inf }
0x1c58   :  { %5772 = vmax.xlane.f32.xlu0 %v5771_v49 }
0x1ce5   :  { %v5773_v51 = vpop.xlane.xlu0 %5772 }
0x1ce6   :  { %vm5774_vm9 = vcmp.ge.f32.partialorder %v5770_v43, %v5773_v51 }
0x1ce7   :  { %v5775_v17 = vsel %vm5774_vm9, %v13036_v5, 128 }
0x1ce8   :  { %v5776_v52 = vsel %vm1134_vm5, %v5775_v17, 2147483647 }
0x1ce9   :  { %v5778_v53 = vshra.s32 %v5776_v52, 16  ;;  %v5777_v4 = vand.u32 65535, %v5776_v52 }
0x1ceb   :  { %v5780_v56 = vcvt.s32.f32 %v5778_v53  ;;  %v5779_v9 = vcvt.s32.f32 %v5777_v4 }
0x1ced   :  { %5781 = vmin.xlane.f32.xlu1 %v5780_v56 }
0x1d7a   :  { %v5782_v7 = vpop.xlane.xlu1 %5781 }
0x1d7b   :  { %vm5783_vm10 = vcmp.eq.f32.partialorder %v5780_v56, %v5782_v7  ;;  %v5788_v11 = vcvt.f32.s32 %v5782_v7 }
0x1d7c   :  { %v5784_v8 = vsel %vm5783_vm10, %v5779_v9, inf }
0x1d7d   :  { %5785 = vmin.xlane.f32.xlu0 %v5784_v8  ;;  %v5789_v15 = vshll.u32 %v5788_v11, 16 }
0x1d93   :  { %5873 = vrot.lane.b32.xlu0 %v13657_v19, %s12779_s18 }
0x1e0a   :  { %v5786_v14 = vpop.xlane.xlu0 %5785 }
0x1e0b   :  { %v5787_v16 = vcvt.f32.s32 %v5786_v14 }
0x1e0d   :  { %v5790_v18 = vadd.s32 %v5789_v15, %v5787_v16 }
0x1e0e   :  { %v5874_v53 = vpop.permute.xlu0 %5873 }
0x1e0f   :  { %9411 = vst.msk [vmem:[%s14200_s7 + $0x8] sm:$0x3] %vm1155_vm8, %v5790_v18  ;;  %vm5794_vm11 = vcmp.eq.s32.totalorder %v5790_v18, 0  ;;  %vm5804_vm12 = vcmp.eq.s32.totalorder %v5790_v18, 1  ;;  %vm5814_vm13 = vcmp.eq.s32.totalorder %v5790_v18, 2  ;;  %vm5824_vm14 = vcmp.eq.s32.totalorder %v5790_v18, 3 }
0x1e10   :  { %v9412_v19 = vsel %vm5794_vm11, 1.0, %v12778_v1  ;;  %v9414_v24 = vsel %vm5804_vm12, 1.0, %v12778_v1  ;;  %v9416_v23 = vsel %vm5814_vm13, 1.0, %v12778_v1  ;;  %v9418_v30 = vsel %vm5824_vm14, 1.0, %v12778_v1 }
0x1e11   :  { %v5801_v27 = vmul.f32 %v9413_v21, %v9412_v19  ;;  %v5811_v28 = vmul.f32 %v9415_v22, %v9414_v24  ;;  %vm5834_vm15 = vcmp.eq.s32.totalorder %v5790_v18, 4  ;;  %v5821_v31 = vmul.f32 %v9417_v25, %v9416_v23 }
0x1e12   :  { %vm5844_vm1 = vcmp.eq.s32.totalorder %v5790_v18, 5  ;;  %v9420_v34 = vsel %vm5834_vm15, 1.0, %v12778_v1  ;;  %v5831_v36 = vmul.f32 %v9419_v29, %v9418_v30  ;;  %vm5854_vm6 = vcmp.eq.s32.totalorder %v5790_v18, 6 }
0x1e13   :  { %v5812_v6 = vadd.f32 %v5811_v28, %v5801_v27  ;;  %v9422_v39 = vsel %vm5844_vm1, 1.0, %v12778_v1  ;;  %v5841_v42 = vmul.f32 %v9421_v32, %v9420_v34  ;;  %vm5864_vm7 = vcmp.eq.s32.totalorder %v5790_v18, 7  ;;  %v6442_v32 = vld [vmem:[#allocation2 + $0xa8] sm:$0xff] }
0x1e14   :  { %v9424_v13 = vsel %vm5854_vm6, 1.0, %v12778_v1  ;;  %v5851_v46 = vmul.f32 %v9423_v38, %v9422_v39  ;;  %v9426_v48 = vsel %vm5864_vm7, 1.0, %v12778_v1 }
0x1e15   :  { %v5822_v35 = vadd.f32 %v5821_v31, %v5812_v6  ;;  %v5861_v49 = vmul.f32 %v9425_v37, %v9424_v13  ;;  %v5871_v17 = vmul.f32 %v9427_v47, %v9426_v48  ;;  %v6441_v31 = vld [vmem:[#allocation2 + $0xa0] sm:$0xff] }
0x1e16   :  { %v6459_v34 = vand.u32 4294901760, %v6441_v31 }
0x1e17   :  { %v5832_v40 = vadd.f32 %v5831_v36, %v5822_v35  ;;  %v6462_v35 = vand.u32 4294901760, %v6442_v32 }
0x1e18   :  { %v6539_v38 = vsub.f32 %v6441_v31, %v6459_v34 }
0x1e19   :  { %v5842_v44 = vadd.f32 %v5841_v42, %v5832_v40  ;;  %v13808_v36 = vpack.c.bf16 %v6462_v35, %v6459_v34  ;;  %v6546_v39 = vsub.f32 %v6442_v32, %v6462_v35  ;;  %v6443_v40 = vld [vmem:[#allocation2 + $0xb0] sm:$0xff]  ;;  %v6444_v42 = vld [vmem:[#allocation2 + $0xb8] sm:$0xff]  ;;  %v9430_v35 = vld [vmem:[%s14198_s5 + $0xa] sm:$0x3] }
0x1e1a   :  { %v6468_v37 = vand.u32 4294901760, %v6444_v42  ;;  %v6540_v13 = vand.u32 4294901760, %v6539_v38 }
0x1e1b   :  { %v5852_v43 = vadd.f32 %v5851_v46, %v5842_v44  ;;  %12190 = vmatpush3.bf16.msra.mxu0 %v13808_v36  ;;  %v6547_v44 = vand.u32 4294901760, %v6546_v39 }
0x1e1c   :  { %12191 = vmatprep.subr.bf16.mxu0 %v12776_v0  ;;  %v6560_v48 = vsub.f32 %v6444_v42, %v6468_v37 }
0x1e1d   :  { %v5862_v51 = vadd.f32 %v5861_v49, %v5852_v43  ;;  %v6541_v43 = vsub.f32 %v6539_v38, %v6540_v13 }
0x1e1f   :  { %v5872_v52 = vadd.f32 %v5871_v17, %v5862_v51  ;;  %v6548_v51 = vsub.f32 %v6546_v39, %v6547_v44 }
0x1e21   :  { %v5876_v56 = vsel %vm641_vm4, %v5872_v52, %v5874_v53  ;;  %v6542_v52 = vand.u32 4294901760, %v6541_v43 }
0x1e22   :  { %v5878_v4 = vsel %vm63_vm2, %v5876_v56, 0  ;;  %v6561_v56 = vand.u32 4294901760, %v6560_v48 }
0x1e23   :  { %v5953_v7 = vand.u32 4294901760, %v5878_v4 }
0x1e25   :  { %v5954_v9 = vsub.f32 %v5878_v4, %v5953_v7  ;;  %v6549_v4 = vand.u32 4294901760, %v6548_v51 }
0x1e27   :  { %v5955_v8 = vand.u32 4294901760, %v5954_v9 }
0x1e29   :  { %v5956_v11 = vsub.f32 %v5954_v9, %v5955_v8 }
0x1e2b   :  { %v5957_v14 = vand.u32 4294901760, %v5956_v11 }
0x1e2d   :  { %11053 = vmatmul.mubr.f32.vlgmr.msra.gmra.mrb[10].mxu1 %v5957_v14 }
0x1e2e   :  { %12130 = vmatpush3.bf16.msra.mxu1 %v12932_v45  ;;  %11071 = vmatprep.mubr.msk.f32.mxu1 %vm12777_vm0, %v12778_v1 }
0x1e2f   :  { %12131 = vmatprep.subr.bf16.mxu1 %v12776_v0 }
0x1e32   :  { %12133 = vmatpush3.bf16.msra.mxu1 %v12939_v50 }
0x1e33   :  { %12134 = vmatprep.subr.bf16.mxu1 %v12776_v0 }
0x1e36   :  { %12136 = vmatpush3.bf16.msra.mxu1 %v12946_v54 }
0x1e37   :  { %12137 = vmatprep.subr.bf16.mxu1 %v12776_v0 }
0x1e3a   :  { %12139 = vmatpush3.bf16.msra.mxu1 %v12950_v57 }
0x1e3b   :  { %12140 = vmatprep.subr.bf16.mxu1 %v12776_v0 }
0x1e3d   :  { %11072 = vmatmul.mubr.f32.vlgmr.msra.gmra.mrb[10].mxu1 %v5953_v7 }
0x1e3e   :  { %12142 = vmatpush3.bf16.msra.mxu1 %v12956_v58  ;;  %11090 = vmatprep.mubr.msk.f32.mxu1 %vm12777_vm0, %v12778_v1 }
0x1e3f   :  { %12143 = vmatprep.subr.bf16.mxu1 %v12776_v0 }
0x1e42   :  { %12145 = vmatpush3.bf16.msra.mxu1 %v12963_v59 }
0x1e43   :  { %12146 = vmatprep.subr.bf16.mxu1 %v12776_v0 }
0x1e46   :  { %12148 = vmatpush3.bf16.msra.mxu1 %v12971_v60 }
0x1e47   :  { %12149 = vmatprep.subr.bf16.mxu1 %v12776_v0 }
0x1e4a   :  { %12151 = vmatpush3.bf16.msra.mxu1 %v12977_v61 }
0x1e4b   :  { %12152 = vmatprep.subr.bf16.mxu1 %v12776_v0 }
0x1e4d   :  { %11091 = vmatmul.mubr.f32.vlgmr.msra.gmra.mrb[10].mxu1 %v5954_v9  ;;  %v6562_v9 = vsub.f32 %v6560_v48, %v6561_v56 }
0x1e4e   :  { %12154 = vmatpush3.bf16.msra.mxu1 %v12872_v12  ;;  %11109 = vmatprep.mubr.msk.f32.mxu1 %vm12777_vm0, %v12778_v1 }
0x1e4f   :  { %12155 = vmatprep.subr.bf16.mxu1 %v12776_v0  ;;  %v6563_v14 = vand.u32 4294901760, %v6562_v9  ;;  %v9437_v9 = vld [vmem:[%s14193_s0 + $0x22] ss:$0 sm:$0xff] }
0x1e52   :  { %12157 = vmatpush3.bf16.msra.mxu1 %v12887_v20 }
0x1e53   :  { %12158 = vmatprep.subr.bf16.mxu1 %v12776_v0 }
0x1e56   :  { %12160 = vmatpush3.bf16.msra.mxu1 %v12894_v26 }
0x1e57   :  { %12161 = vmatprep.subr.bf16.mxu1 %v12776_v0 }
0x1e5a   :  { %12163 = vmatpush3.bf16.msra.mxu1 %v12910_v33 }
0x1e5b   :  { %12164 = vmatprep.subr.bf16.mxu1 %v12776_v0 }
0x1e5d   :  { %11110 = vmatmul.mubr.f32.vlgmr.msra.gmra.mrb[10].mxu1 %v5955_v8  ;;  %v12195_v8 = vpack.c.bf16 %v6549_v4, %v6542_v52  ;;  %v9435_v4 = vld [vmem:[%s14193_s0 + $0x21] ss:$0 sm:$0xff] }
0x1e5e   :  { %12166 = vmatpush3.bf16.msra.mxu1 %v12996_v62  ;;  %11128 = vmatprep.mubr.msk.f32.mxu1 %vm12777_vm0, %v12778_v1 }
0x1e5f   :  { %12167 = vmatprep.subr.bf16.mxu1 %v12776_v0 }
0x1e62   :  { %12169 = vmatpush3.bf16.msra.mxu1 %v13005_v63 }
0x1e63   :  { %12170 = vmatprep.subr.bf16.mxu1 %v12776_v0 }
0x1e66   :  { %12172 = vmatpush3.bf16.msra.mxu1 %v13013_v2 }
0x1e67   :  { %12173 = vmatprep.subr.bf16.mxu1 %v12776_v0 }
0x1e6a   :  { %12175 = vmatpush3.bf16.msra.mxu1 %v13017_v3 }
0x1e6b   :  { %12176 = vmatprep.subr.bf16.mxu1 %v12776_v0 }
0x1e6d   :  { %11129 = vmatmul.mubr.f32.vlgmr.msra.gmra.mrb[10].mxu1 %v5953_v7 }
0x1e6e   :  { %12178 = vmatpush3.bf16.msra.mxu1 %v12872_v12  ;;  %11147 = vmatprep.mubr.msk.f32.mxu1 %vm12777_vm0, %v12778_v1 }
0x1e6f   :  { %12179 = vmatprep.subr.bf16.mxu1 %v12776_v0 }
0x1e72   :  { %12181 = vmatpush3.bf16.msra.mxu1 %v12887_v20 }
0x1e73   :  { %12182 = vmatprep.subr.bf16.mxu1 %v12776_v0 }
0x1e76   :  { %12184 = vmatpush3.bf16.msra.mxu1 %v12894_v26 }
0x1e77   :  { %12185 = vmatprep.subr.bf16.mxu1 %v12776_v0 }
0x1e7a   :  { %12187 = vmatpush3.bf16.msra.mxu1 %v12910_v33 }
0x1e7b   :  { %12296 = vmatprep.subr.bf16.mxu1 %v12776_v0 }
0x1e7d   :  { %11148 = vmatmul.mubr.f32.vlgmr.msra.gmra.mrb[10].mxu1 %v5953_v7 }
0x1e7e   :  { %11338 = vmatprep.mubr.msk.f32.mxu1 %vm12777_vm0, %v12778_v1 }
0x1f50   :  { %v6413_v15 = vpop.f32.mrb[10].mxu1 }
0x1f51   :  { %v12450_v16 = vadd.f32 %v13500_v55, %v6413_v15  ;;  %v11149_v18 = vpop.f32.mrb[11].mxu1 }
0x1f53   :  { %v6417_v21 = vmul.f32 0.5, %v12450_v16 }
0x1f55   :  { %v6418_v22 = vsel %vm13046_vm3, %v12450_v16, %v6417_v21  ;;  %v12201_v16 = vpack.c.bf16 %v6546_v39, %v6539_v38  ;;  %v12213_v21 = vpack.c.bf16 %v6547_v44, %v6540_v13 }
0x1f56   :  { %12659 = vtanh.f32 %v6418_v22 }
0x1f60   :  { %v12660_v19 = vpop.eup %12659 }
0x1f61   :  { %v6420_v24 = vadd.f32 1.0, %v12660_v19 }
0x1f63   :  { %v6421_v25 = vmul.f32 0.5, %v6420_v24 }
0x1f65   :  { %v6422_v23 = vsel %vm13046_vm3, %v12660_v19, %v6421_v25 }
0x1f66   :  { %6425 = vrot.lane.b32.xlu1 %v6422_v23, %s12779_s18  ;;  %v6423_v55 = vmul.f32 %v6422_v23, %v13649_v41  ;;  %v6465_v41 = vand.u32 4294901760, %v6443_v40 }
0x1f68   :  { %v12192_v46 = vpack.c.bf16 %v6468_v37, %v6465_v41  ;;  %v6553_v47 = vsub.f32 %v6443_v40, %v6465_v41 }
0x1f6a   :  { %12193 = vmatpush3.bf16.msra.mxu0 %v12192_v46  ;;  %v6554_v53 = vand.u32 4294901760, %v6553_v47  ;;  %v12204_v18 = vpack.c.bf16 %v6560_v48, %v6553_v47 }
0x1f6b   :  { %12194 = vmatprep.subr.bf16.mxu0 %v12776_v0 }
0x1f6c   :  { %v6555_v7 = vsub.f32 %v6553_v47, %v6554_v53  ;;  %v12216_v22 = vpack.c.bf16 %v6561_v56, %v6554_v53  ;;  %v9433_v56 = vld [vmem:[%s14193_s0 + $0x20] ss:$0 sm:$0xff] }
0x1f6e   :  { %v6556_v11 = vand.u32 4294901760, %v6555_v7 }
0x1f70   :  { %v12198_v15 = vpack.c.bf16 %v6563_v14, %v6556_v11 }
0x1fd8   :  { %v6426_v27 = vpop.permute.xlu1 %6425 }
0x1fd9   :  { %v6428_v28 = vmul.f32 %v6426_v27, %v6422_v23 }
0x1fdb   :  { %6430 = vrot.lane.b32.xlu1 %v6428_v28, %s12780_s19 }
0x204d   :  { %v6431_v29 = vpop.permute.xlu1 %6430 }
0x204e   :  { %v13804_v30 = vadd.f32 %v6431_v29, %v6423_v55  ;;  %v9429_v29 = vld [vmem:[%s14197_s4 + $0x5] ss:$0 sm:$0xff] }
0x2050   :  { %12661 = vtanh.f32 %v13804_v30 }
0x205a   :  { %v12662_v6 = vpop.eup %12661 }
0x205b   :  { %6436 = vrot.lane.b32.xlu0 %v12662_v6, %s12779_s18 }
0x20cd   :  { %v6437_v49 = vpop.permute.xlu0 %6436 }
0x20ce   :  { %v13812_v17 = vmul.f32 %v6437_v49, %v6422_v23 }
0x20d0   :  { %6454 = vrot.lane.b32.xlu1 %v13812_v17, %s12780_s19 }
0x2142   :  { %v6455_v19 = vpop.permute.xlu1 %6454 }
0x2143   :  { %v6456_v24 = vsel %vm641_vm4, %v6455_v19, 0 }
0x2144   :  { %v6527_v25 = vand.u32 4294901760, %v6456_v24 }
0x2146   :  { %v6528_v23 = vsub.f32 %v6456_v24, %v6527_v25 }
0x2148   :  { %v6529_v27 = vand.u32 4294901760, %v6528_v23 }
0x214a   :  { %v6530_v28 = vsub.f32 %v6528_v23, %v6529_v27 }
0x214c   :  { %v6531_v55 = vand.u32 4294901760, %v6530_v28 }
0x214e   :  { %11159 = vmatmul.mubr.f32.vlgmr.msra.gmra.mrb[10].mxu0 %v6531_v55 }
0x214f   :  { %12196 = vmatpush3.bf16.msra.mxu0 %v12195_v8  ;;  %11169 = vmatprep.mubr.msk.f32.mxu0 %vm12777_vm0, %v12778_v1 }
0x2150   :  { %12197 = vmatprep.subr.bf16.mxu0 %v12776_v0 }
0x2153   :  { %12199 = vmatpush3.bf16.msra.mxu0 %v12198_v15  ;;  %v9439_v15 = vld [vmem:[%s14193_s0 + $0x23] ss:$0 sm:$0xff] }
0x2154   :  { %12200 = vmatprep.subr.bf16.mxu0 %v12776_v0 }
0x2156   :  { %11170 = vmatmul.mubr.f32.vlgmr.msra.gmra.mrb[10].mxu0 %v6527_v25 }
0x2157   :  { %12202 = vmatpush3.bf16.msra.mxu0 %v12201_v16  ;;  %11180 = vmatprep.mubr.msk.f32.mxu0 %vm12777_vm0, %v12778_v1 }
0x2158   :  { %12203 = vmatprep.subr.bf16.mxu0 %v12776_v0 }
0x215b   :  { %12205 = vmatpush3.bf16.msra.mxu0 %v12204_v18 }
0x215c   :  { %12206 = vmatprep.subr.bf16.mxu0 %v12776_v0 }
0x215e   :  { %11181 = vmatmul.mubr.f32.vlgmr.msra.gmra.mrb[10].mxu0 %v6528_v23 }
0x215f   :  { %12208 = vmatpush3.bf16.msra.mxu0 %v13808_v36  ;;  %11191 = vmatprep.mubr.msk.f32.mxu0 %vm12777_vm0, %v12778_v1 }
0x2160   :  { %12209 = vmatprep.subr.bf16.mxu0 %v12776_v0 }
0x2163   :  { %12211 = vmatpush3.bf16.msra.mxu0 %v12192_v46 }
0x2164   :  { %12212 = vmatprep.subr.bf16.mxu0 %v12776_v0 }
0x2166   :  { %11192 = vmatmul.mubr.f32.vlgmr.msra.gmra.mrb[10].mxu0 %v6529_v27 }
0x2167   :  { %12214 = vmatpush3.bf16.msra.mxu0 %v12213_v21  ;;  %11202 = vmatprep.mubr.msk.f32.mxu0 %vm12777_vm0, %v12778_v1 }
0x2168   :  { %12215 = vmatprep.subr.bf16.mxu0 %v12776_v0 }
0x216b   :  { %12217 = vmatpush3.bf16.msra.mxu0 %v12216_v22 }
0x216c   :  { %12218 = vmatprep.subr.bf16.mxu0 %v12776_v0 }
0x216e   :  { %11203 = vmatmul.mubr.f32.vlgmr.msra.gmra.mrb[10].mxu0 %v6527_v25 }
0x216f   :  { %12220 = vmatpush3.bf16.msra.mxu0 %v13808_v36  ;;  %11213 = vmatprep.mubr.msk.f32.mxu0 %vm12777_vm0, %v12778_v1 }
0x2170   :  { %12221 = vmatprep.subr.bf16.mxu0 %v12776_v0 }
0x2173   :  { %12223 = vmatpush3.bf16.msra.mxu0 %v12192_v46 }
0x2174   :  { %12224 = vmatprep.subr.bf16.mxu0 %v12776_v0 }
0x2176   :  { %11214 = vmatmul.mubr.f32.vlgmr.msra.gmra.mrb[10].mxu0 %v6527_v25 }
0x2177   :  { %12226 = vmatpush3.bf16.msra.mxu0 %v12872_v12  ;;  %11232 = vmatprep.mubr.msk.f32.mxu0 %vm12777_vm0, %v12778_v1 }
0x2178   :  { %12227 = vmatprep.subr.bf16.mxu0 %v12776_v0 }
0x217b   :  { %12229 = vmatpush3.bf16.msra.mxu0 %v12887_v20 }
0x217c   :  { %12230 = vmatprep.subr.bf16.mxu0 %v12776_v0 }
0x217f   :  { %12232 = vmatpush3.bf16.msra.mxu0 %v12894_v26 }
0x2180   :  { %12233 = vmatprep.subr.bf16.mxu0 %v12776_v0 }
0x2183   :  { %12235 = vmatpush3.bf16.msra.mxu0 %v12910_v33 }
0x2184   :  { %12236 = vmatprep.subr.bf16.mxu0 %v12776_v0 }
0x2249   :  { %v6939_v6 = vpop.f32.mrb[10].mxu0 }
0x224a   :  { %v12451_v31 = vadd.f32 %v9429_v29, %v6939_v6  ;;  %v11215_v32 = vpop.f32.mrb[11].mxu0 }
0x224c   :  { %12663 = vtanh.f32 %v12451_v31 }
0x2256   :  { %v12664_v34 = vpop.eup %12663 }
0x2257   :  { %v6944_v36 = vmul.f32 2.5, %v12664_v34  ;;  %v13938_v34 = vld [vmem:[%s14195_s2] ss:$0 sm:$0xff] }
0x2259   :  { %6946 = vst [vmem:[#allocation5 + $0xa] sm:$0x3] %v6944_v36  ;;  %v6949_v38 = vadd.f32 %v9430_v35, %v6944_v36 }
0x225b   :  { %v6950_v39 = vsel %vm1134_vm5, %v6949_v38, -inf }
0x225c   :  { %6951 = vmax.xlane.f32.xlu0 %v6950_v39 }
0x22e9   :  { %v6952_v40 = vpop.xlane.xlu0 %6951 }
0x22ea   :  { %vm6953_vm9 = vcmp.ge.f32.partialorder %v6949_v38, %v6952_v40 }
0x22eb   :  { %v6954_v42 = vsel %vm6953_vm9, %v13036_v5, 128 }
0x22ec   :  { %v6955_v41 = vsel %vm1134_vm5, %v6954_v42, 2147483647 }
0x22ed   :  { %v6957_v37 = vshra.s32 %v6955_v41, 16  ;;  %v6956_v44 = vand.u32 65535, %v6955_v41 }
0x22ef   :  { %v6959_v13 = vcvt.s32.f32 %v6957_v37  ;;  %v6958_v47 = vcvt.s32.f32 %v6956_v44 }
0x22f1   :  { %6960 = vmin.xlane.f32.xlu1 %v6959_v13 }
0x237e   :  { %v6961_v46 = vpop.xlane.xlu1 %6960 }
0x237f   :  { %vm6962_vm10 = vcmp.eq.f32.partialorder %v6959_v13, %v6961_v46  ;;  %v6967_v43 = vcvt.f32.s32 %v6961_v46 }
0x2380   :  { %v6963_v48 = vsel %vm6962_vm10, %v6958_v47, inf }
0x2381   :  { %6964 = vmin.xlane.f32.xlu0 %v6963_v48  ;;  %v6968_v51 = vshll.u32 %v6967_v43, 16 }
0x2397   :  { %7012 = vrot.lane.b32.xlu0 %v13812_v17, %s12779_s18 }
0x240e   :  { %v6965_v49 = vpop.xlane.xlu0 %6964 }
0x240f   :  { %v6966_v52 = vcvt.f32.s32 %v6965_v49  ;;  %v7580_v49 = vld [vmem:[#allocation2 + $0xc0] sm:$0xff] }
0x2411   :  { %v6969_v53 = vadd.s32 %v6968_v51, %v6966_v52  ;;  %v7581_v51 = vld [vmem:[#allocation2 + $0xc8] sm:$0xff]  ;;  %v7598_v52 = vand.u32 4294901760, %v7580_v49 }
0x2412   :  { %v7013_v25 = vpop.permute.xlu0 %7012 }
0x2413   :  { %9431 = vst.msk [vmem:[%s14200_s7 + $0xa] sm:$0x3] %vm1155_vm8, %v6969_v53  ;;  %vm6973_vm11 = vcmp.eq.s32.totalorder %v6969_v53, 0  ;;  %vm6983_vm12 = vcmp.eq.s32.totalorder %v6969_v53, 1  ;;  %vm6993_vm13 = vcmp.eq.s32.totalorder %v6969_v53, 2  ;;  %vm7003_vm14 = vcmp.eq.s32.totalorder %v6969_v53, 3 }
0x2414   :  { %v9432_v17 = vsel %vm6973_vm11, 1.0, %v12778_v1  ;;  %v9434_v7 = vsel %vm6983_vm12, 1.0, %v12778_v1  ;;  %v9436_v8 = vsel %vm6993_vm13, 1.0, %v12778_v1  ;;  %v9438_v16 = vsel %vm7003_vm14, 1.0, %v12778_v1 }
0x2415   :  { %v6980_v11 = vmul.f32 %v9433_v56, %v9432_v17  ;;  %v6990_v14 = vmul.f32 %v9435_v4, %v9434_v7  ;;  %v7000_v21 = vmul.f32 %v9437_v9, %v9436_v8  ;;  %v7010_v19 = vmul.f32 %v9439_v15, %v9438_v16  ;;  %v7582_v7 = vld [vmem:[#allocation2 + $0xd0] sm:$0xff]  ;;  %v7583_v9 = vld [vmem:[#allocation2 + $0xd8] sm:$0xff] }
0x2416   :  { %v7601_v53 = vand.u32 4294901760, %v7581_v51  ;;  %v7678_v4 = vsub.f32 %v7580_v49, %v7598_v52  ;;  %v7607_v8 = vand.u32 4294901760, %v7583_v9 }
0x2417   :  { %v6991_v18 = vadd.f32 %v6990_v14, %v6980_v11 }
0x2418   :  { %v13952_v56 = vpack.c.bf16 %v7601_v53, %v7598_v52  ;;  %v7685_v17 = vsub.f32 %v7581_v51, %v7601_v53  ;;  %v7679_v11 = vand.u32 4294901760, %v7678_v4 }
0x2419   :  { %v7001_v22 = vadd.f32 %v7000_v21, %v6991_v18  ;;  %v7699_v18 = vsub.f32 %v7583_v9, %v7607_v8 }
0x241a   :  { %12298 = vmatpush3.bf16.msra.mxu1 %v13952_v56  ;;  %v7686_v14 = vand.u32 4294901760, %v7685_v17  ;;  %v7680_v21 = vsub.f32 %v7678_v4, %v7679_v11 }
0x241b   :  { %v7011_v24 = vadd.f32 %v7010_v19, %v7001_v22  ;;  %12299 = vmatprep.subr.bf16.mxu1 %v12776_v0 }
0x241c   :  { %v7687_v22 = vsub.f32 %v7685_v17, %v7686_v14 }
0x241d   :  { %v7015_v23 = vsel %vm641_vm4, %v7011_v24, %v7013_v25  ;;  %v7681_v24 = vand.u32 4294901760, %v7680_v21 }
0x241e   :  { %v7017_v27 = vsel %vm63_vm2, %v7015_v23, 0  ;;  %v7700_v23 = vand.u32 4294901760, %v7699_v18 }
0x241f   :  { %v7092_v28 = vand.u32 4294901760, %v7017_v27 }
0x2421   :  { %v7093_v55 = vsub.f32 %v7017_v27, %v7092_v28 }
0x2423   :  { %v7094_v29 = vand.u32 4294901760, %v7093_v55 }
0x2425   :  { %v7095_v6 = vsub.f32 %v7093_v55, %v7094_v29 }
0x2427   :  { %v7096_v31 = vand.u32 4294901760, %v7095_v6 }
0x2429   :  { %11233 = vmatmul.mubr.f32.vlgmr.msra.gmra.mrb[12].mxu0 %v7096_v31 }
0x242a   :  { %12238 = vmatpush3.bf16.msra.mxu0 %v12932_v45  ;;  %11251 = vmatprep.mubr.msk.f32.mxu0 %vm12777_vm0, %v12778_v1 }
0x242b   :  { %12239 = vmatprep.subr.bf16.mxu0 %v12776_v0 }
0x242e   :  { %12241 = vmatpush3.bf16.msra.mxu0 %v12939_v50 }
0x242f   :  { %12242 = vmatprep.subr.bf16.mxu0 %v12776_v0 }
0x2432   :  { %12244 = vmatpush3.bf16.msra.mxu0 %v12946_v54 }
0x2433   :  { %12245 = vmatprep.subr.bf16.mxu0 %v12776_v0 }
0x2436   :  { %12247 = vmatpush3.bf16.msra.mxu0 %v12950_v57 }
0x2437   :  { %12248 = vmatprep.subr.bf16.mxu0 %v12776_v0 }
0x2439   :  { %11252 = vmatmul.mubr.f32.vlgmr.msra.gmra.mrb[12].mxu0 %v7092_v28 }
0x243a   :  { %12250 = vmatpush3.bf16.msra.mxu0 %v12956_v58  ;;  %11270 = vmatprep.mubr.msk.f32.mxu0 %vm12777_vm0, %v12778_v1 }
0x243b   :  { %12251 = vmatprep.subr.bf16.mxu0 %v12776_v0 }
0x243e   :  { %12253 = vmatpush3.bf16.msra.mxu0 %v12963_v59 }
0x243f   :  { %12254 = vmatprep.subr.bf16.mxu0 %v12776_v0 }
0x2442   :  { %12256 = vmatpush3.bf16.msra.mxu0 %v12971_v60 }
0x2443   :  { %12257 = vmatprep.subr.bf16.mxu0 %v12776_v0 }
0x2446   :  { %12259 = vmatpush3.bf16.msra.mxu0 %v12977_v61 }
0x2447   :  { %12260 = vmatprep.subr.bf16.mxu0 %v12776_v0 }
0x2449   :  { %11271 = vmatmul.mubr.f32.vlgmr.msra.gmra.mrb[12].mxu0 %v7093_v55 }
0x244a   :  { %12262 = vmatpush3.bf16.msra.mxu0 %v12872_v12  ;;  %11289 = vmatprep.mubr.msk.f32.mxu0 %vm12777_vm0, %v12778_v1 }
0x244b   :  { %12263 = vmatprep.subr.bf16.mxu0 %v12776_v0 }
0x244e   :  { %12265 = vmatpush3.bf16.msra.mxu0 %v12887_v20 }
0x244f   :  { %12266 = vmatprep.subr.bf16.mxu0 %v12776_v0 }
0x2452   :  { %12268 = vmatpush3.bf16.msra.mxu0 %v12894_v26 }
0x2453   :  { %12269 = vmatprep.subr.bf16.mxu0 %v12776_v0 }
0x2456   :  { %12271 = vmatpush3.bf16.msra.mxu0 %v12910_v33 }
0x2457   :  { %12272 = vmatprep.subr.bf16.mxu0 %v12776_v0 }
0x2459   :  { %11290 = vmatmul.mubr.f32.vlgmr.msra.gmra.mrb[12].mxu0 %v7094_v29  ;;  %v7701_v29 = vsub.f32 %v7699_v18, %v7700_v23 }
0x245a   :  { %12274 = vmatpush3.bf16.msra.mxu0 %v12996_v62  ;;  %11308 = vmatprep.mubr.msk.f32.mxu0 %vm12777_vm0, %v12778_v1 }
0x245b   :  { %12275 = vmatprep.subr.bf16.mxu0 %v12776_v0 }
0x245e   :  { %12277 = vmatpush3.bf16.msra.mxu0 %v13005_v63 }
0x245f   :  { %12278 = vmatprep.subr.bf16.mxu0 %v12776_v0 }
0x2462   :  { %12280 = vmatpush3.bf16.msra.mxu0 %v13013_v2 }
0x2463   :  { %12281 = vmatprep.subr.bf16.mxu0 %v12776_v0 }
0x2466   :  { %12283 = vmatpush3.bf16.msra.mxu0 %v13017_v3 }
0x2467   :  { %12284 = vmatprep.subr.bf16.mxu0 %v12776_v0 }
0x2469   :  { %11309 = vmatmul.mubr.f32.vlgmr.msra.gmra.mrb[12].mxu0 %v7092_v28 }
0x246a   :  { %12286 = vmatpush3.bf16.msra.mxu0 %v12872_v12  ;;  %11327 = vmatprep.mubr.msk.f32.mxu0 %vm12777_vm0, %v12778_v1 }
0x246b   :  { %12287 = vmatprep.subr.bf16.mxu0 %v12776_v0 }
0x246e   :  { %12289 = vmatpush3.bf16.msra.mxu0 %v12887_v20 }
0x246f   :  { %12290 = vmatprep.subr.bf16.mxu0 %v12776_v0 }
0x2472   :  { %12292 = vmatpush3.bf16.msra.mxu0 %v12894_v26 }
0x2473   :  { %12293 = vmatprep.subr.bf16.mxu0 %v12776_v0 }
0x2476   :  { %12295 = vmatpush3.bf16.msra.mxu0 %v12910_v33 }
0x2477   :  { %12404 = vmatprep.subr.bf16.mxu0 %v12776_v0 }
0x2479   :  { %11328 = vmatmul.mubr.f32.vlgmr.msra.gmra.mrb[12].mxu0 %v7092_v28  ;;  %v7688_v28 = vand.u32 4294901760, %v7687_v22 }
0x247a   :  { %11518 = vmatprep.mubr.msk.f32.mxu0 %vm12777_vm0, %v12778_v1 }
0x247b   :  { %v12303_v6 = vpack.c.bf16 %v7688_v28, %v7681_v24  ;;  %v9445_v28 = vld [vmem:[%s14193_s0 + $0x24] ss:$0 sm:$0xff] }
0x254c   :  { %v7552_v32 = vpop.f32.mrb[12].mxu0 }
0x254d   :  { %v12452_v35 = vadd.f32 %v13938_v34, %v7552_v32  ;;  %v11329_v36 = vpop.f32.mrb[13].mxu0  ;;  %v7702_v32 = vand.u32 4294901760, %v7701_v29 }
0x254e   :  { %v12309_v36 = vpack.c.bf16 %v7685_v17, %v7678_v4 }
0x254f   :  { %v7556_v38 = vmul.f32 0.5, %v12452_v35 }
0x2551   :  { %v7557_v39 = vsel %vm13046_vm3, %v12452_v35, %v7556_v38 }
0x2552   :  { %12665 = vtanh.f32 %v7557_v39  ;;  %v12321_v39 = vpack.c.bf16 %v7686_v14, %v7679_v11 }
0x255c   :  { %v12666_v40 = vpop.eup %12665 }
0x255d   :  { %v7559_v42 = vadd.f32 1.0, %v12666_v40 }
0x255f   :  { %v7560_v41 = vmul.f32 0.5, %v7559_v42 }
0x2561   :  { %v7561_v37 = vsel %vm13046_vm3, %v12666_v40, %v7560_v41 }
0x2562   :  { %7564 = vrot.lane.b32.xlu1 %v7561_v37, %s12779_s18  ;;  %v7562_v46 = vmul.f32 %v7561_v37, %v13804_v30  ;;  %v7604_v30 = vand.u32 4294901760, %v7582_v7 }
0x2564   :  { %v12300_v15 = vpack.c.bf16 %v7607_v8, %v7604_v30  ;;  %v7692_v16 = vsub.f32 %v7582_v7, %v7604_v30 }
0x2566   :  { %12301 = vmatpush3.bf16.msra.mxu1 %v12300_v15  ;;  %v7693_v25 = vand.u32 4294901760, %v7692_v16  ;;  %v12312_v38 = vpack.c.bf16 %v7699_v18, %v7692_v16 }
0x2567   :  { %12302 = vmatprep.subr.bf16.mxu1 %v12776_v0 }
0x2568   :  { %v7694_v55 = vsub.f32 %v7692_v16, %v7693_v25  ;;  %v12324_v40 = vpack.c.bf16 %v7700_v23, %v7693_v25 }
0x256a   :  { %v7695_v31 = vand.u32 4294901760, %v7694_v55  ;;  %v9447_v55 = vld [vmem:[%s14193_s0 + $0x25] ss:$0 sm:$0xff] }
0x256c   :  { %v12306_v35 = vpack.c.bf16 %v7702_v32, %v7695_v31 }
0x25d4   :  { %v7565_v13 = vpop.permute.xlu1 %7564 }
0x25d5   :  { %v7567_v44 = vmul.f32 %v7565_v13, %v7561_v37 }
0x25d7   :  { %7569 = vrot.lane.b32.xlu1 %v7567_v44, %s12780_s19 }
0x2649   :  { %v7570_v47 = vpop.permute.xlu1 %7569 }
0x264a   :  { %v13948_v48 = vadd.f32 %v7570_v47, %v7562_v46 }
0x264c   :  { %12667 = vtanh.f32 %v13948_v48 }
0x2656   :  { %v12668_v43 = vpop.eup %12667 }
0x2657   :  { %7575 = vrot.lane.b32.xlu0 %v12668_v43, %s12779_s18  ;;  %v9441_v43 = vld [vmem:[%s14197_s4 + $0x6] ss:$0 sm:$0xff] }
0x26c9   :  { %v7576_v19 = vpop.permute.xlu0 %7575 }
0x26ca   :  { %v13956_v27 = vmul.f32 %v7576_v19, %v7561_v37 }
0x26cc   :  { %7593 = vrot.lane.b32.xlu1 %v13956_v27, %s12780_s19 }
0x273e   :  { %v7594_v42 = vpop.permute.xlu1 %7593 }
0x273f   :  { %v7595_v41 = vsel %vm641_vm4, %v7594_v42, 0  ;;  %v9453_v42 = vld [vmem:[%s14193_s0 + $0x28] ss:$0 sm:$0xff] }
0x2740   :  { %v7666_v37 = vand.u32 4294901760, %v7595_v41 }
0x2742   :  { %v7667_v13 = vsub.f32 %v7595_v41, %v7666_v37 }
0x2744   :  { %v7668_v44 = vand.u32 4294901760, %v7667_v13 }
0x2746   :  { %v7669_v46 = vsub.f32 %v7667_v13, %v7668_v44 }
0x2748   :  { %v7670_v47 = vand.u32 4294901760, %v7669_v46 }
0x274a   :  { %11339 = vmatmul.mubr.f32.vlgmr.msra.gmra.mrb[12].mxu1 %v7670_v47 }
0x274b   :  { %12304 = vmatpush3.bf16.msra.mxu1 %v12303_v6  ;;  %11349 = vmatprep.mubr.msk.f32.mxu1 %vm12777_vm0, %v12778_v1  ;;  %v9449_v6 = vld [vmem:[%s14193_s0 + $0x26] ss:$0 sm:$0xff] }
0x274c   :  { %12305 = vmatprep.subr.bf16.mxu1 %v12776_v0 }
0x274f   :  { %12307 = vmatpush3.bf16.msra.mxu1 %v12306_v35 }
0x2750   :  { %12308 = vmatprep.subr.bf16.mxu1 %v12776_v0 }
0x2752   :  { %11350 = vmatmul.mubr.f32.vlgmr.msra.gmra.mrb[12].mxu1 %v7666_v37 }
0x2753   :  { %12310 = vmatpush3.bf16.msra.mxu1 %v12309_v36  ;;  %11360 = vmatprep.mubr.msk.f32.mxu1 %vm12777_vm0, %v12778_v1  ;;  %v9451_v36 = vld [vmem:[%s14193_s0 + $0x27] ss:$0 sm:$0xff] }
0x2754   :  { %12311 = vmatprep.subr.bf16.mxu1 %v12776_v0 }
0x2757   :  { %12313 = vmatpush3.bf16.msra.mxu1 %v12312_v38 }
0x2758   :  { %12314 = vmatprep.subr.bf16.mxu1 %v12776_v0 }
0x275a   :  { %11361 = vmatmul.mubr.f32.vlgmr.msra.gmra.mrb[12].mxu1 %v7667_v13 }
0x275b   :  { %12316 = vmatpush3.bf16.msra.mxu1 %v13952_v56  ;;  %11371 = vmatprep.mubr.msk.f32.mxu1 %vm12777_vm0, %v12778_v1 }
0x275c   :  { %12317 = vmatprep.subr.bf16.mxu1 %v12776_v0 }
0x275f   :  { %12319 = vmatpush3.bf16.msra.mxu1 %v12300_v15 }
0x2760   :  { %12320 = vmatprep.subr.bf16.mxu1 %v12776_v0 }
0x2762   :  { %11372 = vmatmul.mubr.f32.vlgmr.msra.gmra.mrb[12].mxu1 %v7668_v44  ;;  %v9455_v44 = vld [vmem:[%s14193_s0 + $0x29] ss:$0 sm:$0xff] }
0x2763   :  { %12322 = vmatpush3.bf16.msra.mxu1 %v12321_v39  ;;  %11382 = vmatprep.mubr.msk.f32.mxu1 %vm12777_vm0, %v12778_v1 }
0x2764   :  { %12323 = vmatprep.subr.bf16.mxu1 %v12776_v0 }
0x2767   :  { %12325 = vmatpush3.bf16.msra.mxu1 %v12324_v40 }
0x2768   :  { %12326 = vmatprep.subr.bf16.mxu1 %v12776_v0 }
0x276a   :  { %11383 = vmatmul.mubr.f32.vlgmr.msra.gmra.mrb[12].mxu1 %v7666_v37 }
0x276b   :  { %12328 = vmatpush3.bf16.msra.mxu1 %v13952_v56  ;;  %11393 = vmatprep.mubr.msk.f32.mxu1 %vm12777_vm0, %v12778_v1  ;;  %v9442_v56 = vld [vmem:[%s14198_s5 + $0xc] sm:$0x3] }
0x276c   :  { %12329 = vmatprep.subr.bf16.mxu1 %v12776_v0 }
0x276f   :  { %12331 = vmatpush3.bf16.msra.mxu1 %v12300_v15 }
0x2770   :  { %12332 = vmatprep.subr.bf16.mxu1 %v12776_v0 }
0x2772   :  { %11394 = vmatmul.mubr.f32.vlgmr.msra.gmra.mrb[12].mxu1 %v7666_v37 }
0x2773   :  { %12334 = vmatpush3.bf16.msra.mxu1 %v12872_v12  ;;  %11412 = vmatprep.mubr.msk.f32.mxu1 %vm12777_vm0, %v12778_v1 }
0x2774   :  { %12335 = vmatprep.subr.bf16.mxu1 %v12776_v0 }
0x2777   :  { %12337 = vmatpush3.bf16.msra.mxu1 %v12887_v20 }
0x2778   :  { %12338 = vmatprep.subr.bf16.mxu1 %v12776_v0 }
0x277b   :  { %12340 = vmatpush3.bf16.msra.mxu1 %v12894_v26 }
0x277c   :  { %12341 = vmatprep.subr.bf16.mxu1 %v12776_v0 }
0x277f   :  { %12343 = vmatpush3.bf16.msra.mxu1 %v12910_v33 }
0x2780   :  { %12344 = vmatprep.subr.bf16.mxu1 %v12776_v0 }
0x2845   :  { %v8078_v49 = vpop.f32.mrb[12].mxu1 }
0x2846   :  { %v12453_v51 = vadd.f32 %v9441_v43, %v8078_v49  ;;  %v11395_v52 = vpop.f32.mrb[13].mxu1  ;;  %v9457_v49 = vld [vmem:[%s14193_s0 + $0x2a] ss:$0 sm:$0xff] }
0x2848   :  { %12669 = vtanh.f32 %v12453_v51 }
0x2852   :  { %v12670_v53 = vpop.eup %12669 }
0x2853   :  { %v8083_v4 = vmul.f32 2.5, %v12670_v53 }
0x2855   :  { %8085 = vst [vmem:[#allocation5 + $0xc] sm:$0x3] %v8083_v4  ;;  %v8088_v17 = vadd.f32 %v9442_v56, %v8083_v4  ;;  %v9459_v56 = vld [vmem:[%s14193_s0 + $0x2b] ss:$0 sm:$0xff] }
0x2857   :  { %v8089_v7 = vsel %vm1134_vm5, %v8088_v17, -inf }
0x2858   :  { %8090 = vmax.xlane.f32.xlu0 %v8089_v7 }
0x28e5   :  { %v8091_v9 = vpop.xlane.xlu0 %8090 }
0x28e6   :  { %vm8092_vm15 = vcmp.ge.f32.partialorder %v8088_v17, %v8091_v9 }
0x28e7   :  { %v8093_v30 = vsel %vm8092_vm15, %v13036_v5, 128 }
0x28e8   :  { %v8094_v8 = vsel %vm1134_vm5, %v8093_v30, 2147483647 }
0x28e9   :  { %v8096_v11 = vshra.s32 %v8094_v8, 16  ;;  %v8095_v15 = vand.u32 65535, %v8094_v8 }
0x28eb   :  { %v8098_v14 = vcvt.s32.f32 %v8096_v11  ;;  %v8097_v18 = vcvt.s32.f32 %v8095_v15 }
0x28ed   :  { %8099 = vmin.xlane.f32.xlu1 %v8098_v14 }
0x297a   :  { %v8100_v16 = vpop.xlane.xlu1 %8099 }
0x297b   :  { %vm8101_vm1 = vcmp.eq.f32.partialorder %v8098_v14, %v8100_v16  ;;  %v8106_v22 = vcvt.f32.s32 %v8100_v16 }
0x297c   :  { %v8102_v21 = vsel %vm8101_vm1, %v8097_v18, inf }
0x297d   :  { %8103 = vmin.xlane.f32.xlu0 %v8102_v21  ;;  %v8107_v24 = vshll.u32 %v8106_v22, 16 }
0x2993   :  { %8191 = vrot.lane.b32.xlu0 %v13956_v27, %s12779_s18 }
0x2a0a   :  { %v8104_v19 = vpop.xlane.xlu0 %8103 }
0x2a0b   :  { %v8105_v25 = vcvt.f32.s32 %v8104_v19 }
0x2a0d   :  { %v8108_v23 = vadd.s32 %v8107_v24, %v8105_v25 }
0x2a0e   :  { %v8192_v11 = vpop.permute.xlu0 %8191 }
0x2a0f   :  { %9443 = vst.msk [vmem:[%s14200_s7 + $0xc] sm:$0x3] %vm1155_vm8, %v8108_v23  ;;  %vm8112_vm6 = vcmp.eq.s32.totalorder %v8108_v23, 0  ;;  %vm8122_vm7 = vcmp.eq.s32.totalorder %v8108_v23, 1  ;;  %vm8132_vm9 = vcmp.eq.s32.totalorder %v8108_v23, 2  ;;  %vm8142_vm10 = vcmp.eq.s32.totalorder %v8108_v23, 3 }
0x2a10   :  { %v9444_v27 = vsel %vm8112_vm6, 1.0, %v12778_v1  ;;  %v9446_v29 = vsel %vm8122_vm7, 1.0, %v12778_v1  ;;  %v9448_v31 = vsel %vm8132_vm9, 1.0, %v12778_v1  ;;  %v9450_v38 = vsel %vm8142_vm10, 1.0, %v12778_v1 }
0x2a11   :  { %v8119_v32 = vmul.f32 %v9445_v28, %v9444_v27  ;;  %v8129_v35 = vmul.f32 %v9447_v55, %v9446_v29  ;;  %vm8152_vm11 = vcmp.eq.s32.totalorder %v8108_v23, 4  ;;  %v8139_v40 = vmul.f32 %v9449_v6, %v9448_v31  ;;  %v8761_v55 = vld [vmem:[#allocation2 + $0xf0] sm:$0xff]  ;;  %v8762_v27 = vld [vmem:[#allocation2 + $0xf8] sm:$0xff] }
0x2a12   :  { %vm8162_vm12 = vcmp.eq.s32.totalorder %v8108_v23, 5  ;;  %v9452_v41 = vsel %vm8152_vm11, 1.0, %v12778_v1  ;;  %v8149_v13 = vmul.f32 %v9451_v36, %v9450_v38  ;;  %vm8172_vm13 = vcmp.eq.s32.totalorder %v8108_v23, 6 }
0x2a13   :  { %v8130_v39 = vadd.f32 %v8129_v35, %v8119_v32  ;;  %v9454_v46 = vsel %vm8162_vm12, 1.0, %v12778_v1  ;;  %v8159_v43 = vmul.f32 %v9453_v42, %v9452_v41  ;;  %vm8182_vm14 = vcmp.eq.s32.totalorder %v8108_v23, 7 }
0x2a14   :  { %v9456_v51 = vsel %vm8172_vm13, 1.0, %v12778_v1  ;;  %v8169_v53 = vmul.f32 %v9455_v44, %v9454_v46  ;;  %v9458_v4 = vsel %vm8182_vm14, 1.0, %v12778_v1  ;;  %v8786_v29 = vand.u32 4294901760, %v8762_v27 }
0x2a15   :  { %v8140_v37 = vadd.f32 %v8139_v40, %v8130_v39  ;;  %v8179_v7 = vmul.f32 %v9457_v49, %v9456_v51  ;;  %v8189_v30 = vmul.f32 %v9459_v56, %v9458_v4 }
0x2a16   :  { %v8878_v36 = vsub.f32 %v8762_v27, %v8786_v29 }
0x2a17   :  { %v8150_v47 = vadd.f32 %v8149_v13, %v8140_v37 }
0x2a18   :  { %v8879_v13 = vand.u32 4294901760, %v8878_v36 }
0x2a19   :  { %v8160_v52 = vadd.f32 %v8159_v43, %v8150_v47 }
0x2a1a   :  { %v8880_v47 = vsub.f32 %v8878_v36, %v8879_v13 }
0x2a1b   :  { %v8170_v17 = vadd.f32 %v8169_v53, %v8160_v52 }
0x2a1c   :  { %v8881_v51 = vand.u32 4294901760, %v8880_v47 }
0x2a1d   :  { %v8180_v9 = vadd.f32 %v8179_v7, %v8170_v17 }
0x2a1f   :  { %v8190_v8 = vadd.f32 %v8189_v30, %v8180_v9 }
0x2a21   :  { %v8194_v14 = vsel %vm641_vm4, %v8190_v8, %v8192_v11 }
0x2a22   :  { %v8196_v15 = vsel %vm63_vm2, %v8194_v14, 0 }
0x2a23   :  { %v8271_v16 = vand.u32 4294901760, %v8196_v15 }
0x2a25   :  { %v8272_v18 = vsub.f32 %v8196_v15, %v8271_v16 }
0x2a27   :  { %v8273_v21 = vand.u32 4294901760, %v8272_v18 }
0x2a29   :  { %v8274_v22 = vsub.f32 %v8272_v18, %v8273_v21 }
0x2a2b   :  { %v8275_v19 = vand.u32 4294901760, %v8274_v22 }
0x2a2d   :  { %11413 = vmatmul.mubr.f32.vlgmr.msra.gmra.mrb[14].mxu1 %v8275_v19 }
0x2a2e   :  { %12346 = vmatpush3.bf16.msra.mxu1 %v12932_v45  ;;  %11431 = vmatprep.mubr.msk.f32.mxu1 %vm12777_vm0, %v12778_v1 }
0x2a2f   :  { %12347 = vmatprep.subr.bf16.mxu1 %v12776_v0 }
0x2a32   :  { %12349 = vmatpush3.bf16.msra.mxu1 %v12939_v50 }
0x2a33   :  { %12350 = vmatprep.subr.bf16.mxu1 %v12776_v0 }
0x2a36   :  { %12352 = vmatpush3.bf16.msra.mxu1 %v12946_v54 }
0x2a37   :  { %12353 = vmatprep.subr.bf16.mxu1 %v12776_v0 }
0x2a3a   :  { %12355 = vmatpush3.bf16.msra.mxu1 %v12950_v57 }
0x2a3b   :  { %12356 = vmatprep.subr.bf16.mxu1 %v12776_v0 }
0x2a3d   :  { %11432 = vmatmul.mubr.f32.vlgmr.msra.gmra.mrb[14].mxu1 %v8271_v16 }
0x2a3e   :  { %12358 = vmatpush3.bf16.msra.mxu1 %v12956_v58  ;;  %11450 = vmatprep.mubr.msk.f32.mxu1 %vm12777_vm0, %v12778_v1 }
0x2a3f   :  { %12359 = vmatprep.subr.bf16.mxu1 %v12776_v0 }
0x2a42   :  { %12361 = vmatpush3.bf16.msra.mxu1 %v12963_v59 }
0x2a43   :  { %12362 = vmatprep.subr.bf16.mxu1 %v12776_v0 }
0x2a46   :  { %12364 = vmatpush3.bf16.msra.mxu1 %v12971_v60 }
0x2a47   :  { %12365 = vmatprep.subr.bf16.mxu1 %v12776_v0 }
0x2a4a   :  { %12367 = vmatpush3.bf16.msra.mxu1 %v12977_v61 }
0x2a4b   :  { %12368 = vmatprep.subr.bf16.mxu1 %v12776_v0 }
0x2a4d   :  { %11451 = vmatmul.mubr.f32.vlgmr.msra.gmra.mrb[14].mxu1 %v8272_v18 }
0x2a4e   :  { %12370 = vmatpush3.bf16.msra.mxu1 %v12872_v12  ;;  %11469 = vmatprep.mubr.msk.f32.mxu1 %vm12777_vm0, %v12778_v1 }
0x2a4f   :  { %12371 = vmatprep.subr.bf16.mxu1 %v12776_v0 }
0x2a52   :  { %12373 = vmatpush3.bf16.msra.mxu1 %v12887_v20 }
0x2a53   :  { %12374 = vmatprep.subr.bf16.mxu1 %v12776_v0 }
0x2a56   :  { %12376 = vmatpush3.bf16.msra.mxu1 %v12894_v26 }
0x2a57   :  { %12377 = vmatprep.subr.bf16.mxu1 %v12776_v0 }
0x2a5a   :  { %12379 = vmatpush3.bf16.msra.mxu1 %v12910_v33 }
0x2a5b   :  { %12380 = vmatprep.subr.bf16.mxu1 %v12776_v0 }
0x2a5d   :  { %11470 = vmatmul.mubr.f32.vlgmr.msra.gmra.mrb[14].mxu1 %v8273_v21 }
0x2a5e   :  { %12382 = vmatpush3.bf16.msra.mxu1 %v12996_v62  ;;  %11488 = vmatprep.mubr.msk.f32.mxu1 %vm12777_vm0, %v12778_v1 }
0x2a5f   :  { %12383 = vmatprep.subr.bf16.mxu1 %v12776_v0 }
0x2a62   :  { %12385 = vmatpush3.bf16.msra.mxu1 %v13005_v63 }
0x2a63   :  { %12386 = vmatprep.subr.bf16.mxu1 %v12776_v0 }
0x2a66   :  { %12388 = vmatpush3.bf16.msra.mxu1 %v13013_v2 }
0x2a67   :  { %12389 = vmatprep.subr.bf16.mxu1 %v12776_v0 }
0x2a6a   :  { %12391 = vmatpush3.bf16.msra.mxu1 %v13017_v3  ;;  %v8759_v3 = vld [vmem:[#allocation2 + $0xe0] sm:$0xff] }
0x2a6b   :  { %12392 = vmatprep.subr.bf16.mxu1 %v12776_v0  ;;  %v8777_v10 = vand.u32 4294901760, %v8759_v3 }
0x2a6d   :  { %11489 = vmatmul.mubr.f32.vlgmr.msra.gmra.mrb[14].mxu1 %v8271_v16  ;;  %v8857_v23 = vsub.f32 %v8759_v3, %v8777_v10 }
0x2a6e   :  { %12394 = vmatpush3.bf16.msra.mxu1 %v12872_v12  ;;  %11507 = vmatprep.mubr.msk.f32.mxu1 %vm12777_vm0, %v12778_v1 }
0x2a6f   :  { %12395 = vmatprep.subr.bf16.mxu1 %v12776_v0  ;;  %v8858_v6 = vand.u32 4294901760, %v8857_v23 }
0x2a71   :  { %v8859_v38 = vsub.f32 %v8857_v23, %v8858_v6 }
0x2a72   :  { %12397 = vmatpush3.bf16.msra.mxu1 %v12887_v20 }
0x2a73   :  { %12398 = vmatprep.subr.bf16.mxu1 %v12776_v0  ;;  %v8860_v41 = vand.u32 4294901760, %v8859_v38 }
0x2a76   :  { %12400 = vmatpush3.bf16.msra.mxu1 %v12894_v26 }
0x2a77   :  { %12401 = vmatprep.subr.bf16.mxu1 %v12776_v0 }
0x2a7a   :  { %12403 = vmatpush3.bf16.msra.mxu1 %v12910_v33 }
0x2a7d   :  { %11508 = vmatmul.mubr.f32.vlgmr.msra.gmra.mrb[14].mxu1 %v8271_v16  ;;  %v9461_v16 = vld [vmem:[%s14197_s4 + $0x7] ss:$0 sm:$0xff]  ;;  %s12781_s4 = smov [#allocation6]  }
0x2b50   :  { %v8731_v45 = vpop.f32.mrb[14].mxu1 }
0x2b51   :  { %v12454_v50 = vadd.f32 %v13938_v34, %v8731_v45  ;;  %v11509_v12 = vpop.f32.mrb[15].mxu1  ;;  %v8760_v34 = vld [vmem:[#allocation2 + $0xe8] sm:$0xff] }
0x2b52   :  { %v8780_v24 = vand.u32 4294901760, %v8760_v34  ;;  %v9462_v45 = vld [vmem:[%s14198_s5 + $0xe] sm:$0x3]  ;;  %s9318_s5 = sshll.u32 %s12781_s4, 4  ;;  %s9319_s5 = int_to_ptr.vmem [resolvable:$true] %s9318_s5 }
0x2b53   :  { %v8735_v54 = vmul.f32 0.5, %v12454_v50  ;;  %s12701_s29 = scalar_lea.vmem %s9319_s5, 32  ;;  %p12706_p9 = scmp.lt.s32.totalorder %s9319_s5, %s9319_s5 }
0x2b54   :  { %v14104_v25 = vpack.c.bf16 %v8780_v24, %v8777_v10  ;;  %v8864_v28 = vsub.f32 %v8760_v34, %v8780_v24  ;;  %p12702_p8 = scmp.ne.s32.totalorder %s9319_s5, %s12701_s29  ;;  %p12707_p10 = scmp.lt.s32.totalorder %s12701_s29, %s12701_s29 }
0x2b55   :  { %v8736_v57 = vsel %vm13046_vm3, %v12454_v50, %v8735_v54 }
0x2b56   :  { %12671 = vtanh.f32 %v8736_v57  ;;  %12406 = vmatpush3.bf16.msra.mxu0 %v14104_v25  ;;  %v8865_v31 = vand.u32 4294901760, %v8864_v28  ;;  %v12417_v53 = vpack.c.bf16 %v8864_v28, %v8857_v23  ;;  %p12708_p11 = por %p12707_p10, %p12706_p9 }
0x2b57   :  { %12407 = vmatprep.subr.bf16.mxu0 %v12776_v0 }
0x2b58   :  { %v8866_v40 = vsub.f32 %v8864_v28, %v8865_v31  ;;  %v12429_v4 = vpack.c.bf16 %v8865_v31, %v8858_v6  ;;  %p12709_p12 = pnand %p12708_p11, %p12702_p8 }
0x2b5a   :  { %v8867_v44 = vand.u32 4294901760, %v8866_v40 }
0x2b5c   :  { %v12411_v43 = vpack.c.bf16 %v8867_v44, %v8860_v41 }
0x2b60   :  { %v12672_v58 = vpop.eup %12671 }
0x2b61   :  { %v8738_v20 = vadd.f32 1.0, %v12672_v58 }
0x2b63   :  { %v8739_v59 = vmul.f32 0.5, %v8738_v20 }
0x2b65   :  { %v8740_v26 = vsel %vm13046_vm3, %v12672_v58, %v8739_v59  ;;  %vm9291_vm3 = vcmask 254976  }
0x2b66   :  { %8743 = vrot.lane.b32.xlu1 %v8740_v26, %s12779_s18  ;;  %v8741_v61 = vmul.f32 %v8740_v26, %v13948_v48  ;;  %v8783_v48 = vand.u32 4294901760, %v8761_v55 }
0x2b68   :  { %v12408_v32 = vpack.c.bf16 %v8786_v29, %v8783_v48  ;;  %v8871_v35 = vsub.f32 %v8761_v55, %v8783_v48 }
0x2b6a   :  { %12409 = vmatpush3.bf16.msra.mxu0 %v12408_v32  ;;  %v8872_v37 = vand.u32 4294901760, %v8871_v35  ;;  %v12420_v56 = vpack.c.bf16 %v8878_v36, %v8871_v35 }
0x2b6b   :  { %12410 = vmatprep.subr.bf16.mxu0 %v12776_v0 }
0x2b6c   :  { %v8873_v46 = vsub.f32 %v8871_v35, %v8872_v37  ;;  %v12432_v17 = vpack.c.bf16 %v8879_v13, %v8872_v37 }
0x2b6e   :  { %v8874_v49 = vand.u32 4294901760, %v8873_v46 }
0x2b70   :  { %v12414_v52 = vpack.c.bf16 %v8881_v51, %v8874_v49 }
0x2bd8   :  { %v8744_v60 = vpop.permute.xlu1 %8743 }
0x2bd9   :  { %v8746_v33 = vmul.f32 %v8744_v60, %v8740_v26 }
0x2bdb   :  { %8748 = vrot.lane.b32.xlu1 %v8746_v33, %s12780_s19 }
0x2c4d   :  { %v8749_v62 = vpop.permute.xlu1 %8748 }
0x2c4e   :  { %v14100_v63 = vadd.f32 %v8749_v62, %v8741_v61 }
0x2c50   :  { %12673 = vtanh.f32 %v14100_v63 }
0x2c5a   :  { %v12674_v2 = vpop.eup %12673 }
0x2c5b   :  { %8754 = vrot.lane.b32.xlu0 %v12674_v2, %s12779_s18 }
0x2ccd   :  { %v8755_v39 = vpop.permute.xlu0 %8754 }
0x2cce   :  { %v8757_v42 = vmul.f32 %v8755_v39, %v8740_v26 }
0x2cd0   :  { %8772 = vrot.lane.b32.xlu1 %v8757_v42, %s12780_s19 }
0x2d42   :  { %v8773_v7 = vpop.permute.xlu1 %8772 }
0x2d43   :  { %v8774_v9 = vsel %vm641_vm4, %v8773_v7, 0  ;;  %9292 = vst.msk [vmem:[#allocation6] sm:$0x3] %vm9291_vm3, %v8773_v7 }
0x2d44   :  { %v8845_v30 = vand.u32 4294901760, %v8774_v9 }
0x2d46   :  { %v8846_v8 = vsub.f32 %v8774_v9, %v8845_v30 }
0x2d48   :  { %v8847_v11 = vand.u32 4294901760, %v8846_v8 }
0x2d4a   :  { %v8848_v14 = vsub.f32 %v8846_v8, %v8847_v11 }
0x2d4c   :  { %v8849_v15 = vand.u32 4294901760, %v8848_v14 }
0x2d4e   :  { %11519 = vmatmul.mubr.f32.vlgmr.msra.gmra.mrb[14].mxu0 %v8849_v15 }
0x2d4f   :  { %12412 = vmatpush3.bf16.msra.mxu0 %v12411_v43  ;;  %11529 = vmatprep.mubr.msk.f32.mxu0 %vm12777_vm0, %v12778_v1 }
0x2d50   :  { %12413 = vmatprep.subr.bf16.mxu0 %v12776_v0 }
0x2d53   :  { %12415 = vmatpush3.bf16.msra.mxu0 %v12414_v52 }
0x2d54   :  { %12416 = vmatprep.subr.bf16.mxu0 %v12776_v0 }
0x2d56   :  { %11530 = vmatmul.mubr.f32.vlgmr.msra.gmra.mrb[14].mxu0 %v8845_v30 }
0x2d57   :  { %12418 = vmatpush3.bf16.msra.mxu0 %v12417_v53  ;;  %11540 = vmatprep.mubr.msk.f32.mxu0 %vm12777_vm0, %v12778_v1 }
0x2d58   :  { %12419 = vmatprep.subr.bf16.mxu0 %v12776_v0 }
0x2d5b   :  { %12421 = vmatpush3.bf16.msra.mxu0 %v12420_v56 }
0x2d5c   :  { %12422 = vmatprep.subr.bf16.mxu0 %v12776_v0 }
0x2d5e   :  { %11541 = vmatmul.mubr.f32.vlgmr.msra.gmra.mrb[14].mxu0 %v8846_v8 }
0x2d5f   :  { %12424 = vmatpush3.bf16.msra.mxu0 %v14104_v25  ;;  %11551 = vmatprep.mubr.msk.f32.mxu0 %vm12777_vm0, %v12778_v1 }
0x2d60   :  { %12425 = vmatprep.subr.bf16.mxu0 %v12776_v0 }
0x2d63   :  { %12427 = vmatpush3.bf16.msra.mxu0 %v12408_v32 }
0x2d64   :  { %12428 = vmatprep.subr.bf16.mxu0 %v12776_v0 }
0x2d66   :  { %11552 = vmatmul.mubr.f32.vlgmr.msra.gmra.mrb[14].mxu0 %v8847_v11 }
0x2d67   :  { %12430 = vmatpush3.bf16.msra.mxu0 %v12429_v4  ;;  %11562 = vmatprep.mubr.msk.f32.mxu0 %vm12777_vm0, %v12778_v1 }
0x2d68   :  { %12431 = vmatprep.subr.bf16.mxu0 %v12776_v0 }
0x2d6b   :  { %12433 = vmatpush3.bf16.msra.mxu0 %v12432_v17 }
0x2d6c   :  { %12434 = vmatprep.subr.bf16.mxu0 %v12776_v0 }
0x2d6e   :  { %11563 = vmatmul.mubr.f32.vlgmr.msra.gmra.mrb[14].mxu0 %v8845_v30 }
0x2d6f   :  { %12436 = vmatpush3.bf16.msra.mxu0 %v14104_v25  ;;  %11573 = vmatprep.mubr.msk.f32.mxu0 %vm12777_vm0, %v12778_v1 }
0x2d70   :  { %12437 = vmatprep.subr.bf16.mxu0 %v12776_v0 }
0x2d73   :  { %12439 = vmatpush3.bf16.msra.mxu0 %v12408_v32 }
0x2d76   :  { %11574 = vmatmul.mubr.f32.vlgmr.msra.gmra.mrb[14].mxu0 %v8845_v30 }
0x2e49   :  { %v9257_v18 = vpop.f32.mrb[14].mxu0 }
0x2e4a   :  { %v12455_v21 = vadd.f32 %v9461_v16, %v9257_v18  ;;  %v11575_v22 = vpop.f32.mrb[15].mxu0 }
0x2e4c   :  { %12675 = vtanh.f32 %v12455_v21 }
0x2e56   :  { %v12676_v19 = vpop.eup %12675 }
0x2e57   :  { %v9262_v50 = vmul.f32 2.5, %v12676_v19 }
0x2e59   :  { %9264 = vst [vmem:[#allocation5 + $0xe] sm:$0x3] %v9262_v50  ;;  %v9267_v1 = vadd.f32 %v9462_v45, %v9262_v50 }
0x2e5b   :  { %v9268_v0 = vsel %vm1134_vm5, %v9267_v1, -inf }
0x2e5c   :  { %9269 = vmax.xlane.f32.xlu0 %v9268_v0 }
0x2ee9   :  { %v9270_v12 = vpop.xlane.xlu0 %9269 }
0x2eea   :  { %vm9271_vm0 = vcmp.ge.f32.partialorder %v9267_v1, %v9270_v12 }
0x2eeb   :  { %v9272_v54 = vsel %vm9271_vm0, %v13036_v5, 128 }
0x2eec   :  { %v9273_v57 = vsel %vm1134_vm5, %v9272_v54, 2147483647 }
0x2eed   :  { %v9275_v58 = vshra.s32 %v9273_v57, 16  ;;  %v9274_v59 = vand.u32 65535, %v9273_v57 }
0x2eef   :  { %v9277_v20 = vcvt.s32.f32 %v9275_v58  ;;  %v9276_v60 = vcvt.s32.f32 %v9274_v59 }
0x2ef1   :  { %9278 = vmin.xlane.f32.xlu1 %v9277_v20 }
0x2f7e   :  { %v9279_v26 = vpop.xlane.xlu1 %9278 }
0x2f7f   :  { %vm9280_vm4 = vcmp.eq.f32.partialorder %v9277_v20, %v9279_v26 }
0x2f80   :  { %v9281_v33 = vsel %vm9280_vm4, %v9276_v60, inf }
0x2f81   :  { %9282 = vmin.xlane.f32.xlu0 %v9281_v33 }
0x2f82   :  { %12712 = shalt.err (!%p12709_p12)
}
0x2f83   :  { %s12713_s11 = scalar_lea.hbm %s14201_s8, 32 }
0x2f84   :  { %p12714_p13 = scmp.ne.s32.totalorder %s14201_s8, %s12713_s11  ;;  %p12717_p0 = scmp.lt.u32.totalorder %s12713_s11, %s14201_s8 }
0x2f86   :  { %p12719_p1 = pnand %p12717_p0, %p12714_p13 }
0x2f88   :  { %12722 = shalt.err (!%p12719_p1)
}
0x2f89   :  { %9321 = dma.vmem_to_hbm [thread:$0]  %s9319_s5, 32, %s14201_s8, [#allocation7]  }
0x2f8a   :  { %s12783_s17 = smov 96   ;;  %s12723_s20 = scalar_lea.vmem %s14142_s28, 256 }
0x2f8b   :  { %p12724_p2 = scmp.ne.s32.totalorder %s14142_s28, %s12723_s20  ;;  %p12728_p3 = scmp.lt.s32.totalorder %s14142_s28, %s14142_s28 }
0x2f8c   :  { %p12729_p4 = scmp.lt.s32.totalorder %s12723_s20, %s12723_s20 }
0x2f8e   :  { %p12730_p5 = por %p12729_p4, %p12728_p3 }
0x2f90   :  { %p12731_p6 = pnand %p12730_p5, %p12724_p2 }
0x2f97   :  { %9294 = vrot.lane.b32.xlu0 %v14100_v63, %s12783_s17 }
0x2f98   :  { %12734 = shalt.err (!%p12731_p6)
}
0x2f99   :  { %s12735_s23 = scalar_lea.hbm %s14199_s6, 256 }
0x2f9a   :  { %p12736_p7 = scmp.ne.s32.totalorder %s14199_s6, %s12735_s23  ;;  %p12739_p8 = scmp.lt.u32.totalorder %s12735_s23, %s14199_s6 }
0x2f9c   :  { %p12741_p9 = pnand %p12739_p8, %p12736_p7 }
0x2f9e   :  { %12744 = shalt.err (!%p12741_p9)
}
0x2f9f   :  { %s12784_s0 = smov 2   ;;  %v9285_v5 = vcvt.f32.s32 %v9279_v26  ;;  %s12785_s26 = smov [#allocation8]  }
0x2fa0   :  { %9309 = dma.vmem_to_hbm [thread:$0]  %s14142_s28, 256, %s14199_s6, [#allocation4], %s12780_s19, %s12780_s19, %s12784_s0  }
0x2fa1   :  { %s9328_s4 = sshll.u32 %s12785_s26, 4  ;;  %v9286_v62 = vshll.u32 %v9285_v5, 16  ;;  %s9329_s4 = int_to_ptr.vmem [resolvable:$true] %s9328_s4 }
0x2fa2   :  { %s12745_s29 = scalar_lea.vmem %s9329_s4, 32  ;;  %p12750_p11 = scmp.lt.s32.totalorder %s9329_s4, %s9329_s4 }
0x2fa3   :  { %p12746_p10 = scmp.ne.s32.totalorder %s9329_s4, %s12745_s29  ;;  %p12751_p12 = scmp.lt.s32.totalorder %s12745_s29, %s12745_s29 }
0x2fa5   :  { %p12752_p13 = por %p12751_p12, %p12750_p11 }
0x2fa7   :  { %p12753_p0 = pnand %p12752_p13, %p12746_p10 }
0x300e   :  { %v9283_v61 = vpop.xlane.xlu0 %9282 }
0x300f   :  { %v9284_v63 = vcvt.f32.s32 %v9283_v61 }
0x3011   :  { %v9287_v2 = vadd.s32 %v9286_v62, %v9284_v63 }
0x3012   :  { %v9295_v3 = vpop.permute.xlu0 %9294 }
0x3013   :  { %9463 = vst.msk [vmem:[%s14200_s7 + $0xe] sm:$0x3] %vm1155_vm8, %v9287_v2 }
0x3014   :  { %9297 = vst.msk [vmem:[#allocation8] sm:$0x3] %vm9291_vm3, %v9295_v3 }
0x3015   :  { %12756 = shalt.err (!%p12753_p0)
}
0x3016   :  { %s12757_s28 = scalar_lea.hbm %s14202_s9, 32 }
0x3017   :  { %p12758_p1 = scmp.ne.s32.totalorder %s14202_s9, %s12757_s28  ;;  %p12761_p2 = scmp.lt.u32.totalorder %s12757_s28, %s14202_s9 }
0x3019   :  { %p12763_p3 = pnand %p12761_p2, %p12758_p1 }
0x301b   :  { %12766 = shalt.err (!%p12763_p3)
}
0x301c   :  { %9331 = dma.vmem_to_hbm [thread:$0]  %s9329_s4, 32, %s14202_s9, [#allocation7]  }
0x301d   :  { %12769 = dma.done.wait [#allocation4], 256  }
0x301e   :  { %12770 = vsyncadd [#allocation4], 4294967040 }
0x301f   :  { %12771 = dma.done.wait [#allocation7], 64  }
0x3020   :  { %12772 = vsyncadd [#allocation7], 4294967232 }
0x3021   :  { %9343 = vsyncpa [#allocation3], 1 }
0x3022   :  { %9344 = vsyncpa [#allocation4], 1 }
0x3023   :  { %9345 = vsyncpa [#allocation7], 1 }

</bundles_post_ra>
